<compile_context>
chip_gen: v5e
topology: v5e:2x2
jax: 0.10.0
libtpu: 0.0.40
codegen_flags: <defaults>
</compile_context>

<pallas_src>
import functools

import jax
import jax.numpy as jnp
from jax import lax
from jax.experimental import pallas as pl
from jax.experimental.pallas import tpu as pltpu


def _make_gru_disc_kernel(num_layers: int, hidden: int, seq_len: int):
    """Build the Pallas kernel body (closes over static config)."""
    H = hidden

    def kernel(*refs):
        # ref order:
        #   gates0 (T,B,3H), whh0 (H,3H), bhh0 (1,3H),
        #   [w4 (2H,4H), b4 (1,4H)] * (L-1),
        #   wout (H,1), bout (1,1), out (B,1)
        gates0_ref = refs[0]
        whh0_ref = refs[1]
        bhh0_ref = refs[2]
        deep_refs = refs[3:3 + 2 * (num_layers - 1)]
        wout_ref = refs[3 + 2 * (num_layers - 1)]
        bout_ref = refs[4 + 2 * (num_layers - 1)]
        out_ref = refs[5 + 2 * (num_layers - 1)]

        B = gates0_ref.shape[1]

        def step(t, hs):
            new_hs = []
            # ---- layer 0: input gates precomputed; one (B,H)x(H,3H) matmul ----
            g0 = gates0_ref[t]                                        # (B, 3H)
            gh = jnp.dot(hs[0], whh0_ref[...],
                         preferred_element_type=jnp.float32) + bhh0_ref[...]
            r = jax.nn.sigmoid(g0[:, :H] + gh[:, :H])
            z = jax.nn.sigmoid(g0[:, H:2 * H] + gh[:, H:2 * H])
            n = jnp.tanh(g0[:, 2 * H:] + r * gh[:, 2 * H:])
            h = (1.0 - z) * n + z * hs[0]
            new_hs.append(h)
            layer_in = h

            # ---- layers > 0: single fused (B,2H)x(2H,4H) matmul per layer ----
            for l in range(1, num_layers):
                w4 = deep_refs[2 * (l - 1)]
                b4 = deep_refs[2 * (l - 1) + 1]
                xin = jnp.concatenate([layer_in, hs[l]], axis=-1)     # (B, 2H)
                g = jnp.dot(xin, w4[...],
                            preferred_element_type=jnp.float32) + b4[...]
                r = jax.nn.sigmoid(g[:, :H])
                z = jax.nn.sigmoid(g[:, H:2 * H])
                n = jnp.tanh(g[:, 2 * H:3 * H] + r * g[:, 3 * H:])
                h = (1.0 - z) * n + z * hs[l]
                new_hs.append(h)
                layer_in = h
            return tuple(new_hs)

        init = tuple(jnp.zeros((B, H), jnp.float32) for _ in range(num_layers))
        # Short, static trip count -> fully unroll for cross-step scheduling.
        hs = lax.fori_loop(0, seq_len, step, init, unroll=True)

        last = hs[num_layers - 1]                  # (B, H) latent at last timestep
        out_ref[...] = (jnp.dot(last, wout_ref[...],
                                preferred_element_type=jnp.float32)
                        + bout_ref[...]).astype(out_ref.dtype)

    return kernel


def init_discriminator_params(key, hidden_size: int, num_layers: int):
    """Deterministic init matching torch shapes (uniform(-1/sqrt(H), 1/sqrt(H))).

    Gate order along the leading axis is (r, z, n), matching torch's row order.
    """
    k = 1.0 / jnp.sqrt(hidden_size)
    params = {"layers": []}
    for l in range(num_layers):
        in_dim = 1 if l == 0 else hidden_size
        key, k1, k2, k3, k4 = jax.random.split(key, 5)
        wih = jax.random.uniform(k1, (3, in_dim, hidden_size), jnp.float32, -k, k)
        whh = jax.random.uniform(k2, (3, hidden_size, hidden_size), jnp.float32, -k, k)
        bih = jax.random.uniform(k3, (3, 1, hidden_size), jnp.float32, -k, k)
        bhh = jax.random.uniform(k4, (3, 1, hidden_size), jnp.float32, -k, k)
        params["layers"].append((wih, whh, bih, bhh))
    key, k5, k6 = jax.random.split(key, 3)
    params["wout"] = jax.random.uniform(k5, (hidden_size, 1), jnp.float32, -k, k)
    params["bout"] = jax.random.uniform(k6, (1, 1), jnp.float32, -k, k)
    return params


@functools.partial(jax.jit, static_argnames=("hidden_size", "num_layers", "horizon"))
def discriminator_forward(history_window, forecast, params, *,
                          hidden_size: int, num_layers: int, horizon: int):
    """history_window: (B, Th, 1), forecast: (B, Ho) -> (B, 1)."""
    B = history_window.shape[0]
    H = hidden_size

    # cat along time, time-major (glue in plain JAX)
    x = jnp.concatenate(
        [history_window.astype(jnp.float32),
         forecast.reshape(B, horizon, 1).astype(jnp.float32)], axis=1)   # (B, T, 1)
    x_tb = jnp.transpose(x[..., 0], (1, 0))                              # (T, B)
    T = x_tb.shape[0]

    # ---------- one-time weight fusion into lane-dense layouts ----------
    wih0, whh0, bih0, bhh0 = params["layers"][0]
    wih0_row = wih0.reshape(3 * H)                 # (3H,)  [r|z|n]
    bih0_row = bih0.reshape(3 * H)                 # (3H,)
    # layer-0 input gates for ALL timesteps (input_size==1 => broadcast FMA)
    gates0 = x_tb[:, :, None] * wih0_row[None, None, :] + bih0_row       # (T, B, 3H)
    whh0_f = jnp.concatenate([whh0[0], whh0[1], whh0[2]], axis=1)        # (H, 3H)
    bhh0_f = bhh0.reshape(1, 3 * H)                                      # (1, 3H)

    flat_inputs = [gates0, whh0_f, bhh0_f]
    zeros_hh = jnp.zeros((H, H), jnp.float32)
    for l in range(1, num_layers):
        wih, whh, bih, bhh = params["layers"][l]
        top = jnp.concatenate([wih[0], wih[1], wih[2], zeros_hh], axis=1)  # (H, 4H)
        bot = jnp.concatenate([whh[0], whh[1], zeros_hh, whh[2]], axis=1)  # (H, 4H)
        w4 = jnp.concatenate([top, bot], axis=0)                           # (2H, 4H)
        b4 = jnp.concatenate([bih[0] + bhh[0], bih[1] + bhh[1],
                              bih[2], bhh[2]], axis=1)                     # (1, 4H)
        flat_inputs += [w4, b4]
    flat_inputs += [params["wout"], params["bout"]]

    vmem = pl.BlockSpec(memory_space=pltpu.MemorySpace.VMEM)
    kernel = _make_gru_disc_kernel(num_layers, H, T)

    # Advisory cost estimate so XLA does not serialize around the custom call.
    flops = int(T * (2 * B * H * 3 * H
                     + (num_layers - 1) * 2 * B * (2 * H) * (4 * H))
                + 2 * B * H)
    transc = int(T * num_layers * 3 * B * H)
    bytes_acc = int(sum(a.size for a in flat_inputs) * 4 + B * 4)

    out = pl.pallas_call(
        kernel,
        out_shape=jax.ShapeDtypeStruct((B, 1), jnp.float32),
        in_specs=[vmem] * len(flat_inputs),
        out_specs=vmem,
        cost_estimate=pl.CostEstimate(flops=flops, transcendentals=transc,
                                      bytes_accessed=bytes_acc),
    )(*flat_inputs)
    return out


def discriminator_forward_ref(history_window, forecast, params, *,
                              hidden_size: int, num_layers: int, horizon: int):
    """Pure-JAX reference (same math, unfused torch-layout weights)."""
    B = history_window.shape[0]
    x = jnp.concatenate(
        [history_window, forecast.reshape(B, horizon, 1)], axis=1)
    seq = jnp.transpose(x, (1, 0, 2)).astype(jnp.float32)      # (T, B, in)

    for l in range(num_layers):
        wih, whh, bih, bhh = params["layers"][l]

        def cell(h, x_t, wih=wih, whh=whh, bih=bih, bhh=bhh):
            gi = [x_t @ wih[g] + bih[g] for g in range(3)]
            gh = [h @ whh[g] + bhh[g] for g in range(3)]
            r = jax.nn.sigmoid(gi[0] + gh[0])
            z = jax.nn.sigmoid(gi[1] + gh[1])
            n = jnp.tanh(gi[2] + r * gh[2])
            h_new = (1.0 - z) * n + z * h
            return h_new, h_new

        h0 = jnp.zeros((B, hidden_size), jnp.float32)
        _, seq = lax.scan(cell, h0, seq)
    last = seq[-1]
    return last @ params["wout"] + params["bout"]


if __name__ == "__main__":
    # Small config consistent with the module's forward signature.
    batch = 2
    history_window_size = 8
    horizon = 4
    hidden_size = 32
    num_layers = 2

    key = jax.random.PRNGKey(0)
    k_hist, k_fore, k_param = jax.random.split(key, 3)
    history_window = jax.random.normal(
        k_hist, (batch, history_window_size, 1), jnp.float32)
    forecast = jax.random.normal(k_fore, (batch, horizon), jnp.float32)
    params = init_discriminator_params(k_param, hidden_size, num_layers)

    out = discriminator_forward(
        history_window, forecast, params,
        hidden_size=hidden_size, num_layers=num_layers, horizon=horizon)
    out = jax.block_until_ready(out)
    assert out.shape == (batch, 1), out.shape

    ref = discriminator_forward_ref(
        history_window, forecast, params,
        hidden_size=hidden_size, num_layers=num_layers, horizon=horizon)
    assert jnp.allclose(out, ref, atol=1e-3, rtol=1e-3), (out, ref)

    print("KERNEL_OK")
</pallas_src>

<mosaic_0001>
module attributes {stable_mosaic.version = 11 : i64} {
  func.func @kernel(%arg0: memref<12x2x96xf32, #tpu.memory_space<vmem>>, %arg1: memref<32x96xf32, #tpu.memory_space<vmem>>, %arg2: memref<1x96xf32, #tpu.memory_space<vmem>>, %arg3: memref<64x128xf32, #tpu.memory_space<vmem>>, %arg4: memref<1x128xf32, #tpu.memory_space<vmem>>, %arg5: memref<32x1xf32, #tpu.memory_space<vmem>>, %arg6: memref<1x1xf32, #tpu.memory_space<vmem>>, %arg7: memref<2x1xf32, #tpu.memory_space<vmem>>) attributes {dimension_semantics = [], scalar_prefetch = 0 : i64, scratch_operands = 0 : i64, tpu.core_type = #tpu.core_type<tc>} {
    %cst = arith.constant 0.000000e+00 : f32
    %0 = vector.broadcast %cst : f32 to vector<2x32xf32>
    %cst_0 = arith.constant 0.000000e+00 : f32
    %1 = vector.broadcast %cst_0 : f32 to vector<2x32xf32>
    %c0_i32 = arith.constant 0 : i32
    %2 = arith.index_cast %c0_i32 : i32 to index
    %c0 = arith.constant 0 : index
    %c0_1 = arith.constant 0 : index
    %3 = vector.load %arg0[%2, %c0, %c0_1] : memref<12x2x96xf32, #tpu.memory_space<vmem>>, vector<1x2x96xf32>
    %4 = vector.shape_cast %3 : vector<1x2x96xf32> to vector<2x96xf32>
    %c0_2 = arith.constant 0 : index
    %c0_3 = arith.constant 0 : index
    %5 = vector.load %arg1[%c0_2, %c0_3] : memref<32x96xf32, #tpu.memory_space<vmem>>, vector<32x96xf32>
    %cst_4 = arith.constant dense<0.000000e+00> : vector<2x96xf32>
    %6 = tpu.matmul %0, %5, %cst_4 {dimension_numbers = #tpu.dot_dimension_numbers<[1], [0], [0], [1], [0, 0, 1, 1], [], []>} : vector<2x32xf32>, vector<32x96xf32>, vector<2x96xf32> -> vector<2x96xf32>
    %c0_5 = arith.constant 0 : index
    %c0_6 = arith.constant 0 : index
    %7 = vector.load %arg2[%c0_5, %c0_6] : memref<1x96xf32, #tpu.memory_space<vmem>>, vector<1x96xf32>
    %8 = vector.broadcast %7 : vector<1x96xf32> to vector<2x96xf32>
    %9 = arith.addf %6, %8 : vector<2x96xf32>
    %10 = vector.extract_strided_slice %4 {offsets = [0, 0], sizes = [2, 32], strides = [1, 1]} : vector<2x96xf32> to vector<2x32xf32>
    %11 = vector.extract_strided_slice %9 {offsets = [0, 0], sizes = [2, 32], strides = [1, 1]} : vector<2x96xf32> to vector<2x32xf32>
    %12 = arith.addf %10, %11 : vector<2x32xf32>
    %13 = arith.negf %12 : vector<2x32xf32>
    %14 = math.exp %13 : vector<2x32xf32>
    %cst_7 = arith.constant 1.000000e+00 : f32
    %15 = vector.broadcast %cst_7 : f32 to vector<2x32xf32>
    %16 = arith.addf %15, %14 : vector<2x32xf32>
    %17 = arith.divf %15, %16 : vector<2x32xf32>
    %18 = vector.extract_strided_slice %4 {offsets = [0, 32], sizes = [2, 32], strides = [1, 1]} : vector<2x96xf32> to vector<2x32xf32>
    %19 = vector.extract_strided_slice %9 {offsets = [0, 32], sizes = [2, 32], strides = [1, 1]} : vector<2x96xf32> to vector<2x32xf32>
    %20 = arith.addf %18, %19 : vector<2x32xf32>
    %21 = arith.negf %20 : vector<2x32xf32>
    %22 = math.exp %21 : vector<2x32xf32>
    %cst_8 = arith.constant 1.000000e+00 : f32
    %23 = vector.broadcast %cst_8 : f32 to vector<2x32xf32>
    %24 = arith.addf %23, %22 : vector<2x32xf32>
    %25 = arith.divf %23, %24 : vector<2x32xf32>
    %26 = vector.extract_strided_slice %4 {offsets = [0, 64], sizes = [2, 32], strides = [1, 1]} : vector<2x96xf32> to vector<2x32xf32>
    %27 = vector.extract_strided_slice %9 {offsets = [0, 64], sizes = [2, 32], strides = [1, 1]} : vector<2x96xf32> to vector<2x32xf32>
    %28 = arith.mulf %17, %27 : vector<2x32xf32>
    %29 = arith.addf %26, %28 : vector<2x32xf32>
    %30 = math.tanh %29 : vector<2x32xf32>
    %cst_9 = arith.constant 1.000000e+00 : f32
    %31 = vector.broadcast %cst_9 : f32 to vector<2x32xf32>
    %32 = arith.subf %31, %25 : vector<2x32xf32>
    %33 = arith.mulf %32, %30 : vector<2x32xf32>
    %34 = arith.mulf %25, %0 : vector<2x32xf32>
    %35 = arith.addf %33, %34 : vector<2x32xf32>
    %36 = tpu.concatenate %35, %1 in 1 : vector<2x32xf32>, vector<2x32xf32> -> vector<2x64xf32>
    %c0_10 = arith.constant 0 : index
    %c0_11 = arith.constant 0 : index
    %37 = vector.load %arg3[%c0_10, %c0_11] : memref<64x128xf32, #tpu.memory_space<vmem>>, vector<64x128xf32>
    %cst_12 = arith.constant dense<0.000000e+00> : vector<2x128xf32>
    %38 = tpu.matmul %36, %37, %cst_12 {dimension_numbers = #tpu.dot_dimension_numbers<[1], [0], [0], [1], [0, 0, 1, 1], [], []>} : vector<2x64xf32>, vector<64x128xf32>, vector<2x128xf32> -> vector<2x128xf32>
    %c0_13 = arith.constant 0 : index
    %c0_14 = arith.constant 0 : index
    %39 = vector.load %arg4[%c0_13, %c0_14] : memref<1x128xf32, #tpu.memory_space<vmem>>, vector<1x128xf32>
    %40 = vector.broadcast %39 : vector<1x128xf32> to vector<2x128xf32>
    %41 = arith.addf %38, %40 : vector<2x128xf32>
    %42 = vector.extract_strided_slice %41 {offsets = [0, 0], sizes = [2, 32], strides = [1, 1]} : vector<2x128xf32> to vector<2x32xf32>
    %43 = arith.negf %42 : vector<2x32xf32>
    %44 = math.exp %43 : vector<2x32xf32>
    %cst_15 = arith.constant 1.000000e+00 : f32
    %45 = vector.broadcast %cst_15 : f32 to vector<2x32xf32>
    %46 = arith.addf %45, %44 : vector<2x32xf32>
    %47 = arith.divf %45, %46 : vector<2x32xf32>
    %48 = vector.extract_strided_slice %41 {offsets = [0, 32], sizes = [2, 32], strides = [1, 1]} : vector<2x128xf32> to vector<2x32xf32>
    %49 = arith.negf %48 : vector<2x32xf32>
    %50 = math.exp %49 : vector<2x32xf32>
    %cst_16 = arith.constant 1.000000e+00 : f32
    %51 = vector.broadcast %cst_16 : f32 to vector<2x32xf32>
    %52 = arith.addf %51, %50 : vector<2x32xf32>
    %53 = arith.divf %51, %52 : vector<2x32xf32>
    %54 = vector.extract_strided_slice %41 {offsets = [0, 64], sizes = [2, 32], strides = [1, 1]} : vector<2x128xf32> to vector<2x32xf32>
    %55 = vector.extract_strided_slice %41 {offsets = [0, 96], sizes = [2, 32], strides = [1, 1]} : vector<2x128xf32> to vector<2x32xf32>
    %56 = arith.mulf %47, %55 : vector<2x32xf32>
    %57 = arith.addf %54, %56 : vector<2x32xf32>
    %58 = math.tanh %57 : vector<2x32xf32>
    %cst_17 = arith.constant 1.000000e+00 : f32
    %59 = vector.broadcast %cst_17 : f32 to vector<2x32xf32>
    %60 = arith.subf %59, %53 : vector<2x32xf32>
    %61 = arith.mulf %60, %58 : vector<2x32xf32>
    %62 = arith.mulf %53, %1 : vector<2x32xf32>
    %63 = arith.addf %61, %62 : vector<2x32xf32>
    %c1_i32 = arith.constant 1 : i32
    %64 = arith.index_cast %c1_i32 : i32 to index
    %c0_18 = arith.constant 0 : index
    %c0_19 = arith.constant 0 : index
    %65 = vector.load %arg0[%64, %c0_18, %c0_19] : memref<12x2x96xf32, #tpu.memory_space<vmem>>, vector<1x2x96xf32>
    %66 = vector.shape_cast %65 : vector<1x2x96xf32> to vector<2x96xf32>
    %c0_20 = arith.constant 0 : index
    %c0_21 = arith.constant 0 : index
    %67 = vector.load %arg1[%c0_20, %c0_21] : memref<32x96xf32, #tpu.memory_space<vmem>>, vector<32x96xf32>
    %cst_22 = arith.constant dense<0.000000e+00> : vector<2x96xf32>
    %68 = tpu.matmul %35, %67, %cst_22 {dimension_numbers = #tpu.dot_dimension_numbers<[1], [0], [0], [1], [0, 0, 1, 1], [], []>} : vector<2x32xf32>, vector<32x96xf32>, vector<2x96xf32> -> vector<2x96xf32>
    %c0_23 = arith.constant 0 : index
    %c0_24 = arith.constant 0 : index
    %69 = vector.load %arg2[%c0_23, %c0_24] : memref<1x96xf32, #tpu.memory_space<vmem>>, vector<1x96xf32>
    %70 = vector.broadcast %69 : vector<1x96xf32> to vector<2x96xf32>
    %71 = arith.addf %68, %70 : vector<2x96xf32>
    %72 = vector.extract_strided_slice %66 {offsets = [0, 0], sizes = [2, 32], strides = [1, 1]} : vector<2x96xf32> to vector<2x32xf32>
    %73 = vector.extract_strided_slice %71 {offsets = [0, 0], sizes = [2, 32], strides = [1, 1]} : vector<2x96xf32> to vector<2x32xf32>
    %74 = arith.addf %72, %73 : vector<2x32xf32>
    %75 = arith.negf %74 : vector<2x32xf32>
    %76 = math.exp %75 : vector<2x32xf32>
    %cst_25 = arith.constant 1.000000e+00 : f32
    %77 = vector.broadcast %cst_25 : f32 to vector<2x32xf32>
    %78 = arith.addf %77, %76 : vector<2x32xf32>
    %79 = arith.divf %77, %78 : vector<2x32xf32>
    %80 = vector.extract_strided_slice %66 {offsets = [0, 32], sizes = [2, 32], strides = [1, 1]} : vector<2x96xf32> to vector<2x32xf32>
    %81 = vector.extract_strided_slice %71 {offsets = [0, 32], sizes = [2, 32], strides = [1, 1]} : vector<2x96xf32> to vector<2x32xf32>
    %82 = arith.addf %80, %81 : vector<2x32xf32>
    %83 = arith.negf %82 : vector<2x32xf32>
    %84 = math.exp %83 : vector<2x32xf32>
    %cst_26 = arith.constant 1.000000e+00 : f32
    %85 = vector.broadcast %cst_26 : f32 to vector<2x32xf32>
    %86 = arith.addf %85, %84 : vector<2x32xf32>
    %87 = arith.divf %85, %86 : vector<2x32xf32>
    %88 = vector.extract_strided_slice %66 {offsets = [0, 64], sizes = [2, 32], strides = [1, 1]} : vector<2x96xf32> to vector<2x32xf32>
    %89 = vector.extract_strided_slice %71 {offsets = [0, 64], sizes = [2, 32], strides = [1, 1]} : vector<2x96xf32> to vector<2x32xf32>
    %90 = arith.mulf %79, %89 : vector<2x32xf32>
    %91 = arith.addf %88, %90 : vector<2x32xf32>
    %92 = math.tanh %91 : vector<2x32xf32>
    %cst_27 = arith.constant 1.000000e+00 : f32
    %93 = vector.broadcast %cst_27 : f32 to vector<2x32xf32>
    %94 = arith.subf %93, %87 : vector<2x32xf32>
    %95 = arith.mulf %94, %92 : vector<2x32xf32>
    %96 = arith.mulf %87, %35 : vector<2x32xf32>
    %97 = arith.addf %95, %96 : vector<2x32xf32>
    %98 = tpu.concatenate %97, %63 in 1 : vector<2x32xf32>, vector<2x32xf32> -> vector<2x64xf32>
    %c0_28 = arith.constant 0 : index
    %c0_29 = arith.constant 0 : index
    %99 = vector.load %arg3[%c0_28, %c0_29] : memref<64x128xf32, #tpu.memory_space<vmem>>, vector<64x128xf32>
    %cst_30 = arith.constant dense<0.000000e+00> : vector<2x128xf32>
    %100 = tpu.matmul %98, %99, %cst_30 {dimension_numbers = #tpu.dot_dimension_numbers<[1], [0], [0], [1], [0, 0, 1, 1], [], []>} : vector<2x64xf32>, vector<64x128xf32>, vector<2x128xf32> -> vector<2x128xf32>
    %c0_31 = arith.constant 0 : index
    %c0_32 = arith.constant 0 : index
    %101 = vector.load %arg4[%c0_31, %c0_32] : memref<1x128xf32, #tpu.memory_space<vmem>>, vector<1x128xf32>
    %102 = vector.broadcast %101 : vector<1x128xf32> to vector<2x128xf32>
    %103 = arith.addf %100, %102 : vector<2x128xf32>
    %104 = vector.extract_strided_slice %103 {offsets = [0, 0], sizes = [2, 32], strides = [1, 1]} : vector<2x128xf32> to vector<2x32xf32>
    %105 = arith.negf %104 : vector<2x32xf32>
    %106 = math.exp %105 : vector<2x32xf32>
    %cst_33 = arith.constant 1.000000e+00 : f32
    %107 = vector.broadcast %cst_33 : f32 to vector<2x32xf32>
    %108 = arith.addf %107, %106 : vector<2x32xf32>
    %109 = arith.divf %107, %108 : vector<2x32xf32>
    %110 = vector.extract_strided_slice %103 {offsets = [0, 32], sizes = [2, 32], strides = [1, 1]} : vector<2x128xf32> to vector<2x32xf32>
    %111 = arith.negf %110 : vector<2x32xf32>
    %112 = math.exp %111 : vector<2x32xf32>
    %cst_34 = arith.constant 1.000000e+00 : f32
    %113 = vector.broadcast %cst_34 : f32 to vector<2x32xf32>
    %114 = arith.addf %113, %112 : vector<2x32xf32>
    %115 = arith.divf %113, %114 : vector<2x32xf32>
    %116 = vector.extract_strided_slice %103 {offsets = [0, 64], sizes = [2, 32], strides = [1, 1]} : vector<2x128xf32> to vector<2x32xf32>
    %117 = vector.extract_strided_slice %103 {offsets = [0, 96], sizes = [2, 32], strides = [1, 1]} : vector<2x128xf32> to vector<2x32xf32>
    %118 = arith.mulf %109, %117 : vector<2x32xf32>
    %119 = arith.addf %116, %118 : vector<2x32xf32>
    %120 = math.tanh %119 : vector<2x32xf32>
    %cst_35 = arith.constant 1.000000e+00 : f32
    %121 = vector.broadcast %cst_35 : f32 to vector<2x32xf32>
    %122 = arith.subf %121, %115 : vector<2x32xf32>
    %123 = arith.mulf %122, %120 : vector<2x32xf32>
    %124 = arith.mulf %115, %63 : vector<2x32xf32>
    %125 = arith.addf %123, %124 : vector<2x32xf32>
    %c2_i32 = arith.constant 2 : i32
    %126 = arith.index_cast %c2_i32 : i32 to index
    %c0_36 = arith.constant 0 : index
    %c0_37 = arith.constant 0 : index
    %127 = vector.load %arg0[%126, %c0_36, %c0_37] : memref<12x2x96xf32, #tpu.memory_space<vmem>>, vector<1x2x96xf32>
    %128 = vector.shape_cast %127 : vector<1x2x96xf32> to vector<2x96xf32>
    %c0_38 = arith.constant 0 : index
    %c0_39 = arith.constant 0 : index
    %129 = vector.load %arg1[%c0_38, %c0_39] : memref<32x96xf32, #tpu.memory_space<vmem>>, vector<32x96xf32>
    %cst_40 = arith.constant dense<0.000000e+00> : vector<2x96xf32>
    %130 = tpu.matmul %97, %129, %cst_40 {dimension_numbers = #tpu.dot_dimension_numbers<[1], [0], [0], [1], [0, 0, 1, 1], [], []>} : vector<2x32xf32>, vector<32x96xf32>, vector<2x96xf32> -> vector<2x96xf32>
    %c0_41 = arith.constant 0 : index
    %c0_42 = arith.constant 0 : index
    %131 = vector.load %arg2[%c0_41, %c0_42] : memref<1x96xf32, #tpu.memory_space<vmem>>, vector<1x96xf32>
    %132 = vector.broadcast %131 : vector<1x96xf32> to vector<2x96xf32>
    %133 = arith.addf %130, %132 : vector<2x96xf32>
    %134 = vector.extract_strided_slice %128 {offsets = [0, 0], sizes = [2, 32], strides = [1, 1]} : vector<2x96xf32> to vector<2x32xf32>
    %135 = vector.extract_strided_slice %133 {offsets = [0, 0], sizes = [2, 32], strides = [1, 1]} : vector<2x96xf32> to vector<2x32xf32>
    %136 = arith.addf %134, %135 : vector<2x32xf32>
    %137 = arith.negf %136 : vector<2x32xf32>
    %138 = math.exp %137 : vector<2x32xf32>
    %cst_43 = arith.constant 1.000000e+00 : f32
    %139 = vector.broadcast %cst_43 : f32 to vector<2x32xf32>
    %140 = arith.addf %139, %138 : vector<2x32xf32>
    %141 = arith.divf %139, %140 : vector<2x32xf32>
    %142 = vector.extract_strided_slice %128 {offsets = [0, 32], sizes = [2, 32], strides = [1, 1]} : vector<2x96xf32> to vector<2x32xf32>
    %143 = vector.extract_strided_slice %133 {offsets = [0, 32], sizes = [2, 32], strides = [1, 1]} : vector<2x96xf32> to vector<2x32xf32>
    %144 = arith.addf %142, %143 : vector<2x32xf32>
    %145 = arith.negf %144 : vector<2x32xf32>
    %146 = math.exp %145 : vector<2x32xf32>
    %cst_44 = arith.constant 1.000000e+00 : f32
    %147 = vector.broadcast %cst_44 : f32 to vector<2x32xf32>
    %148 = arith.addf %147, %146 : vector<2x32xf32>
    %149 = arith.divf %147, %148 : vector<2x32xf32>
    %150 = vector.extract_strided_slice %128 {offsets = [0, 64], sizes = [2, 32], strides = [1, 1]} : vector<2x96xf32> to vector<2x32xf32>
    %151 = vector.extract_strided_slice %133 {offsets = [0, 64], sizes = [2, 32], strides = [1, 1]} : vector<2x96xf32> to vector<2x32xf32>
    %152 = arith.mulf %141, %151 : vector<2x32xf32>
    %153 = arith.addf %150, %152 : vector<2x32xf32>
    %154 = math.tanh %153 : vector<2x32xf32>
    %cst_45 = arith.constant 1.000000e+00 : f32
    %155 = vector.broadcast %cst_45 : f32 to vector<2x32xf32>
    %156 = arith.subf %155, %149 : vector<2x32xf32>
    %157 = arith.mulf %156, %154 : vector<2x32xf32>
    %158 = arith.mulf %149, %97 : vector<2x32xf32>
    %159 = arith.addf %157, %158 : vector<2x32xf32>
    %160 = tpu.concatenate %159, %125 in 1 : vector<2x32xf32>, vector<2x32xf32> -> vector<2x64xf32>
    %c0_46 = arith.constant 0 : index
    %c0_47 = arith.constant 0 : index
    %161 = vector.load %arg3[%c0_46, %c0_47] : memref<64x128xf32, #tpu.memory_space<vmem>>, vector<64x128xf32>
    %cst_48 = arith.constant dense<0.000000e+00> : vector<2x128xf32>
    %162 = tpu.matmul %160, %161, %cst_48 {dimension_numbers = #tpu.dot_dimension_numbers<[1], [0], [0], [1], [0, 0, 1, 1], [], []>} : vector<2x64xf32>, vector<64x128xf32>, vector<2x128xf32> -> vector<2x128xf32>
    %c0_49 = arith.constant 0 : index
    %c0_50 = arith.constant 0 : index
    %163 = vector.load %arg4[%c0_49, %c0_50] : memref<1x128xf32, #tpu.memory_space<vmem>>, vector<1x128xf32>
    %164 = vector.broadcast %163 : vector<1x128xf32> to vector<2x128xf32>
    %165 = arith.addf %162, %164 : vector<2x128xf32>
    %166 = vector.extract_strided_slice %165 {offsets = [0, 0], sizes = [2, 32], strides = [1, 1]} : vector<2x128xf32> to vector<2x32xf32>
    %167 = arith.negf %166 : vector<2x32xf32>
    %168 = math.exp %167 : vector<2x32xf32>
    %cst_51 = arith.constant 1.000000e+00 : f32
    %169 = vector.broadcast %cst_51 : f32 to vector<2x32xf32>
    %170 = arith.addf %169, %168 : vector<2x32xf32>
    %171 = arith.divf %169, %170 : vector<2x32xf32>
    %172 = vector.extract_strided_slice %165 {offsets = [0, 32], sizes = [2, 32], strides = [1, 1]} : vector<2x128xf32> to vector<2x32xf32>
    %173 = arith.negf %172 : vector<2x32xf32>
    %174 = math.exp %173 : vector<2x32xf32>
    %cst_52 = arith.constant 1.000000e+00 : f32
    %175 = vector.broadcast %cst_52 : f32 to vector<2x32xf32>
    %176 = arith.addf %175, %174 : vector<2x32xf32>
    %177 = arith.divf %175, %176 : vector<2x32xf32>
    %178 = vector.extract_strided_slice %165 {offsets = [0, 64], sizes = [2, 32], strides = [1, 1]} : vector<2x128xf32> to vector<2x32xf32>
    %179 = vector.extract_strided_slice %165 {offsets = [0, 96], sizes = [2, 32], strides = [1, 1]} : vector<2x128xf32> to vector<2x32xf32>
    %180 = arith.mulf %171, %179 : vector<2x32xf32>
    %181 = arith.addf %178, %180 : vector<2x32xf32>
    %182 = math.tanh %181 : vector<2x32xf32>
    %cst_53 = arith.constant 1.000000e+00 : f32
    %183 = vector.broadcast %cst_53 : f32 to vector<2x32xf32>
    %184 = arith.subf %183, %177 : vector<2x32xf32>
    %185 = arith.mulf %184, %182 : vector<2x32xf32>
    %186 = arith.mulf %177, %125 : vector<2x32xf32>
    %187 = arith.addf %185, %186 : vector<2x32xf32>
    %c3_i32 = arith.constant 3 : i32
    %188 = arith.index_cast %c3_i32 : i32 to index
    %c0_54 = arith.constant 0 : index
    %c0_55 = arith.constant 0 : index
    %189 = vector.load %arg0[%188, %c0_54, %c0_55] : memref<12x2x96xf32, #tpu.memory_space<vmem>>, vector<1x2x96xf32>
    %190 = vector.shape_cast %189 : vector<1x2x96xf32> to vector<2x96xf32>
    %c0_56 = arith.constant 0 : index
    %c0_57 = arith.constant 0 : index
    %191 = vector.load %arg1[%c0_56, %c0_57] : memref<32x96xf32, #tpu.memory_space<vmem>>, vector<32x96xf32>
    %cst_58 = arith.constant dense<0.000000e+00> : vector<2x96xf32>
    %192 = tpu.matmul %159, %191, %cst_58 {dimension_numbers = #tpu.dot_dimension_numbers<[1], [0], [0], [1], [0, 0, 1, 1], [], []>} : vector<2x32xf32>, vector<32x96xf32>, vector<2x96xf32> -> vector<2x96xf32>
    %c0_59 = arith.constant 0 : index
    %c0_60 = arith.constant 0 : index
    %193 = vector.load %arg2[%c0_59, %c0_60] : memref<1x96xf32, #tpu.memory_space<vmem>>, vector<1x96xf32>
    %194 = vector.broadcast %193 : vector<1x96xf32> to vector<2x96xf32>
    %195 = arith.addf %192, %194 : vector<2x96xf32>
    %196 = vector.extract_strided_slice %190 {offsets = [0, 0], sizes = [2, 32], strides = [1, 1]} : vector<2x96xf32> to vector<2x32xf32>
    %197 = vector.extract_strided_slice %195 {offsets = [0, 0], sizes = [2, 32], strides = [1, 1]} : vector<2x96xf32> to vector<2x32xf32>
    %198 = arith.addf %196, %197 : vector<2x32xf32>
    %199 = arith.negf %198 : vector<2x32xf32>
    %200 = math.exp %199 : vector<2x32xf32>
    %cst_61 = arith.constant 1.000000e+00 : f32
    %201 = vector.broadcast %cst_61 : f32 to vector<2x32xf32>
    %202 = arith.addf %201, %200 : vector<2x32xf32>
    %203 = arith.divf %201, %202 : vector<2x32xf32>
    %204 = vector.extract_strided_slice %190 {offsets = [0, 32], sizes = [2, 32], strides = [1, 1]} : vector<2x96xf32> to vector<2x32xf32>
    %205 = vector.extract_strided_slice %195 {offsets = [0, 32], sizes = [2, 32], strides = [1, 1]} : vector<2x96xf32> to vector<2x32xf32>
    %206 = arith.addf %204, %205 : vector<2x32xf32>
    %207 = arith.negf %206 : vector<2x32xf32>
    %208 = math.exp %207 : vector<2x32xf32>
    %cst_62 = arith.constant 1.000000e+00 : f32
    %209 = vector.broadcast %cst_62 : f32 to vector<2x32xf32>
    %210 = arith.addf %209, %208 : vector<2x32xf32>
    %211 = arith.divf %209, %210 : vector<2x32xf32>
    %212 = vector.extract_strided_slice %190 {offsets = [0, 64], sizes = [2, 32], strides = [1, 1]} : vector<2x96xf32> to vector<2x32xf32>
    %213 = vector.extract_strided_slice %195 {offsets = [0, 64], sizes = [2, 32], strides = [1, 1]} : vector<2x96xf32> to vector<2x32xf32>
    %214 = arith.mulf %203, %213 : vector<2x32xf32>
    %215 = arith.addf %212, %214 : vector<2x32xf32>
    %216 = math.tanh %215 : vector<2x32xf32>
    %cst_63 = arith.constant 1.000000e+00 : f32
    %217 = vector.broadcast %cst_63 : f32 to vector<2x32xf32>
    %218 = arith.subf %217, %211 : vector<2x32xf32>
    %219 = arith.mulf %218, %216 : vector<2x32xf32>
    %220 = arith.mulf %211, %159 : vector<2x32xf32>
    %221 = arith.addf %219, %220 : vector<2x32xf32>
    %222 = tpu.concatenate %221, %187 in 1 : vector<2x32xf32>, vector<2x32xf32> -> vector<2x64xf32>
    %c0_64 = arith.constant 0 : index
    %c0_65 = arith.constant 0 : index
    %223 = vector.load %arg3[%c0_64, %c0_65] : memref<64x128xf32, #tpu.memory_space<vmem>>, vector<64x128xf32>
    %cst_66 = arith.constant dense<0.000000e+00> : vector<2x128xf32>
    %224 = tpu.matmul %222, %223, %cst_66 {dimension_numbers = #tpu.dot_dimension_numbers<[1], [0], [0], [1], [0, 0, 1, 1], [], []>} : vector<2x64xf32>, vector<64x128xf32>, vector<2x128xf32> -> vector<2x128xf32>
    %c0_67 = arith.constant 0 : index
    %c0_68 = arith.constant 0 : index
    %225 = vector.load %arg4[%c0_67, %c0_68] : memref<1x128xf32, #tpu.memory_space<vmem>>, vector<1x128xf32>
    %226 = vector.broadcast %225 : vector<1x128xf32> to vector<2x128xf32>
    %227 = arith.addf %224, %226 : vector<2x128xf32>
    %228 = vector.extract_strided_slice %227 {offsets = [0, 0], sizes = [2, 32], strides = [1, 1]} : vector<2x128xf32> to vector<2x32xf32>
    %229 = arith.negf %228 : vector<2x32xf32>
    %230 = math.exp %229 : vector<2x32xf32>
    %cst_69 = arith.constant 1.000000e+00 : f32
    %231 = vector.broadcast %cst_69 : f32 to vector<2x32xf32>
    %232 = arith.addf %231, %230 : vector<2x32xf32>
    %233 = arith.divf %231, %232 : vector<2x32xf32>
    %234 = vector.extract_strided_slice %227 {offsets = [0, 32], sizes = [2, 32], strides = [1, 1]} : vector<2x128xf32> to vector<2x32xf32>
    %235 = arith.negf %234 : vector<2x32xf32>
    %236 = math.exp %235 : vector<2x32xf32>
    %cst_70 = arith.constant 1.000000e+00 : f32
    %237 = vector.broadcast %cst_70 : f32 to vector<2x32xf32>
    %238 = arith.addf %237, %236 : vector<2x32xf32>
    %239 = arith.divf %237, %238 : vector<2x32xf32>
    %240 = vector.extract_strided_slice %227 {offsets = [0, 64], sizes = [2, 32], strides = [1, 1]} : vector<2x128xf32> to vector<2x32xf32>
    %241 = vector.extract_strided_slice %227 {offsets = [0, 96], sizes = [2, 32], strides = [1, 1]} : vector<2x128xf32> to vector<2x32xf32>
    %242 = arith.mulf %233, %241 : vector<2x32xf32>
    %243 = arith.addf %240, %242 : vector<2x32xf32>
    %244 = math.tanh %243 : vector<2x32xf32>
    %cst_71 = arith.constant 1.000000e+00 : f32
    %245 = vector.broadcast %cst_71 : f32 to vector<2x32xf32>
    %246 = arith.subf %245, %239 : vector<2x32xf32>
    %247 = arith.mulf %246, %244 : vector<2x32xf32>
    %248 = arith.mulf %239, %187 : vector<2x32xf32>
    %249 = arith.addf %247, %248 : vector<2x32xf32>
    %c4_i32 = arith.constant 4 : i32
    %250 = arith.index_cast %c4_i32 : i32 to index
    %c0_72 = arith.constant 0 : index
    %c0_73 = arith.constant 0 : index
    %251 = vector.load %arg0[%250, %c0_72, %c0_73] : memref<12x2x96xf32, #tpu.memory_space<vmem>>, vector<1x2x96xf32>
    %252 = vector.shape_cast %251 : vector<1x2x96xf32> to vector<2x96xf32>
    %c0_74 = arith.constant 0 : index
    %c0_75 = arith.constant 0 : index
    %253 = vector.load %arg1[%c0_74, %c0_75] : memref<32x96xf32, #tpu.memory_space<vmem>>, vector<32x96xf32>
    %cst_76 = arith.constant dense<0.000000e+00> : vector<2x96xf32>
    %254 = tpu.matmul %221, %253, %cst_76 {dimension_numbers = #tpu.dot_dimension_numbers<[1], [0], [0], [1], [0, 0, 1, 1], [], []>} : vector<2x32xf32>, vector<32x96xf32>, vector<2x96xf32> -> vector<2x96xf32>
    %c0_77 = arith.constant 0 : index
    %c0_78 = arith.constant 0 : index
    %255 = vector.load %arg2[%c0_77, %c0_78] : memref<1x96xf32, #tpu.memory_space<vmem>>, vector<1x96xf32>
    %256 = vector.broadcast %255 : vector<1x96xf32> to vector<2x96xf32>
    %257 = arith.addf %254, %256 : vector<2x96xf32>
    %258 = vector.extract_strided_slice %252 {offsets = [0, 0], sizes = [2, 32], strides = [1, 1]} : vector<2x96xf32> to vector<2x32xf32>
    %259 = vector.extract_strided_slice %257 {offsets = [0, 0], sizes = [2, 32], strides = [1, 1]} : vector<2x96xf32> to vector<2x32xf32>
    %260 = arith.addf %258, %259 : vector<2x32xf32>
    %261 = arith.negf %260 : vector<2x32xf32>
    %262 = math.exp %261 : vector<2x32xf32>
    %cst_79 = arith.constant 1.000000e+00 : f32
    %263 = vector.broadcast %cst_79 : f32 to vector<2x32xf32>
    %264 = arith.addf %263, %262 : vector<2x32xf32>
    %265 = arith.divf %263, %264 : vector<2x32xf32>
    %266 = vector.extract_strided_slice %252 {offsets = [0, 32], sizes = [2, 32], strides = [1, 1]} : vector<2x96xf32> to vector<2x32xf32>
    %267 = vector.extract_strided_slice %257 {offsets = [0, 32], sizes = [2, 32], strides = [1, 1]} : vector<2x96xf32> to vector<2x32xf32>
    %268 = arith.addf %266, %267 : vector<2x32xf32>
    %269 = arith.negf %268 : vector<2x32xf32>
    %270 = math.exp %269 : vector<2x32xf32>
    %cst_80 = arith.constant 1.000000e+00 : f32
    %271 = vector.broadcast %cst_80 : f32 to vector<2x32xf32>
    %272 = arith.addf %271, %270 : vector<2x32xf32>
    %273 = arith.divf %271, %272 : vector<2x32xf32>
    %274 = vector.extract_strided_slice %252 {offsets = [0, 64], sizes = [2, 32], strides = [1, 1]} : vector<2x96xf32> to vector<2x32xf32>
    %275 = vector.extract_strided_slice %257 {offsets = [0, 64], sizes = [2, 32], strides = [1, 1]} : vector<2x96xf32> to vector<2x32xf32>
    %276 = arith.mulf %265, %275 : vector<2x32xf32>
    %277 = arith.addf %274, %276 : vector<2x32xf32>
    %278 = math.tanh %277 : vector<2x32xf32>
    %cst_81 = arith.constant 1.000000e+00 : f32
    %279 = vector.broadcast %cst_81 : f32 to vector<2x32xf32>
    %280 = arith.subf %279, %273 : vector<2x32xf32>
    %281 = arith.mulf %280, %278 : vector<2x32xf32>
    %282 = arith.mulf %273, %221 : vector<2x32xf32>
    %283 = arith.addf %281, %282 : vector<2x32xf32>
    %284 = tpu.concatenate %283, %249 in 1 : vector<2x32xf32>, vector<2x32xf32> -> vector<2x64xf32>
    %c0_82 = arith.constant 0 : index
    %c0_83 = arith.constant 0 : index
    %285 = vector.load %arg3[%c0_82, %c0_83] : memref<64x128xf32, #tpu.memory_space<vmem>>, vector<64x128xf32>
    %cst_84 = arith.constant dense<0.000000e+00> : vector<2x128xf32>
    %286 = tpu.matmul %284, %285, %cst_84 {dimension_numbers = #tpu.dot_dimension_numbers<[1], [0], [0], [1], [0, 0, 1, 1], [], []>} : vector<2x64xf32>, vector<64x128xf32>, vector<2x128xf32> -> vector<2x128xf32>
    %c0_85 = arith.constant 0 : index
    %c0_86 = arith.constant 0 : index
    %287 = vector.load %arg4[%c0_85, %c0_86] : memref<1x128xf32, #tpu.memory_space<vmem>>, vector<1x128xf32>
    %288 = vector.broadcast %287 : vector<1x128xf32> to vector<2x128xf32>
    %289 = arith.addf %286, %288 : vector<2x128xf32>
    %290 = vector.extract_strided_slice %289 {offsets = [0, 0], sizes = [2, 32], strides = [1, 1]} : vector<2x128xf32> to vector<2x32xf32>
    %291 = arith.negf %290 : vector<2x32xf32>
    %292 = math.exp %291 : vector<2x32xf32>
    %cst_87 = arith.constant 1.000000e+00 : f32
    %293 = vector.broadcast %cst_87 : f32 to vector<2x32xf32>
    %294 = arith.addf %293, %292 : vector<2x32xf32>
    %295 = arith.divf %293, %294 : vector<2x32xf32>
    %296 = vector.extract_strided_slice %289 {offsets = [0, 32], sizes = [2, 32], strides = [1, 1]} : vector<2x128xf32> to vector<2x32xf32>
    %297 = arith.negf %296 : vector<2x32xf32>
    %298 = math.exp %297 : vector<2x32xf32>
    %cst_88 = arith.constant 1.000000e+00 : f32
    %299 = vector.broadcast %cst_88 : f32 to vector<2x32xf32>
    %300 = arith.addf %299, %298 : vector<2x32xf32>
    %301 = arith.divf %299, %300 : vector<2x32xf32>
    %302 = vector.extract_strided_slice %289 {offsets = [0, 64], sizes = [2, 32], strides = [1, 1]} : vector<2x128xf32> to vector<2x32xf32>
    %303 = vector.extract_strided_slice %289 {offsets = [0, 96], sizes = [2, 32], strides = [1, 1]} : vector<2x128xf32> to vector<2x32xf32>
    %304 = arith.mulf %295, %303 : vector<2x32xf32>
    %305 = arith.addf %302, %304 : vector<2x32xf32>
    %306 = math.tanh %305 : vector<2x32xf32>
    %cst_89 = arith.constant 1.000000e+00 : f32
    %307 = vector.broadcast %cst_89 : f32 to vector<2x32xf32>
    %308 = arith.subf %307, %301 : vector<2x32xf32>
    %309 = arith.mulf %308, %306 : vector<2x32xf32>
    %310 = arith.mulf %301, %249 : vector<2x32xf32>
    %311 = arith.addf %309, %310 : vector<2x32xf32>
    %c5_i32 = arith.constant 5 : i32
    %312 = arith.index_cast %c5_i32 : i32 to index
    %c0_90 = arith.constant 0 : index
    %c0_91 = arith.constant 0 : index
    %313 = vector.load %arg0[%312, %c0_90, %c0_91] : memref<12x2x96xf32, #tpu.memory_space<vmem>>, vector<1x2x96xf32>
    %314 = vector.shape_cast %313 : vector<1x2x96xf32> to vector<2x96xf32>
    %c0_92 = arith.constant 0 : index
    %c0_93 = arith.constant 0 : index
    %315 = vector.load %arg1[%c0_92, %c0_93] : memref<32x96xf32, #tpu.memory_space<vmem>>, vector<32x96xf32>
    %cst_94 = arith.constant dense<0.000000e+00> : vector<2x96xf32>
    %316 = tpu.matmul %283, %315, %cst_94 {dimension_numbers = #tpu.dot_dimension_numbers<[1], [0], [0], [1], [0, 0, 1, 1], [], []>} : vector<2x32xf32>, vector<32x96xf32>, vector<2x96xf32> -> vector<2x96xf32>
    %c0_95 = arith.constant 0 : index
    %c0_96 = arith.constant 0 : index
    %317 = vector.load %arg2[%c0_95, %c0_96] : memref<1x96xf32, #tpu.memory_space<vmem>>, vector<1x96xf32>
    %318 = vector.broadcast %317 : vector<1x96xf32> to vector<2x96xf32>
    %319 = arith.addf %316, %318 : vector<2x96xf32>
    %320 = vector.extract_strided_slice %314 {offsets = [0, 0], sizes = [2, 32], strides = [1, 1]} : vector<2x96xf32> to vector<2x32xf32>
    %321 = vector.extract_strided_slice %319 {offsets = [0, 0], sizes = [2, 32], strides = [1, 1]} : vector<2x96xf32> to vector<2x32xf32>
    %322 = arith.addf %320, %321 : vector<2x32xf32>
    %323 = arith.negf %322 : vector<2x32xf32>
    %324 = math.exp %323 : vector<2x32xf32>
    %cst_97 = arith.constant 1.000000e+00 : f32
    %325 = vector.broadcast %cst_97 : f32 to vector<2x32xf32>
    %326 = arith.addf %325, %324 : vector<2x32xf32>
    %327 = arith.divf %325, %326 : vector<2x32xf32>
    %328 = vector.extract_strided_slice %314 {offsets = [0, 32], sizes = [2, 32], strides = [1, 1]} : vector<2x96xf32> to vector<2x32xf32>
    %329 = vector.extract_strided_slice %319 {offsets = [0, 32], sizes = [2, 32], strides = [1, 1]} : vector<2x96xf32> to vector<2x32xf32>
    %330 = arith.addf %328, %329 : vector<2x32xf32>
    %331 = arith.negf %330 : vector<2x32xf32>
    %332 = math.exp %331 : vector<2x32xf32>
    %cst_98 = arith.constant 1.000000e+00 : f32
    %333 = vector.broadcast %cst_98 : f32 to vector<2x32xf32>
    %334 = arith.addf %333, %332 : vector<2x32xf32>
    %335 = arith.divf %333, %334 : vector<2x32xf32>
    %336 = vector.extract_strided_slice %314 {offsets = [0, 64], sizes = [2, 32], strides = [1, 1]} : vector<2x96xf32> to vector<2x32xf32>
    %337 = vector.extract_strided_slice %319 {offsets = [0, 64], sizes = [2, 32], strides = [1, 1]} : vector<2x96xf32> to vector<2x32xf32>
    %338 = arith.mulf %327, %337 : vector<2x32xf32>
    %339 = arith.addf %336, %338 : vector<2x32xf32>
    %340 = math.tanh %339 : vector<2x32xf32>
    %cst_99 = arith.constant 1.000000e+00 : f32
    %341 = vector.broadcast %cst_99 : f32 to vector<2x32xf32>
    %342 = arith.subf %341, %335 : vector<2x32xf32>
    %343 = arith.mulf %342, %340 : vector<2x32xf32>
    %344 = arith.mulf %335, %283 : vector<2x32xf32>
    %345 = arith.addf %343, %344 : vector<2x32xf32>
    %346 = tpu.concatenate %345, %311 in 1 : vector<2x32xf32>, vector<2x32xf32> -> vector<2x64xf32>
    %c0_100 = arith.constant 0 : index
    %c0_101 = arith.constant 0 : index
    %347 = vector.load %arg3[%c0_100, %c0_101] : memref<64x128xf32, #tpu.memory_space<vmem>>, vector<64x128xf32>
    %cst_102 = arith.constant dense<0.000000e+00> : vector<2x128xf32>
    %348 = tpu.matmul %346, %347, %cst_102 {dimension_numbers = #tpu.dot_dimension_numbers<[1], [0], [0], [1], [0, 0, 1, 1], [], []>} : vector<2x64xf32>, vector<64x128xf32>, vector<2x128xf32> -> vector<2x128xf32>
    %c0_103 = arith.constant 0 : index
    %c0_104 = arith.constant 0 : index
    %349 = vector.load %arg4[%c0_103, %c0_104] : memref<1x128xf32, #tpu.memory_space<vmem>>, vector<1x128xf32>
    %350 = vector.broadcast %349 : vector<1x128xf32> to vector<2x128xf32>
    %351 = arith.addf %348, %350 : vector<2x128xf32>
    %352 = vector.extract_strided_slice %351 {offsets = [0, 0], sizes = [2, 32], strides = [1, 1]} : vector<2x128xf32> to vector<2x32xf32>
    %353 = arith.negf %352 : vector<2x32xf32>
    %354 = math.exp %353 : vector<2x32xf32>
    %cst_105 = arith.constant 1.000000e+00 : f32
    %355 = vector.broadcast %cst_105 : f32 to vector<2x32xf32>
    %356 = arith.addf %355, %354 : vector<2x32xf32>
    %357 = arith.divf %355, %356 : vector<2x32xf32>
    %358 = vector.extract_strided_slice %351 {offsets = [0, 32], sizes = [2, 32], strides = [1, 1]} : vector<2x128xf32> to vector<2x32xf32>
    %359 = arith.negf %358 : vector<2x32xf32>
    %360 = math.exp %359 : vector<2x32xf32>
    %cst_106 = arith.constant 1.000000e+00 : f32
    %361 = vector.broadcast %cst_106 : f32 to vector<2x32xf32>
    %362 = arith.addf %361, %360 : vector<2x32xf32>
    %363 = arith.divf %361, %362 : vector<2x32xf32>
    %364 = vector.extract_strided_slice %351 {offsets = [0, 64], sizes = [2, 32], strides = [1, 1]} : vector<2x128xf32> to vector<2x32xf32>
    %365 = vector.extract_strided_slice %351 {offsets = [0, 96], sizes = [2, 32], strides = [1, 1]} : vector<2x128xf32> to vector<2x32xf32>
    %366 = arith.mulf %357, %365 : vector<2x32xf32>
    %367 = arith.addf %364, %366 : vector<2x32xf32>
    %368 = math.tanh %367 : vector<2x32xf32>
    %cst_107 = arith.constant 1.000000e+00 : f32
    %369 = vector.broadcast %cst_107 : f32 to vector<2x32xf32>
    %370 = arith.subf %369, %363 : vector<2x32xf32>
    %371 = arith.mulf %370, %368 : vector<2x32xf32>
    %372 = arith.mulf %363, %311 : vector<2x32xf32>
    %373 = arith.addf %371, %372 : vector<2x32xf32>
    %c6_i32 = arith.constant 6 : i32
    %374 = arith.index_cast %c6_i32 : i32 to index
    %c0_108 = arith.constant 0 : index
    %c0_109 = arith.constant 0 : index
    %375 = vector.load %arg0[%374, %c0_108, %c0_109] : memref<12x2x96xf32, #tpu.memory_space<vmem>>, vector<1x2x96xf32>
    %376 = vector.shape_cast %375 : vector<1x2x96xf32> to vector<2x96xf32>
    %c0_110 = arith.constant 0 : index
    %c0_111 = arith.constant 0 : index
    %377 = vector.load %arg1[%c0_110, %c0_111] : memref<32x96xf32, #tpu.memory_space<vmem>>, vector<32x96xf32>
    %cst_112 = arith.constant dense<0.000000e+00> : vector<2x96xf32>
    %378 = tpu.matmul %345, %377, %cst_112 {dimension_numbers = #tpu.dot_dimension_numbers<[1], [0], [0], [1], [0, 0, 1, 1], [], []>} : vector<2x32xf32>, vector<32x96xf32>, vector<2x96xf32> -> vector<2x96xf32>
    %c0_113 = arith.constant 0 : index
    %c0_114 = arith.constant 0 : index
    %379 = vector.load %arg2[%c0_113, %c0_114] : memref<1x96xf32, #tpu.memory_space<vmem>>, vector<1x96xf32>
    %380 = vector.broadcast %379 : vector<1x96xf32> to vector<2x96xf32>
    %381 = arith.addf %378, %380 : vector<2x96xf32>
    %382 = vector.extract_strided_slice %376 {offsets = [0, 0], sizes = [2, 32], strides = [1, 1]} : vector<2x96xf32> to vector<2x32xf32>
    %383 = vector.extract_strided_slice %381 {offsets = [0, 0], sizes = [2, 32], strides = [1, 1]} : vector<2x96xf32> to vector<2x32xf32>
    %384 = arith.addf %382, %383 : vector<2x32xf32>
    %385 = arith.negf %384 : vector<2x32xf32>
    %386 = math.exp %385 : vector<2x32xf32>
    %cst_115 = arith.constant 1.000000e+00 : f32
    %387 = vector.broadcast %cst_115 : f32 to vector<2x32xf32>
    %388 = arith.addf %387, %386 : vector<2x32xf32>
    %389 = arith.divf %387, %388 : vector<2x32xf32>
    %390 = vector.extract_strided_slice %376 {offsets = [0, 32], sizes = [2, 32], strides = [1, 1]} : vector<2x96xf32> to vector<2x32xf32>
    %391 = vector.extract_strided_slice %381 {offsets = [0, 32], sizes = [2, 32], strides = [1, 1]} : vector<2x96xf32> to vector<2x32xf32>
    %392 = arith.addf %390, %391 : vector<2x32xf32>
    %393 = arith.negf %392 : vector<2x32xf32>
    %394 = math.exp %393 : vector<2x32xf32>
    %cst_116 = arith.constant 1.000000e+00 : f32
    %395 = vector.broadcast %cst_116 : f32 to vector<2x32xf32>
    %396 = arith.addf %395, %394 : vector<2x32xf32>
    %397 = arith.divf %395, %396 : vector<2x32xf32>
    %398 = vector.extract_strided_slice %376 {offsets = [0, 64], sizes = [2, 32], strides = [1, 1]} : vector<2x96xf32> to vector<2x32xf32>
    %399 = vector.extract_strided_slice %381 {offsets = [0, 64], sizes = [2, 32], strides = [1, 1]} : vector<2x96xf32> to vector<2x32xf32>
    %400 = arith.mulf %389, %399 : vector<2x32xf32>
    %401 = arith.addf %398, %400 : vector<2x32xf32>
    %402 = math.tanh %401 : vector<2x32xf32>
    %cst_117 = arith.constant 1.000000e+00 : f32
    %403 = vector.broadcast %cst_117 : f32 to vector<2x32xf32>
    %404 = arith.subf %403, %397 : vector<2x32xf32>
    %405 = arith.mulf %404, %402 : vector<2x32xf32>
    %406 = arith.mulf %397, %345 : vector<2x32xf32>
    %407 = arith.addf %405, %406 : vector<2x32xf32>
    %408 = tpu.concatenate %407, %373 in 1 : vector<2x32xf32>, vector<2x32xf32> -> vector<2x64xf32>
    %c0_118 = arith.constant 0 : index
    %c0_119 = arith.constant 0 : index
    %409 = vector.load %arg3[%c0_118, %c0_119] : memref<64x128xf32, #tpu.memory_space<vmem>>, vector<64x128xf32>
    %cst_120 = arith.constant dense<0.000000e+00> : vector<2x128xf32>
    %410 = tpu.matmul %408, %409, %cst_120 {dimension_numbers = #tpu.dot_dimension_numbers<[1], [0], [0], [1], [0, 0, 1, 1], [], []>} : vector<2x64xf32>, vector<64x128xf32>, vector<2x128xf32> -> vector<2x128xf32>
    %c0_121 = arith.constant 0 : index
    %c0_122 = arith.constant 0 : index
    %411 = vector.load %arg4[%c0_121, %c0_122] : memref<1x128xf32, #tpu.memory_space<vmem>>, vector<1x128xf32>
    %412 = vector.broadcast %411 : vector<1x128xf32> to vector<2x128xf32>
    %413 = arith.addf %410, %412 : vector<2x128xf32>
    %414 = vector.extract_strided_slice %413 {offsets = [0, 0], sizes = [2, 32], strides = [1, 1]} : vector<2x128xf32> to vector<2x32xf32>
    %415 = arith.negf %414 : vector<2x32xf32>
    %416 = math.exp %415 : vector<2x32xf32>
    %cst_123 = arith.constant 1.000000e+00 : f32
    %417 = vector.broadcast %cst_123 : f32 to vector<2x32xf32>
    %418 = arith.addf %417, %416 : vector<2x32xf32>
    %419 = arith.divf %417, %418 : vector<2x32xf32>
    %420 = vector.extract_strided_slice %413 {offsets = [0, 32], sizes = [2, 32], strides = [1, 1]} : vector<2x128xf32> to vector<2x32xf32>
    %421 = arith.negf %420 : vector<2x32xf32>
    %422 = math.exp %421 : vector<2x32xf32>
    %cst_124 = arith.constant 1.000000e+00 : f32
    %423 = vector.broadcast %cst_124 : f32 to vector<2x32xf32>
    %424 = arith.addf %423, %422 : vector<2x32xf32>
    %425 = arith.divf %423, %424 : vector<2x32xf32>
    %426 = vector.extract_strided_slice %413 {offsets = [0, 64], sizes = [2, 32], strides = [1, 1]} : vector<2x128xf32> to vector<2x32xf32>
    %427 = vector.extract_strided_slice %413 {offsets = [0, 96], sizes = [2, 32], strides = [1, 1]} : vector<2x128xf32> to vector<2x32xf32>
    %428 = arith.mulf %419, %427 : vector<2x32xf32>
    %429 = arith.addf %426, %428 : vector<2x32xf32>
    %430 = math.tanh %429 : vector<2x32xf32>
    %cst_125 = arith.constant 1.000000e+00 : f32
    %431 = vector.broadcast %cst_125 : f32 to vector<2x32xf32>
    %432 = arith.subf %431, %425 : vector<2x32xf32>
    %433 = arith.mulf %432, %430 : vector<2x32xf32>
    %434 = arith.mulf %425, %373 : vector<2x32xf32>
    %435 = arith.addf %433, %434 : vector<2x32xf32>
    %c7_i32 = arith.constant 7 : i32
    %436 = arith.index_cast %c7_i32 : i32 to index
    %c0_126 = arith.constant 0 : index
    %c0_127 = arith.constant 0 : index
    %437 = vector.load %arg0[%436, %c0_126, %c0_127] : memref<12x2x96xf32, #tpu.memory_space<vmem>>, vector<1x2x96xf32>
    %438 = vector.shape_cast %437 : vector<1x2x96xf32> to vector<2x96xf32>
    %c0_128 = arith.constant 0 : index
    %c0_129 = arith.constant 0 : index
    %439 = vector.load %arg1[%c0_128, %c0_129] : memref<32x96xf32, #tpu.memory_space<vmem>>, vector<32x96xf32>
    %cst_130 = arith.constant dense<0.000000e+00> : vector<2x96xf32>
    %440 = tpu.matmul %407, %439, %cst_130 {dimension_numbers = #tpu.dot_dimension_numbers<[1], [0], [0], [1], [0, 0, 1, 1], [], []>} : vector<2x32xf32>, vector<32x96xf32>, vector<2x96xf32> -> vector<2x96xf32>
    %c0_131 = arith.constant 0 : index
    %c0_132 = arith.constant 0 : index
    %441 = vector.load %arg2[%c0_131, %c0_132] : memref<1x96xf32, #tpu.memory_space<vmem>>, vector<1x96xf32>
    %442 = vector.broadcast %441 : vector<1x96xf32> to vector<2x96xf32>
    %443 = arith.addf %440, %442 : vector<2x96xf32>
    %444 = vector.extract_strided_slice %438 {offsets = [0, 0], sizes = [2, 32], strides = [1, 1]} : vector<2x96xf32> to vector<2x32xf32>
    %445 = vector.extract_strided_slice %443 {offsets = [0, 0], sizes = [2, 32], strides = [1, 1]} : vector<2x96xf32> to vector<2x32xf32>
    %446 = arith.addf %444, %445 : vector<2x32xf32>
    %447 = arith.negf %446 : vector<2x32xf32>
    %448 = math.exp %447 : vector<2x32xf32>
    %cst_133 = arith.constant 1.000000e+00 : f32
    %449 = vector.broadcast %cst_133 : f32 to vector<2x32xf32>
    %450 = arith.addf %449, %448 : vector<2x32xf32>
    %451 = arith.divf %449, %450 : vector<2x32xf32>
    %452 = vector.extract_strided_slice %438 {offsets = [0, 32], sizes = [2, 32], strides = [1, 1]} : vector<2x96xf32> to vector<2x32xf32>
    %453 = vector.extract_strided_slice %443 {offsets = [0, 32], sizes = [2, 32], strides = [1, 1]} : vector<2x96xf32> to vector<2x32xf32>
    %454 = arith.addf %452, %453 : vector<2x32xf32>
    %455 = arith.negf %454 : vector<2x32xf32>
    %456 = math.exp %455 : vector<2x32xf32>
    %cst_134 = arith.constant 1.000000e+00 : f32
    %457 = vector.broadcast %cst_134 : f32 to vector<2x32xf32>
    %458 = arith.addf %457, %456 : vector<2x32xf32>
    %459 = arith.divf %457, %458 : vector<2x32xf32>
    %460 = vector.extract_strided_slice %438 {offsets = [0, 64], sizes = [2, 32], strides = [1, 1]} : vector<2x96xf32> to vector<2x32xf32>
    %461 = vector.extract_strided_slice %443 {offsets = [0, 64], sizes = [2, 32], strides = [1, 1]} : vector<2x96xf32> to vector<2x32xf32>
    %462 = arith.mulf %451, %461 : vector<2x32xf32>
    %463 = arith.addf %460, %462 : vector<2x32xf32>
    %464 = math.tanh %463 : vector<2x32xf32>
    %cst_135 = arith.constant 1.000000e+00 : f32
    %465 = vector.broadcast %cst_135 : f32 to vector<2x32xf32>
    %466 = arith.subf %465, %459 : vector<2x32xf32>
    %467 = arith.mulf %466, %464 : vector<2x32xf32>
    %468 = arith.mulf %459, %407 : vector<2x32xf32>
    %469 = arith.addf %467, %468 : vector<2x32xf32>
    %470 = tpu.concatenate %469, %435 in 1 : vector<2x32xf32>, vector<2x32xf32> -> vector<2x64xf32>
    %c0_136 = arith.constant 0 : index
    %c0_137 = arith.constant 0 : index
    %471 = vector.load %arg3[%c0_136, %c0_137] : memref<64x128xf32, #tpu.memory_space<vmem>>, vector<64x128xf32>
    %cst_138 = arith.constant dense<0.000000e+00> : vector<2x128xf32>
    %472 = tpu.matmul %470, %471, %cst_138 {dimension_numbers = #tpu.dot_dimension_numbers<[1], [0], [0], [1], [0, 0, 1, 1], [], []>} : vector<2x64xf32>, vector<64x128xf32>, vector<2x128xf32> -> vector<2x128xf32>
    %c0_139 = arith.constant 0 : index
    %c0_140 = arith.constant 0 : index
    %473 = vector.load %arg4[%c0_139, %c0_140] : memref<1x128xf32, #tpu.memory_space<vmem>>, vector<1x128xf32>
    %474 = vector.broadcast %473 : vector<1x128xf32> to vector<2x128xf32>
    %475 = arith.addf %472, %474 : vector<2x128xf32>
    %476 = vector.extract_strided_slice %475 {offsets = [0, 0], sizes = [2, 32], strides = [1, 1]} : vector<2x128xf32> to vector<2x32xf32>
    %477 = arith.negf %476 : vector<2x32xf32>
    %478 = math.exp %477 : vector<2x32xf32>
    %cst_141 = arith.constant 1.000000e+00 : f32
    %479 = vector.broadcast %cst_141 : f32 to vector<2x32xf32>
    %480 = arith.addf %479, %478 : vector<2x32xf32>
    %481 = arith.divf %479, %480 : vector<2x32xf32>
    %482 = vector.extract_strided_slice %475 {offsets = [0, 32], sizes = [2, 32], strides = [1, 1]} : vector<2x128xf32> to vector<2x32xf32>
    %483 = arith.negf %482 : vector<2x32xf32>
    %484 = math.exp %483 : vector<2x32xf32>
    %cst_142 = arith.constant 1.000000e+00 : f32
    %485 = vector.broadcast %cst_142 : f32 to vector<2x32xf32>
    %486 = arith.addf %485, %484 : vector<2x32xf32>
    %487 = arith.divf %485, %486 : vector<2x32xf32>
    %488 = vector.extract_strided_slice %475 {offsets = [0, 64], sizes = [2, 32], strides = [1, 1]} : vector<2x128xf32> to vector<2x32xf32>
    %489 = vector.extract_strided_slice %475 {offsets = [0, 96], sizes = [2, 32], strides = [1, 1]} : vector<2x128xf32> to vector<2x32xf32>
    %490 = arith.mulf %481, %489 : vector<2x32xf32>
    %491 = arith.addf %488, %490 : vector<2x32xf32>
    %492 = math.tanh %491 : vector<2x32xf32>
    %cst_143 = arith.constant 1.000000e+00 : f32
    %493 = vector.broadcast %cst_143 : f32 to vector<2x32xf32>
    %494 = arith.subf %493, %487 : vector<2x32xf32>
    %495 = arith.mulf %494, %492 : vector<2x32xf32>
    %496 = arith.mulf %487, %435 : vector<2x32xf32>
    %497 = arith.addf %495, %496 : vector<2x32xf32>
    %c8_i32 = arith.constant 8 : i32
    %498 = arith.index_cast %c8_i32 : i32 to index
    %c0_144 = arith.constant 0 : index
    %c0_145 = arith.constant 0 : index
    %499 = vector.load %arg0[%498, %c0_144, %c0_145] : memref<12x2x96xf32, #tpu.memory_space<vmem>>, vector<1x2x96xf32>
    %500 = vector.shape_cast %499 : vector<1x2x96xf32> to vector<2x96xf32>
    %c0_146 = arith.constant 0 : index
    %c0_147 = arith.constant 0 : index
    %501 = vector.load %arg1[%c0_146, %c0_147] : memref<32x96xf32, #tpu.memory_space<vmem>>, vector<32x96xf32>
    %cst_148 = arith.constant dense<0.000000e+00> : vector<2x96xf32>
    %502 = tpu.matmul %469, %501, %cst_148 {dimension_numbers = #tpu.dot_dimension_numbers<[1], [0], [0], [1], [0, 0, 1, 1], [], []>} : vector<2x32xf32>, vector<32x96xf32>, vector<2x96xf32> -> vector<2x96xf32>
    %c0_149 = arith.constant 0 : index
    %c0_150 = arith.constant 0 : index
    %503 = vector.load %arg2[%c0_149, %c0_150] : memref<1x96xf32, #tpu.memory_space<vmem>>, vector<1x96xf32>
    %504 = vector.broadcast %503 : vector<1x96xf32> to vector<2x96xf32>
    %505 = arith.addf %502, %504 : vector<2x96xf32>
    %506 = vector.extract_strided_slice %500 {offsets = [0, 0], sizes = [2, 32], strides = [1, 1]} : vector<2x96xf32> to vector<2x32xf32>
    %507 = vector.extract_strided_slice %505 {offsets = [0, 0], sizes = [2, 32], strides = [1, 1]} : vector<2x96xf32> to vector<2x32xf32>
    %508 = arith.addf %506, %507 : vector<2x32xf32>
    %509 = arith.negf %508 : vector<2x32xf32>
    %510 = math.exp %509 : vector<2x32xf32>
    %cst_151 = arith.constant 1.000000e+00 : f32
    %511 = vector.broadcast %cst_151 : f32 to vector<2x32xf32>
    %512 = arith.addf %511, %510 : vector<2x32xf32>
    %513 = arith.divf %511, %512 : vector<2x32xf32>
    %514 = vector.extract_strided_slice %500 {offsets = [0, 32], sizes = [2, 32], strides = [1, 1]} : vector<2x96xf32> to vector<2x32xf32>
    %515 = vector.extract_strided_slice %505 {offsets = [0, 32], sizes = [2, 32], strides = [1, 1]} : vector<2x96xf32> to vector<2x32xf32>
    %516 = arith.addf %514, %515 : vector<2x32xf32>
    %517 = arith.negf %516 : vector<2x32xf32>
    %518 = math.exp %517 : vector<2x32xf32>
    %cst_152 = arith.constant 1.000000e+00 : f32
    %519 = vector.broadcast %cst_152 : f32 to vector<2x32xf32>
    %520 = arith.addf %519, %518 : vector<2x32xf32>
    %521 = arith.divf %519, %520 : vector<2x32xf32>
    %522 = vector.extract_strided_slice %500 {offsets = [0, 64], sizes = [2, 32], strides = [1, 1]} : vector<2x96xf32> to vector<2x32xf32>
    %523 = vector.extract_strided_slice %505 {offsets = [0, 64], sizes = [2, 32], strides = [1, 1]} : vector<2x96xf32> to vector<2x32xf32>
    %524 = arith.mulf %513, %523 : vector<2x32xf32>
    %525 = arith.addf %522, %524 : vector<2x32xf32>
    %526 = math.tanh %525 : vector<2x32xf32>
    %cst_153 = arith.constant 1.000000e+00 : f32
    %527 = vector.broadcast %cst_153 : f32 to vector<2x32xf32>
    %528 = arith.subf %527, %521 : vector<2x32xf32>
    %529 = arith.mulf %528, %526 : vector<2x32xf32>
    %530 = arith.mulf %521, %469 : vector<2x32xf32>
    %531 = arith.addf %529, %530 : vector<2x32xf32>
    %532 = tpu.concatenate %531, %497 in 1 : vector<2x32xf32>, vector<2x32xf32> -> vector<2x64xf32>
    %c0_154 = arith.constant 0 : index
    %c0_155 = arith.constant 0 : index
    %533 = vector.load %arg3[%c0_154, %c0_155] : memref<64x128xf32, #tpu.memory_space<vmem>>, vector<64x128xf32>
    %cst_156 = arith.constant dense<0.000000e+00> : vector<2x128xf32>
    %534 = tpu.matmul %532, %533, %cst_156 {dimension_numbers = #tpu.dot_dimension_numbers<[1], [0], [0], [1], [0, 0, 1, 1], [], []>} : vector<2x64xf32>, vector<64x128xf32>, vector<2x128xf32> -> vector<2x128xf32>
    %c0_157 = arith.constant 0 : index
    %c0_158 = arith.constant 0 : index
    %535 = vector.load %arg4[%c0_157, %c0_158] : memref<1x128xf32, #tpu.memory_space<vmem>>, vector<1x128xf32>
    %536 = vector.broadcast %535 : vector<1x128xf32> to vector<2x128xf32>
    %537 = arith.addf %534, %536 : vector<2x128xf32>
    %538 = vector.extract_strided_slice %537 {offsets = [0, 0], sizes = [2, 32], strides = [1, 1]} : vector<2x128xf32> to vector<2x32xf32>
    %539 = arith.negf %538 : vector<2x32xf32>
    %540 = math.exp %539 : vector<2x32xf32>
    %cst_159 = arith.constant 1.000000e+00 : f32
    %541 = vector.broadcast %cst_159 : f32 to vector<2x32xf32>
    %542 = arith.addf %541, %540 : vector<2x32xf32>
    %543 = arith.divf %541, %542 : vector<2x32xf32>
    %544 = vector.extract_strided_slice %537 {offsets = [0, 32], sizes = [2, 32], strides = [1, 1]} : vector<2x128xf32> to vector<2x32xf32>
    %545 = arith.negf %544 : vector<2x32xf32>
    %546 = math.exp %545 : vector<2x32xf32>
    %cst_160 = arith.constant 1.000000e+00 : f32
    %547 = vector.broadcast %cst_160 : f32 to vector<2x32xf32>
    %548 = arith.addf %547, %546 : vector<2x32xf32>
    %549 = arith.divf %547, %548 : vector<2x32xf32>
    %550 = vector.extract_strided_slice %537 {offsets = [0, 64], sizes = [2, 32], strides = [1, 1]} : vector<2x128xf32> to vector<2x32xf32>
    %551 = vector.extract_strided_slice %537 {offsets = [0, 96], sizes = [2, 32], strides = [1, 1]} : vector<2x128xf32> to vector<2x32xf32>
    %552 = arith.mulf %543, %551 : vector<2x32xf32>
    %553 = arith.addf %550, %552 : vector<2x32xf32>
    %554 = math.tanh %553 : vector<2x32xf32>
    %cst_161 = arith.constant 1.000000e+00 : f32
    %555 = vector.broadcast %cst_161 : f32 to vector<2x32xf32>
    %556 = arith.subf %555, %549 : vector<2x32xf32>
    %557 = arith.mulf %556, %554 : vector<2x32xf32>
    %558 = arith.mulf %549, %497 : vector<2x32xf32>
    %559 = arith.addf %557, %558 : vector<2x32xf32>
    %c9_i32 = arith.constant 9 : i32
    %560 = arith.index_cast %c9_i32 : i32 to index
    %c0_162 = arith.constant 0 : index
    %c0_163 = arith.constant 0 : index
    %561 = vector.load %arg0[%560, %c0_162, %c0_163] : memref<12x2x96xf32, #tpu.memory_space<vmem>>, vector<1x2x96xf32>
    %562 = vector.shape_cast %561 : vector<1x2x96xf32> to vector<2x96xf32>
    %c0_164 = arith.constant 0 : index
    %c0_165 = arith.constant 0 : index
    %563 = vector.load %arg1[%c0_164, %c0_165] : memref<32x96xf32, #tpu.memory_space<vmem>>, vector<32x96xf32>
    %cst_166 = arith.constant dense<0.000000e+00> : vector<2x96xf32>
    %564 = tpu.matmul %531, %563, %cst_166 {dimension_numbers = #tpu.dot_dimension_numbers<[1], [0], [0], [1], [0, 0, 1, 1], [], []>} : vector<2x32xf32>, vector<32x96xf32>, vector<2x96xf32> -> vector<2x96xf32>
    %c0_167 = arith.constant 0 : index
    %c0_168 = arith.constant 0 : index
    %565 = vector.load %arg2[%c0_167, %c0_168] : memref<1x96xf32, #tpu.memory_space<vmem>>, vector<1x96xf32>
    %566 = vector.broadcast %565 : vector<1x96xf32> to vector<2x96xf32>
    %567 = arith.addf %564, %566 : vector<2x96xf32>
    %568 = vector.extract_strided_slice %562 {offsets = [0, 0], sizes = [2, 32], strides = [1, 1]} : vector<2x96xf32> to vector<2x32xf32>
    %569 = vector.extract_strided_slice %567 {offsets = [0, 0], sizes = [2, 32], strides = [1, 1]} : vector<2x96xf32> to vector<2x32xf32>
    %570 = arith.addf %568, %569 : vector<2x32xf32>
    %571 = arith.negf %570 : vector<2x32xf32>
    %572 = math.exp %571 : vector<2x32xf32>
    %cst_169 = arith.constant 1.000000e+00 : f32
    %573 = vector.broadcast %cst_169 : f32 to vector<2x32xf32>
    %574 = arith.addf %573, %572 : vector<2x32xf32>
    %575 = arith.divf %573, %574 : vector<2x32xf32>
    %576 = vector.extract_strided_slice %562 {offsets = [0, 32], sizes = [2, 32], strides = [1, 1]} : vector<2x96xf32> to vector<2x32xf32>
    %577 = vector.extract_strided_slice %567 {offsets = [0, 32], sizes = [2, 32], strides = [1, 1]} : vector<2x96xf32> to vector<2x32xf32>
    %578 = arith.addf %576, %577 : vector<2x32xf32>
    %579 = arith.negf %578 : vector<2x32xf32>
    %580 = math.exp %579 : vector<2x32xf32>
    %cst_170 = arith.constant 1.000000e+00 : f32
    %581 = vector.broadcast %cst_170 : f32 to vector<2x32xf32>
    %582 = arith.addf %581, %580 : vector<2x32xf32>
    %583 = arith.divf %581, %582 : vector<2x32xf32>
    %584 = vector.extract_strided_slice %562 {offsets = [0, 64], sizes = [2, 32], strides = [1, 1]} : vector<2x96xf32> to vector<2x32xf32>
    %585 = vector.extract_strided_slice %567 {offsets = [0, 64], sizes = [2, 32], strides = [1, 1]} : vector<2x96xf32> to vector<2x32xf32>
    %586 = arith.mulf %575, %585 : vector<2x32xf32>
    %587 = arith.addf %584, %586 : vector<2x32xf32>
    %588 = math.tanh %587 : vector<2x32xf32>
    %cst_171 = arith.constant 1.000000e+00 : f32
    %589 = vector.broadcast %cst_171 : f32 to vector<2x32xf32>
    %590 = arith.subf %589, %583 : vector<2x32xf32>
    %591 = arith.mulf %590, %588 : vector<2x32xf32>
    %592 = arith.mulf %583, %531 : vector<2x32xf32>
    %593 = arith.addf %591, %592 : vector<2x32xf32>
    %594 = tpu.concatenate %593, %559 in 1 : vector<2x32xf32>, vector<2x32xf32> -> vector<2x64xf32>
    %c0_172 = arith.constant 0 : index
    %c0_173 = arith.constant 0 : index
    %595 = vector.load %arg3[%c0_172, %c0_173] : memref<64x128xf32, #tpu.memory_space<vmem>>, vector<64x128xf32>
    %cst_174 = arith.constant dense<0.000000e+00> : vector<2x128xf32>
    %596 = tpu.matmul %594, %595, %cst_174 {dimension_numbers = #tpu.dot_dimension_numbers<[1], [0], [0], [1], [0, 0, 1, 1], [], []>} : vector<2x64xf32>, vector<64x128xf32>, vector<2x128xf32> -> vector<2x128xf32>
    %c0_175 = arith.constant 0 : index
    %c0_176 = arith.constant 0 : index
    %597 = vector.load %arg4[%c0_175, %c0_176] : memref<1x128xf32, #tpu.memory_space<vmem>>, vector<1x128xf32>
    %598 = vector.broadcast %597 : vector<1x128xf32> to vector<2x128xf32>
    %599 = arith.addf %596, %598 : vector<2x128xf32>
    %600 = vector.extract_strided_slice %599 {offsets = [0, 0], sizes = [2, 32], strides = [1, 1]} : vector<2x128xf32> to vector<2x32xf32>
    %601 = arith.negf %600 : vector<2x32xf32>
    %602 = math.exp %601 : vector<2x32xf32>
    %cst_177 = arith.constant 1.000000e+00 : f32
    %603 = vector.broadcast %cst_177 : f32 to vector<2x32xf32>
    %604 = arith.addf %603, %602 : vector<2x32xf32>
    %605 = arith.divf %603, %604 : vector<2x32xf32>
    %606 = vector.extract_strided_slice %599 {offsets = [0, 32], sizes = [2, 32], strides = [1, 1]} : vector<2x128xf32> to vector<2x32xf32>
    %607 = arith.negf %606 : vector<2x32xf32>
    %608 = math.exp %607 : vector<2x32xf32>
    %cst_178 = arith.constant 1.000000e+00 : f32
    %609 = vector.broadcast %cst_178 : f32 to vector<2x32xf32>
    %610 = arith.addf %609, %608 : vector<2x32xf32>
    %611 = arith.divf %609, %610 : vector<2x32xf32>
    %612 = vector.extract_strided_slice %599 {offsets = [0, 64], sizes = [2, 32], strides = [1, 1]} : vector<2x128xf32> to vector<2x32xf32>
    %613 = vector.extract_strided_slice %599 {offsets = [0, 96], sizes = [2, 32], strides = [1, 1]} : vector<2x128xf32> to vector<2x32xf32>
    %614 = arith.mulf %605, %613 : vector<2x32xf32>
    %615 = arith.addf %612, %614 : vector<2x32xf32>
    %616 = math.tanh %615 : vector<2x32xf32>
    %cst_179 = arith.constant 1.000000e+00 : f32
    %617 = vector.broadcast %cst_179 : f32 to vector<2x32xf32>
    %618 = arith.subf %617, %611 : vector<2x32xf32>
    %619 = arith.mulf %618, %616 : vector<2x32xf32>
    %620 = arith.mulf %611, %559 : vector<2x32xf32>
    %621 = arith.addf %619, %620 : vector<2x32xf32>
    %c10_i32 = arith.constant 10 : i32
    %622 = arith.index_cast %c10_i32 : i32 to index
    %c0_180 = arith.constant 0 : index
    %c0_181 = arith.constant 0 : index
    %623 = vector.load %arg0[%622, %c0_180, %c0_181] : memref<12x2x96xf32, #tpu.memory_space<vmem>>, vector<1x2x96xf32>
    %624 = vector.shape_cast %623 : vector<1x2x96xf32> to vector<2x96xf32>
    %c0_182 = arith.constant 0 : index
    %c0_183 = arith.constant 0 : index
    %625 = vector.load %arg1[%c0_182, %c0_183] : memref<32x96xf32, #tpu.memory_space<vmem>>, vector<32x96xf32>
    %cst_184 = arith.constant dense<0.000000e+00> : vector<2x96xf32>
    %626 = tpu.matmul %593, %625, %cst_184 {dimension_numbers = #tpu.dot_dimension_numbers<[1], [0], [0], [1], [0, 0, 1, 1], [], []>} : vector<2x32xf32>, vector<32x96xf32>, vector<2x96xf32> -> vector<2x96xf32>
    %c0_185 = arith.constant 0 : index
    %c0_186 = arith.constant 0 : index
    %627 = vector.load %arg2[%c0_185, %c0_186] : memref<1x96xf32, #tpu.memory_space<vmem>>, vector<1x96xf32>
    %628 = vector.broadcast %627 : vector<1x96xf32> to vector<2x96xf32>
    %629 = arith.addf %626, %628 : vector<2x96xf32>
    %630 = vector.extract_strided_slice %624 {offsets = [0, 0], sizes = [2, 32], strides = [1, 1]} : vector<2x96xf32> to vector<2x32xf32>
    %631 = vector.extract_strided_slice %629 {offsets = [0, 0], sizes = [2, 32], strides = [1, 1]} : vector<2x96xf32> to vector<2x32xf32>
    %632 = arith.addf %630, %631 : vector<2x32xf32>
    %633 = arith.negf %632 : vector<2x32xf32>
    %634 = math.exp %633 : vector<2x32xf32>
    %cst_187 = arith.constant 1.000000e+00 : f32
    %635 = vector.broadcast %cst_187 : f32 to vector<2x32xf32>
    %636 = arith.addf %635, %634 : vector<2x32xf32>
    %637 = arith.divf %635, %636 : vector<2x32xf32>
    %638 = vector.extract_strided_slice %624 {offsets = [0, 32], sizes = [2, 32], strides = [1, 1]} : vector<2x96xf32> to vector<2x32xf32>
    %639 = vector.extract_strided_slice %629 {offsets = [0, 32], sizes = [2, 32], strides = [1, 1]} : vector<2x96xf32> to vector<2x32xf32>
    %640 = arith.addf %638, %639 : vector<2x32xf32>
    %641 = arith.negf %640 : vector<2x32xf32>
    %642 = math.exp %641 : vector<2x32xf32>
    %cst_188 = arith.constant 1.000000e+00 : f32
    %643 = vector.broadcast %cst_188 : f32 to vector<2x32xf32>
    %644 = arith.addf %643, %642 : vector<2x32xf32>
    %645 = arith.divf %643, %644 : vector<2x32xf32>
    %646 = vector.extract_strided_slice %624 {offsets = [0, 64], sizes = [2, 32], strides = [1, 1]} : vector<2x96xf32> to vector<2x32xf32>
    %647 = vector.extract_strided_slice %629 {offsets = [0, 64], sizes = [2, 32], strides = [1, 1]} : vector<2x96xf32> to vector<2x32xf32>
    %648 = arith.mulf %637, %647 : vector<2x32xf32>
    %649 = arith.addf %646, %648 : vector<2x32xf32>
    %650 = math.tanh %649 : vector<2x32xf32>
    %cst_189 = arith.constant 1.000000e+00 : f32
    %651 = vector.broadcast %cst_189 : f32 to vector<2x32xf32>
    %652 = arith.subf %651, %645 : vector<2x32xf32>
    %653 = arith.mulf %652, %650 : vector<2x32xf32>
    %654 = arith.mulf %645, %593 : vector<2x32xf32>
    %655 = arith.addf %653, %654 : vector<2x32xf32>
    %656 = tpu.concatenate %655, %621 in 1 : vector<2x32xf32>, vector<2x32xf32> -> vector<2x64xf32>
    %c0_190 = arith.constant 0 : index
    %c0_191 = arith.constant 0 : index
    %657 = vector.load %arg3[%c0_190, %c0_191] : memref<64x128xf32, #tpu.memory_space<vmem>>, vector<64x128xf32>
    %cst_192 = arith.constant dense<0.000000e+00> : vector<2x128xf32>
    %658 = tpu.matmul %656, %657, %cst_192 {dimension_numbers = #tpu.dot_dimension_numbers<[1], [0], [0], [1], [0, 0, 1, 1], [], []>} : vector<2x64xf32>, vector<64x128xf32>, vector<2x128xf32> -> vector<2x128xf32>
    %c0_193 = arith.constant 0 : index
    %c0_194 = arith.constant 0 : index
    %659 = vector.load %arg4[%c0_193, %c0_194] : memref<1x128xf32, #tpu.memory_space<vmem>>, vector<1x128xf32>
    %660 = vector.broadcast %659 : vector<1x128xf32> to vector<2x128xf32>
    %661 = arith.addf %658, %660 : vector<2x128xf32>
    %662 = vector.extract_strided_slice %661 {offsets = [0, 0], sizes = [2, 32], strides = [1, 1]} : vector<2x128xf32> to vector<2x32xf32>
    %663 = arith.negf %662 : vector<2x32xf32>
    %664 = math.exp %663 : vector<2x32xf32>
    %cst_195 = arith.constant 1.000000e+00 : f32
    %665 = vector.broadcast %cst_195 : f32 to vector<2x32xf32>
    %666 = arith.addf %665, %664 : vector<2x32xf32>
    %667 = arith.divf %665, %666 : vector<2x32xf32>
    %668 = vector.extract_strided_slice %661 {offsets = [0, 32], sizes = [2, 32], strides = [1, 1]} : vector<2x128xf32> to vector<2x32xf32>
    %669 = arith.negf %668 : vector<2x32xf32>
    %670 = math.exp %669 : vector<2x32xf32>
    %cst_196 = arith.constant 1.000000e+00 : f32
    %671 = vector.broadcast %cst_196 : f32 to vector<2x32xf32>
    %672 = arith.addf %671, %670 : vector<2x32xf32>
    %673 = arith.divf %671, %672 : vector<2x32xf32>
    %674 = vector.extract_strided_slice %661 {offsets = [0, 64], sizes = [2, 32], strides = [1, 1]} : vector<2x128xf32> to vector<2x32xf32>
    %675 = vector.extract_strided_slice %661 {offsets = [0, 96], sizes = [2, 32], strides = [1, 1]} : vector<2x128xf32> to vector<2x32xf32>
    %676 = arith.mulf %667, %675 : vector<2x32xf32>
    %677 = arith.addf %674, %676 : vector<2x32xf32>
    %678 = math.tanh %677 : vector<2x32xf32>
    %cst_197 = arith.constant 1.000000e+00 : f32
    %679 = vector.broadcast %cst_197 : f32 to vector<2x32xf32>
    %680 = arith.subf %679, %673 : vector<2x32xf32>
    %681 = arith.mulf %680, %678 : vector<2x32xf32>
    %682 = arith.mulf %673, %621 : vector<2x32xf32>
    %683 = arith.addf %681, %682 : vector<2x32xf32>
    %c11_i32 = arith.constant 11 : i32
    %684 = arith.index_cast %c11_i32 : i32 to index
    %c0_198 = arith.constant 0 : index
    %c0_199 = arith.constant 0 : index
    %685 = vector.load %arg0[%684, %c0_198, %c0_199] : memref<12x2x96xf32, #tpu.memory_space<vmem>>, vector<1x2x96xf32>
    %686 = vector.shape_cast %685 : vector<1x2x96xf32> to vector<2x96xf32>
    %c0_200 = arith.constant 0 : index
    %c0_201 = arith.constant 0 : index
    %687 = vector.load %arg1[%c0_200, %c0_201] : memref<32x96xf32, #tpu.memory_space<vmem>>, vector<32x96xf32>
    %cst_202 = arith.constant dense<0.000000e+00> : vector<2x96xf32>
    %688 = tpu.matmul %655, %687, %cst_202 {dimension_numbers = #tpu.dot_dimension_numbers<[1], [0], [0], [1], [0, 0, 1, 1], [], []>} : vector<2x32xf32>, vector<32x96xf32>, vector<2x96xf32> -> vector<2x96xf32>
    %c0_203 = arith.constant 0 : index
    %c0_204 = arith.constant 0 : index
    %689 = vector.load %arg2[%c0_203, %c0_204] : memref<1x96xf32, #tpu.memory_space<vmem>>, vector<1x96xf32>
    %690 = vector.broadcast %689 : vector<1x96xf32> to vector<2x96xf32>
    %691 = arith.addf %688, %690 : vector<2x96xf32>
    %692 = vector.extract_strided_slice %686 {offsets = [0, 0], sizes = [2, 32], strides = [1, 1]} : vector<2x96xf32> to vector<2x32xf32>
    %693 = vector.extract_strided_slice %691 {offsets = [0, 0], sizes = [2, 32], strides = [1, 1]} : vector<2x96xf32> to vector<2x32xf32>
    %694 = arith.addf %692, %693 : vector<2x32xf32>
    %695 = arith.negf %694 : vector<2x32xf32>
    %696 = math.exp %695 : vector<2x32xf32>
    %cst_205 = arith.constant 1.000000e+00 : f32
    %697 = vector.broadcast %cst_205 : f32 to vector<2x32xf32>
    %698 = arith.addf %697, %696 : vector<2x32xf32>
    %699 = arith.divf %697, %698 : vector<2x32xf32>
    %700 = vector.extract_strided_slice %686 {offsets = [0, 32], sizes = [2, 32], strides = [1, 1]} : vector<2x96xf32> to vector<2x32xf32>
    %701 = vector.extract_strided_slice %691 {offsets = [0, 32], sizes = [2, 32], strides = [1, 1]} : vector<2x96xf32> to vector<2x32xf32>
    %702 = arith.addf %700, %701 : vector<2x32xf32>
    %703 = arith.negf %702 : vector<2x32xf32>
    %704 = math.exp %703 : vector<2x32xf32>
    %cst_206 = arith.constant 1.000000e+00 : f32
    %705 = vector.broadcast %cst_206 : f32 to vector<2x32xf32>
    %706 = arith.addf %705, %704 : vector<2x32xf32>
    %707 = arith.divf %705, %706 : vector<2x32xf32>
    %708 = vector.extract_strided_slice %686 {offsets = [0, 64], sizes = [2, 32], strides = [1, 1]} : vector<2x96xf32> to vector<2x32xf32>
    %709 = vector.extract_strided_slice %691 {offsets = [0, 64], sizes = [2, 32], strides = [1, 1]} : vector<2x96xf32> to vector<2x32xf32>
    %710 = arith.mulf %699, %709 : vector<2x32xf32>
    %711 = arith.addf %708, %710 : vector<2x32xf32>
    %712 = math.tanh %711 : vector<2x32xf32>
    %cst_207 = arith.constant 1.000000e+00 : f32
    %713 = vector.broadcast %cst_207 : f32 to vector<2x32xf32>
    %714 = arith.subf %713, %707 : vector<2x32xf32>
    %715 = arith.mulf %714, %712 : vector<2x32xf32>
    %716 = arith.mulf %707, %655 : vector<2x32xf32>
    %717 = arith.addf %715, %716 : vector<2x32xf32>
    %718 = tpu.concatenate %717, %683 in 1 : vector<2x32xf32>, vector<2x32xf32> -> vector<2x64xf32>
    %c0_208 = arith.constant 0 : index
    %c0_209 = arith.constant 0 : index
    %719 = vector.load %arg3[%c0_208, %c0_209] : memref<64x128xf32, #tpu.memory_space<vmem>>, vector<64x128xf32>
    %cst_210 = arith.constant dense<0.000000e+00> : vector<2x128xf32>
    %720 = tpu.matmul %718, %719, %cst_210 {dimension_numbers = #tpu.dot_dimension_numbers<[1], [0], [0], [1], [0, 0, 1, 1], [], []>} : vector<2x64xf32>, vector<64x128xf32>, vector<2x128xf32> -> vector<2x128xf32>
    %c0_211 = arith.constant 0 : index
    %c0_212 = arith.constant 0 : index
    %721 = vector.load %arg4[%c0_211, %c0_212] : memref<1x128xf32, #tpu.memory_space<vmem>>, vector<1x128xf32>
    %722 = vector.broadcast %721 : vector<1x128xf32> to vector<2x128xf32>
    %723 = arith.addf %720, %722 : vector<2x128xf32>
    %724 = vector.extract_strided_slice %723 {offsets = [0, 0], sizes = [2, 32], strides = [1, 1]} : vector<2x128xf32> to vector<2x32xf32>
    %725 = arith.negf %724 : vector<2x32xf32>
    %726 = math.exp %725 : vector<2x32xf32>
    %cst_213 = arith.constant 1.000000e+00 : f32
    %727 = vector.broadcast %cst_213 : f32 to vector<2x32xf32>
    %728 = arith.addf %727, %726 : vector<2x32xf32>
    %729 = arith.divf %727, %728 : vector<2x32xf32>
    %730 = vector.extract_strided_slice %723 {offsets = [0, 32], sizes = [2, 32], strides = [1, 1]} : vector<2x128xf32> to vector<2x32xf32>
    %731 = arith.negf %730 : vector<2x32xf32>
    %732 = math.exp %731 : vector<2x32xf32>
    %cst_214 = arith.constant 1.000000e+00 : f32
    %733 = vector.broadcast %cst_214 : f32 to vector<2x32xf32>
    %734 = arith.addf %733, %732 : vector<2x32xf32>
    %735 = arith.divf %733, %734 : vector<2x32xf32>
    %736 = vector.extract_strided_slice %723 {offsets = [0, 64], sizes = [2, 32], strides = [1, 1]} : vector<2x128xf32> to vector<2x32xf32>
    %737 = vector.extract_strided_slice %723 {offsets = [0, 96], sizes = [2, 32], strides = [1, 1]} : vector<2x128xf32> to vector<2x32xf32>
    %738 = arith.mulf %729, %737 : vector<2x32xf32>
    %739 = arith.addf %736, %738 : vector<2x32xf32>
    %740 = math.tanh %739 : vector<2x32xf32>
    %cst_215 = arith.constant 1.000000e+00 : f32
    %741 = vector.broadcast %cst_215 : f32 to vector<2x32xf32>
    %742 = arith.subf %741, %735 : vector<2x32xf32>
    %743 = arith.mulf %742, %740 : vector<2x32xf32>
    %744 = arith.mulf %735, %683 : vector<2x32xf32>
    %745 = arith.addf %743, %744 : vector<2x32xf32>
    %c12_i32 = arith.constant 12 : i32
    %c0_216 = arith.constant 0 : index
    %c0_217 = arith.constant 0 : index
    %746 = vector.load %arg5[%c0_216, %c0_217] : memref<32x1xf32, #tpu.memory_space<vmem>>, vector<32x1xf32>
    %cst_218 = arith.constant dense<0.000000e+00> : vector<2x1xf32>
    %747 = tpu.matmul %745, %746, %cst_218 {dimension_numbers = #tpu.dot_dimension_numbers<[1], [0], [0], [1], [0, 0, 1, 1], [], []>} : vector<2x32xf32>, vector<32x1xf32>, vector<2x1xf32> -> vector<2x1xf32>
    %c0_219 = arith.constant 0 : index
    %c0_220 = arith.constant 0 : index
    %748 = vector.load %arg6[%c0_219, %c0_220] : memref<1x1xf32, #tpu.memory_space<vmem>>, vector<1x1xf32>
    %749 = vector.broadcast %748 : vector<1x1xf32> to vector<2x1xf32>
    %750 = arith.addf %747, %749 : vector<2x1xf32>
    %c0_221 = arith.constant 0 : index
    %c0_222 = arith.constant 0 : index
    %751 = vector.load %arg7[%c0_221, %c0_222] : memref<2x1xf32, #tpu.memory_space<vmem>>, vector<2x1xf32>
    tpu.vector_store %arg7[%c0_221, %c0_222], %750 {strides = array<i32>} : memref<2x1xf32, #tpu.memory_space<vmem>>, vector<2x1xf32>,
    return
  }
}

</mosaic_0001>

<bundles_post_ra>
// kernel: discriminator_forward.1
= control target key start
LH: loop header
LB: loop body
LE: loop exit
PB: predicated region body
PF: predicated region fallthrough
CT: control target
= control target key end

     0   :  { %v1861_v4 = vmov 0.0   ;;  %s1862_s11 = smov 64   ;;  %s1863_s14 = smov 96   ;;  %vm37_vm4 = vcmask 261120   ;;  %vm117_vm5 = vcmask 523264   ;;  %s2484_s1 = inlined_call_operand.vmem [shape: f32[32,96], index: 1, kind: input, shape index: {}]   ;;  %s2485_s2 = inlined_call_operand.vmem [shape: f32[1,96], index: 2, kind: input, shape index: {}]   ;;  %s2486_s0 = inlined_call_operand.vmem [shape: f32[12,2,96], index: 0, kind: input, shape index: {}]   ;;  %s2487_s3 = inlined_call_operand.vmem [shape: f32[64,128], index: 3, kind: input, shape index: {}]   ;;  %s2488_s4 = inlined_call_operand.vmem [shape: f32[1,128], index: 4, kind: input, shape index: {}]   ;;  %s2489_s5 = inlined_call_operand.vmem [shape: f32[32,1], index: 5, kind: input, shape index: {}]   ;;  %s2490_s6 = inlined_call_operand.<no memory space> [shape: f32[1,1], index: 6, kind: input, shape index: {}]   ;;  %s2491_s7 = inlined_call_operand.vmem [shape: f32[2,1], index: 7, kind: output, shape index: {}]  }
   0x1   :  { %v1908_v0 = vld [vmem:[%s2484_s1 + $0x18] sm:$0xff]  ;;  %v1913_v1 = vld [vmem:[%s2484_s1 + $0x10] sm:$0xff]  ;;  %v1920_v2 = vld [vmem:[%s2484_s1 + $0x8] sm:$0xff]  ;;  %s1864_s13 = smov 32  }
   0x2   :  { %53 = vmatpush.msra.mxu0 %v1908_v0  ;;  %195 = vmatpush.msra.mxu2 %v1908_v0  ;;  %v1927_v3 = vld [vmem:[%s2484_s1] sm:$0xff]  ;;  %v1956_v28 = vld [vmem:[%s2487_s3 + $0x38] sm:$0xff]  ;;  %v1961_v29 = vld [vmem:[%s2487_s3 + $0x30] sm:$0xff] }
   0x3   :  { %v1944_v5 = vld [vmem:[%s2485_s2] ss:$0 sm:$0xff]  ;;  %129 = vmatpush.msra.mxu1 %v1956_v28  ;;  %258 = vmatpush.msra.mxu3 %v1956_v28  ;;  %v1968_v30 = vld [vmem:[%s2487_s3 + $0x28] sm:$0xff]  ;;  %v1984_v32 = vld [vmem:[%s2487_s3 + $0x18] sm:$0xff] }
   0x4   :  { %54 = vmatpush.msra.mxu0 %v1913_v1  ;;  %196 = vmatpush.msra.mxu2 %v1913_v1  ;;  %v28_v8 = vld [vmem:[%s2486_s0] sm:$0x3]  ;;  %v1992_v33 = vld [vmem:[%s2487_s3 + $0x10] sm:$0xff]  ;;  %v2000_v34 = vld [vmem:[%s2487_s3 + $0x8] sm:$0xff] }
   0x5   :  { %130 = vmatpush.msra.mxu1 %v1961_v29  ;;  %259 = vmatpush.msra.mxu3 %v1961_v29  ;;  %v1976_v31 = vld [vmem:[%s2487_s3 + $0x20] sm:$0xff] }
   0x6   :  { %55 = vmatpush.msra.mxu0 %v1920_v2  ;;  %197 = vmatpush.msra.mxu2 %v1920_v2  ;;  %v2016_v40 = vld [vmem:[%s2487_s3] sm:$0xff] }
   0x7   :  { %131 = vmatpush.msra.mxu1 %v1968_v30  ;;  %260 = vmatpush.msra.mxu3 %v1968_v30  ;;  %v1640_v45 = vld [vmem:[%s2486_s0 + $0x2] sm:$0x3] }
   0x8   :  { %56 = vmatpush.msra.mxu0 %v1927_v3  ;;  %198 = vmatpush.msra.mxu2 %v1927_v3 }
   0x9   :  { %57 = vmatmul.f32.vlgmr.msra.gmra.mxu0 %v1861_v4  ;;  %132 = vmatpush.msra.mxu1 %v1976_v31 }
   0xa   :  { %324 = vmatpush.msrb.mxu0 %v1908_v0  ;;  %387 = vmatpush.msrb.mxu2 %v1956_v28 }
   0xb   :  { %261 = vmatpush.msra.mxu3 %v1976_v31  ;;  %133 = vmatpush.msra.mxu1 %v1984_v32 }
   0xc   :  { %325 = vmatpush.msrb.mxu0 %v1913_v1  ;;  %388 = vmatpush.msrb.mxu2 %v1961_v29 }
   0xd   :  { %262 = vmatpush.msra.mxu3 %v1984_v32  ;;  %134 = vmatpush.msra.mxu1 %v1992_v33 }
   0xe   :  { %326 = vmatpush.msrb.mxu0 %v1920_v2  ;;  %389 = vmatpush.msrb.mxu2 %v1968_v30 }
   0xf   :  { %263 = vmatpush.msra.mxu3 %v1992_v33  ;;  %135 = vmatpush.msra.mxu1 %v2000_v34 }
  0x10   :  { %327 = vmatpush.msrb.mxu0 %v1927_v3  ;;  %390 = vmatpush.msrb.mxu2 %v1976_v31 }
  0x11   :  { %264 = vmatpush.msra.mxu3 %v2000_v34  ;;  %136 = vmatpush.msra.mxu1 %v2016_v40 }
  0x12   :  { %453 = vmatpush.msra.mxu0 %v1908_v0  ;;  %391 = vmatpush.msrb.mxu2 %v1984_v32 }
  0x13   :  { %265 = vmatpush.msra.mxu3 %v2016_v40  ;;  %516 = vmatpush.msrb.mxu1 %v1956_v28 }
  0x14   :  { %454 = vmatpush.msra.mxu0 %v1913_v1  ;;  %392 = vmatpush.msrb.mxu2 %v1992_v33 }
  0x15   :  { %582 = vmatpush.msrb.mxu3 %v1908_v0  ;;  %517 = vmatpush.msrb.mxu1 %v1961_v29 }
  0x16   :  { %455 = vmatpush.msra.mxu0 %v1920_v2  ;;  %393 = vmatpush.msrb.mxu2 %v2000_v34 }
  0x17   :  { %583 = vmatpush.msrb.mxu3 %v1913_v1  ;;  %518 = vmatpush.msrb.mxu1 %v1968_v30 }
  0x18   :  { %456 = vmatpush.msra.mxu0 %v1927_v3  ;;  %394 = vmatpush.msrb.mxu2 %v2016_v40 }
  0x19   :  { %584 = vmatpush.msrb.mxu3 %v1920_v2  ;;  %519 = vmatpush.msrb.mxu1 %v1976_v31 }
  0x1b   :  { %585 = vmatpush.msrb.mxu3 %v1927_v3  ;;  %520 = vmatpush.msrb.mxu1 %v1984_v32 }
  0x1d   :  { %521 = vmatpush.msrb.mxu1 %v1992_v33 }
  0x1f   :  { %522 = vmatpush.msrb.mxu1 %v2000_v34 }
  0x21   :  { %523 = vmatpush.msrb.mxu1 %v2016_v40 }
  0x86   :  { %v58_v6 = vpop.f32.mrf.mxu0 }
  0x87   :  { %v59_v7 = vadd.f32 %v1944_v5, %v58_v6 }
  0x89   :  { %82 = vrot.lane.b32.xlu0 %v59_v7, %s1862_s11  ;;  %v61_v9 = vadd.f32 %v59_v7, %v28_v8 }
  0x8b   :  { %v1637_v10 = vmul.f32 -1.442695, %v61_v9 }
  0x8d   :  { %1703 = vpow2.f32 %v1637_v10 }
  0x93   :  { %v1704_v11 = vpop.eup %1703 }
  0x94   :  { %v65_v12 = vadd.f32 1.0, %v1704_v11 }
  0x96   :  { %1705 = vrcp.f32 %v65_v12  ;;  %v77_v18 = vand.u32 2147483648, %v65_v12  ;;  %vm71_vm1 = vweird.f32 %v65_v12  ;;  %v75_v19 = vand.u32 2147483647, %v65_v12 }
  0x98   :  { %v78_v21 = vor.u32 1.1754944e-38, %v77_v18  ;;  %vm76_vm3 = vcmp.eq.f32.partialorder %v75_v19, 8.507059e+37 }
  0x9c   :  { %v1706_v13 = vpop.eup %1705 }
  0x9d   :  { %v67_v14 = vmul.f32 %v1706_v13, %v65_v12  ;;  %vm72_vm0 = vweird.f32 %v1706_v13 }
  0x9e   :  { %vm73_vm2 = vmor %vm71_vm1, %vm72_vm0 }
  0x9f   :  { %v68_v15 = vsub.f32 1.0, %v67_v14  ;;  %v2073_v14 = vld [vmem:[%s2488_s4] ss:$0 sm:$0xff] }
  0xa1   :  { %v69_v16 = vmul.f32 %v1706_v13, %v68_v15 }
  0xa3   :  { %v70_v17 = vadd.f32 %v1706_v13, %v69_v16 }
  0xa5   :  { %v74_v20 = vsel %vm73_vm2, %v1706_v13, %v70_v17  ;;  %v1645_v17 = vld [vmem:[%s2486_s0 + $0x4] sm:$0x3] }
  0xa6   :  { %v79_v23 = vsel %vm76_vm3, %v78_v21, %v74_v20 }
  0xa7   :  { %v92_v35 = vsub.f32 1.0, %v79_v23  ;;  %v98_v37 = vmul.f32 0.0, %v79_v23 }
  0xfb   :  { %v83_v22 = vpop.permute.xlu0 %82 }
  0xfc   :  { %v85_v24 = vmul.f32 %v83_v22, %v79_v23 }
  0xfe   :  { %87 = vrot.lane.b32.xlu0 %v85_v24, %s1862_s11 }
 0x170   :  { %v88_v25 = vpop.permute.xlu0 %87 }
 0x171   :  { %v90_v26 = vadd.f32 %v88_v25, %v28_v8 }
 0x173   :  { %1707 = vtanh.f32 %v90_v26 }
 0x179   :  { %v1708_v27 = vpop.eup %1707 }
 0x17a   :  { %94 = vrot.lane.b32.xlu1 %v1708_v27, %s1863_s14 }
 0x1ec   :  { %v95_v36 = vpop.permute.xlu1 %94 }
 0x1ed   :  { %v97_v38 = vmul.f32 %v95_v36, %v92_v35 }
 0x1ef   :  { %v2009_v39 = vadd.f32 %v98_v37, %v97_v38 }
 0x1f1   :  { %101 = vrot.lane.b32.xlu1 %v2009_v39, %s1863_s14 }
 0x263   :  { %v102_v41 = vpop.permute.xlu1 %101 }
 0x264   :  { %1641 = vmatmul.msk.f32.vlgmr.msra.gmra.mxu2 %vm37_vm4, %v102_v41  ;;  %v104_v42 = vsel %vm37_vm4, %v102_v41, 0.0 }
 0x265   :  { %1638 = vmatmul.msk.f32.vlgmr.msra.gmra.mxu1 %vm117_vm5, %v104_v42  ;;  %711 = vmatpush.msra.mxu2 %v1908_v0 }
 0x266   :  { %840 = vmatpush.msra.mxu1 %v1908_v0 }
 0x267   :  { %712 = vmatpush.msra.mxu2 %v1913_v1 }
 0x268   :  { %841 = vmatpush.msra.mxu1 %v1913_v1 }
 0x269   :  { %713 = vmatpush.msra.mxu2 %v1920_v2 }
 0x26a   :  { %842 = vmatpush.msra.mxu1 %v1920_v2 }
 0x26b   :  { %714 = vmatpush.msra.mxu2 %v1927_v3 }
 0x26c   :  { %843 = vmatpush.msra.mxu1 %v1927_v3 }
 0x2e2   :  { %v138_v15 = vpop.f32.mrf.mxu1 }
 0x2e3   :  { %v139_v16 = vadd.f32 %v2073_v14, %v138_v15 }
 0x2e5   :  { %v1639_v42 = vmul.f32 -1.442695, %v139_v16 }
 0x2e7   :  { %v200_v43 = vpop.f32.mrf.mxu2 }
 0x2e8   :  { %v201_v44 = vadd.f32 %v1944_v5, %v200_v43 }
 0x2ea   :  { %224 = vrot.lane.b32.xlu2 %v201_v44, %s1862_s11  ;;  %v203_v46 = vadd.f32 %v1640_v45, %v201_v44 }
 0x2ec   :  { %v1642_v47 = vmul.f32 -1.442695, %v203_v46 }
 0x2ee   :  { %1709 = vpow2.f32 %v1642_v47 }
 0x2f4   :  { %v1710_v48 = vpop.eup %1709 }
 0x2f5   :  { %v207_v49 = vadd.f32 1.0, %v1710_v48 }
 0x2f7   :  { %1711 = vrcp.f32 %v207_v49  ;;  %v219_v55 = vand.u32 2147483648, %v207_v49  ;;  %vm213_vm7 = vweird.f32 %v207_v49  ;;  %v217_v56 = vand.u32 2147483647, %v207_v49 }
 0x2f9   :  { %v220_v58 = vor.u32 1.1754944e-38, %v219_v55  ;;  %vm218_vm9 = vcmp.eq.f32.partialorder %v217_v56, 8.507059e+37 }
 0x2fd   :  { %v1712_v50 = vpop.eup %1711 }
 0x2fe   :  { %v209_v51 = vmul.f32 %v1712_v50, %v207_v49  ;;  %vm214_vm6 = vweird.f32 %v1712_v50 }
 0x2ff   :  { %vm215_vm8 = vmor %vm213_vm7, %vm214_vm6 }
 0x300   :  { %v210_v52 = vsub.f32 1.0, %v209_v51 }
 0x302   :  { %v211_v53 = vmul.f32 %v1712_v50, %v210_v52 }
 0x304   :  { %v212_v54 = vadd.f32 %v1712_v50, %v211_v53 }
 0x306   :  { %v216_v57 = vsel %vm215_vm8, %v1712_v50, %v212_v54 }
 0x307   :  { %v221_v60 = vsel %vm218_vm9, %v220_v58, %v216_v57 }
 0x308   :  { %v234_v6 = vsub.f32 1.0, %v221_v60  ;;  %v240_v8 = vmul.f32 %v221_v60, %v2009_v39 }
 0x344   :  { %v225_v59 = vpop.permute.xlu2 %224 }
 0x345   :  { %v227_v61 = vmul.f32 %v225_v59, %v221_v60 }
 0x347   :  { %229 = vrot.lane.b32.xlu2 %v227_v61, %s1862_s11 }
 0x3a1   :  { %v230_v62 = vpop.permute.xlu2 %229 }
 0x3a2   :  { %v232_v63 = vadd.f32 %v1640_v45, %v230_v62 }
 0x3a4   :  { %1713 = vtanh.f32 %v232_v63 }
 0x3aa   :  { %v1714_v4 = vpop.eup %1713 }
 0x3ab   :  { %236 = vrot.lane.b32.xlu0 %v1714_v4, %s1863_s14 }
 0x41d   :  { %v237_v7 = vpop.permute.xlu0 %236 }
 0x41e   :  { %v239_v9 = vmul.f32 %v237_v7, %v234_v6 }
 0x420   :  { %v2052_v10 = vadd.f32 %v240_v8, %v239_v9 }
 0x422   :  { %243 = vrot.lane.b32.xlu1 %v2052_v10, %s1863_s14 }
 0x494   :  { %v2056_v11 = vpop.permute.xlu1 %243 }
 0x495   :  { %1646 = vmatmul.msk.f32.vlgmr.msrb.gmra.mxu0 %vm37_vm4, %v2056_v11 }
 0x496   :  { %645 = vmatpush.msrb.mxu0 %v1956_v28 }
 0x498   :  { %646 = vmatpush.msrb.mxu0 %v1961_v29 }
 0x49a   :  { %647 = vmatpush.msrb.mxu0 %v1968_v30 }
 0x49c   :  { %648 = vmatpush.msrb.mxu0 %v1976_v31 }
 0x49e   :  { %649 = vmatpush.msrb.mxu0 %v1984_v32 }
 0x4a0   :  { %650 = vmatpush.msrb.mxu0 %v1992_v33 }
 0x4a2   :  { %651 = vmatpush.msrb.mxu0 %v2000_v34 }
 0x4a4   :  { %652 = vmatpush.msrb.mxu0 %v2016_v40 }
 0x512   :  { %v329_v12 = vpop.f32.mrf.mxu0 }
 0x513   :  { %v330_v13 = vadd.f32 %v1944_v5, %v329_v12 }
 0x515   :  { %353 = vrot.lane.b32.xlu2 %v330_v13, %s1862_s11  ;;  %v332_v18 = vadd.f32 %v1645_v17, %v330_v13 }
 0x517   :  { %v1647_v19 = vmul.f32 -1.442695, %v332_v18 }
 0x519   :  { %1715 = vpow2.f32 %v1647_v19 }
 0x51d   :  { %161 = vrot.lane.b32.xlu2 %v139_v16, %s1864_s13 }
 0x51f   :  { %v1716_v20 = vpop.eup %1715 }
 0x520   :  { %v336_v21 = vadd.f32 1.0, %v1716_v20 }
 0x522   :  { %1717 = vrcp.f32 %v336_v21  ;;  %v348_v27 = vand.u32 2147483648, %v336_v21  ;;  %vm342_vm11 = vweird.f32 %v336_v21  ;;  %v346_v35 = vand.u32 2147483647, %v336_v21 }
 0x523   :  { %1719 = vpow2.f32 %v1639_v42 }
 0x524   :  { %v349_v37 = vor.u32 1.1754944e-38, %v348_v27  ;;  %vm347_vm13 = vcmp.eq.f32.partialorder %v346_v35, 8.507059e+37 }
 0x528   :  { %v1718_v22 = vpop.eup %1717 }
 0x529   :  { %v338_v23 = vmul.f32 %v1718_v22, %v336_v21  ;;  %vm343_vm10 = vweird.f32 %v1718_v22  ;;  %v1720_v43 = vpop.eup %1719  ;;  %v1650_v21 = vld [vmem:[%s2486_s0 + $0x6] sm:$0x3] }
 0x52a   :  { %vm344_vm12 = vmor %vm342_vm11, %vm343_vm10  ;;  %v144_v44 = vadd.f32 1.0, %v1720_v43 }
 0x52b   :  { %v339_v24 = vsub.f32 1.0, %v338_v23 }
 0x52c   :  { %1721 = vrcp.f32 %v144_v44  ;;  %v156_v53 = vand.u32 2147483648, %v144_v44  ;;  %vm150_vm15 = vweird.f32 %v144_v44  ;;  %v154_v54 = vand.u32 2147483647, %v144_v44 }
 0x52d   :  { %v340_v25 = vmul.f32 %v1718_v22, %v339_v24 }
 0x52e   :  { %v157_v57 = vor.u32 1.1754944e-38, %v156_v53  ;;  %vm155_vm1 = vcmp.eq.f32.partialorder %v154_v54, 8.507059e+37 }
 0x52f   :  { %v341_v26 = vadd.f32 %v1718_v22, %v340_v25 }
 0x531   :  { %v345_v36 = vsel %vm344_vm12, %v1718_v22, %v341_v26 }
 0x532   :  { %v350_v39 = vsel %vm347_vm13, %v349_v37, %v345_v36  ;;  %v1722_v45 = vpop.eup %1721 }
 0x533   :  { %v146_v46 = vmul.f32 %v1722_v45, %v144_v44  ;;  %vm151_vm14 = vweird.f32 %v1722_v45  ;;  %v363_v60 = vsub.f32 1.0, %v350_v39  ;;  %v369_v62 = vmul.f32 %v350_v39, %v2052_v10 }
 0x534   :  { %vm152_vm0 = vmor %vm150_vm15, %vm151_vm14 }
 0x535   :  { %v147_v47 = vsub.f32 1.0, %v146_v46 }
 0x537   :  { %v148_v50 = vmul.f32 %v1722_v45, %v147_v47 }
 0x539   :  { %v149_v51 = vadd.f32 %v1722_v45, %v148_v50 }
 0x53b   :  { %v153_v55 = vsel %vm152_vm0, %v1722_v45, %v149_v51 }
 0x53c   :  { %v158_v58 = vsel %vm155_vm1, %v157_v57, %v153_v55 }
 0x53d   :  { %v171_v9 = vsub.f32 1.0, %v158_v58  ;;  %v177_v13 = vmul.f32 0.0, %v158_v58 }
 0x56f   :  { %v354_v38 = vpop.permute.xlu2 %353 }
 0x570   :  { %v356_v41 = vmul.f32 %v354_v38, %v350_v39 }
 0x572   :  { %358 = vrot.lane.b32.xlu0 %v356_v41, %s1862_s11 }
 0x577   :  { %v162_v56 = vpop.permute.xlu2 %161 }
 0x578   :  { %v164_v59 = vmul.f32 %v162_v56, %v158_v58 }
 0x5e4   :  { %v359_v48 = vpop.permute.xlu0 %358 }
 0x5e5   :  { %v361_v49 = vadd.f32 %v1645_v17, %v359_v48 }
 0x5e7   :  { %1723 = vtanh.f32 %v361_v49 }
 0x5ed   :  { %v1724_v52 = vpop.eup %1723 }
 0x5ee   :  { %365 = vrot.lane.b32.xlu1 %v1724_v52, %s1863_s14 }
 0x5f6   :  { %166 = vrot.lane.b32.xlu1 %v164_v59, %s1862_s11 }
 0x660   :  { %v366_v61 = vpop.permute.xlu1 %365 }
 0x661   :  { %v368_v63 = vmul.f32 %v366_v61, %v363_v60 }
 0x663   :  { %v2084_v4 = vadd.f32 %v369_v62, %v368_v63 }
 0x665   :  { %372 = vrot.lane.b32.xlu0 %v2084_v4, %s1863_s14 }
 0x668   :  { %v167_v6 = vpop.permute.xlu1 %166 }
 0x669   :  { %v169_v7 = vadd.f32 %v167_v6, %v139_v16 }
 0x66b   :  { %1725 = vtanh.f32 %v169_v7 }
 0x671   :  { %v1726_v8 = vpop.eup %1725 }
 0x672   :  { %173 = vrot.lane.b32.xlu2 %v1726_v8, %s1863_s14 }
 0x6cc   :  { %v174_v12 = vpop.permute.xlu2 %173 }
 0x6cd   :  { %v176_v15 = vmul.f32 %v174_v12, %v171_v9 }
 0x6cf   :  { %v2089_v17 = vadd.f32 %v177_v13, %v176_v15 }
 0x6d1   :  { %v246_v10 = vsel %vm37_vm4, %v2056_v11, %v2089_v17 }
 0x6d2   :  { %1643 = vmatmul.msk.f32.vlgmr.msra.gmra.mxu3 %vm117_vm5, %v246_v10 }
 0x6d3   :  { %774 = vmatpush.msra.mxu3 %v1956_v28 }
 0x6d5   :  { %775 = vmatpush.msra.mxu3 %v1961_v29 }
 0x6d7   :  { %v2097_v16 = vpop.permute.xlu0 %372  ;;  %776 = vmatpush.msra.mxu3 %v1968_v30 }
 0x6d8   :  { %1651 = vmatmul.msk.f32.vlgmr.msra.gmra.mxu0 %vm37_vm4, %v2097_v16 }
 0x6d9   :  { %777 = vmatpush.msra.mxu3 %v1976_v31  ;;  %969 = vmatpush.msra.mxu0 %v1908_v0 }
 0x6db   :  { %778 = vmatpush.msra.mxu3 %v1984_v32  ;;  %970 = vmatpush.msra.mxu0 %v1913_v1 }
 0x6dd   :  { %779 = vmatpush.msra.mxu3 %v1992_v33  ;;  %971 = vmatpush.msra.mxu0 %v1920_v2 }
 0x6df   :  { %780 = vmatpush.msra.mxu3 %v2000_v34  ;;  %972 = vmatpush.msra.mxu0 %v1927_v3 }
 0x6e1   :  { %781 = vmatpush.msra.mxu3 %v2016_v40 }
 0x755   :  { %v267_v11 = vpop.f32.mrf.mxu3  ;;  %v458_v18 = vpop.f32.mrf.mxu0 }
 0x756   :  { %v268_v19 = vadd.f32 %v2073_v14, %v267_v11  ;;  %v459_v20 = vadd.f32 %v1944_v5, %v458_v18 }
 0x758   :  { %482 = vrot.lane.b32.xlu0 %v459_v20, %s1862_s11  ;;  %290 = vrot.lane.b32.xlu2 %v268_v19, %s1864_s13  ;;  %v461_v22 = vadd.f32 %v1650_v21, %v459_v20  ;;  %v1644_v24 = vmul.f32 -1.442695, %v268_v19 }
 0x75a   :  { %v1652_v23 = vmul.f32 -1.442695, %v461_v22 }
 0x75c   :  { %1727 = vpow2.f32 %v1652_v23 }
 0x75d   :  { %1729 = vpow2.f32 %v1644_v24 }
 0x762   :  { %v1728_v25 = vpop.eup %1727 }
 0x763   :  { %v465_v26 = vadd.f32 1.0, %v1728_v25  ;;  %v1730_v27 = vpop.eup %1729 }
 0x764   :  { %v273_v35 = vadd.f32 1.0, %v1730_v27 }
 0x765   :  { %1731 = vrcp.f32 %v465_v26  ;;  %v477_v45 = vand.u32 2147483648, %v465_v26  ;;  %vm471_vm3 = vweird.f32 %v465_v26  ;;  %v475_v46 = vand.u32 2147483647, %v465_v26 }
 0x766   :  { %1733 = vrcp.f32 %v273_v35  ;;  %v285_v54 = vand.u32 2147483648, %v273_v35  ;;  %vm279_vm9 = vweird.f32 %v273_v35  ;;  %v283_v55 = vand.u32 2147483647, %v273_v35 }
 0x767   :  { %v478_v49 = vor.u32 1.1754944e-38, %v477_v45  ;;  %vm476_vm7 = vcmp.eq.f32.partialorder %v475_v46, 8.507059e+37 }
 0x768   :  { %v286_v58 = vor.u32 1.1754944e-38, %v285_v54  ;;  %vm284_vm11 = vcmp.eq.f32.partialorder %v283_v55, 8.507059e+37 }
 0x76b   :  { %v1732_v36 = vpop.eup %1731 }
 0x76c   :  { %v467_v37 = vmul.f32 %v1732_v36, %v465_v26  ;;  %v1734_v39 = vpop.eup %1733  ;;  %vm472_vm2 = vweird.f32 %v1732_v36 }
 0x76d   :  { %v275_v41 = vmul.f32 %v1734_v39, %v273_v35  ;;  %vm473_vm6 = vmor %vm471_vm3, %vm472_vm2  ;;  %vm280_vm8 = vweird.f32 %v1734_v39 }
 0x76e   :  { %v468_v38 = vsub.f32 1.0, %v467_v37  ;;  %vm281_vm10 = vmor %vm279_vm9, %vm280_vm8 }
 0x76f   :  { %v276_v43 = vsub.f32 1.0, %v275_v41 }
 0x770   :  { %v469_v42 = vmul.f32 %v1732_v36, %v468_v38 }
 0x771   :  { %v277_v47 = vmul.f32 %v1734_v39, %v276_v43 }
 0x772   :  { %v470_v44 = vadd.f32 %v1732_v36, %v469_v42 }
 0x773   :  { %v278_v52 = vadd.f32 %v1734_v39, %v277_v47 }
 0x774   :  { %v474_v48 = vsel %vm473_vm6, %v1732_v36, %v470_v44 }
 0x775   :  { %v479_v51 = vsel %vm476_vm7, %v478_v49, %v474_v48  ;;  %v282_v56 = vsel %vm281_vm10, %v1734_v39, %v278_v52  ;;  %v1655_v48 = vld [vmem:[%s2486_s0 + $0x8] sm:$0x3] }
 0x776   :  { %v287_v59 = vsel %vm284_vm11, %v286_v58, %v282_v56  ;;  %v492_v9 = vsub.f32 1.0, %v479_v51  ;;  %v498_v13 = vmul.f32 %v479_v51, %v2084_v4 }
 0x777   :  { %v300_v11 = vsub.f32 1.0, %v287_v59 }
 0x7b2   :  { %v291_v57 = vpop.permute.xlu2 %290 }
 0x7b3   :  { %v293_v60 = vmul.f32 %v291_v57, %v287_v59 }
 0x7ca   :  { %v483_v50 = vpop.permute.xlu0 %482 }
 0x7cb   :  { %v485_v53 = vmul.f32 %v483_v50, %v479_v51 }
 0x7cd   :  { %487 = vrot.lane.b32.xlu1 %v485_v53, %s1862_s11 }
 0x7d5   :  { %295 = vrot.lane.b32.xlu1 %v293_v60, %s1862_s11 }
 0x83f   :  { %v488_v61 = vpop.permute.xlu1 %487 }
 0x840   :  { %v490_v62 = vadd.f32 %v1650_v21, %v488_v61 }
 0x842   :  { %1735 = vtanh.f32 %v490_v62 }
 0x847   :  { %v296_v63 = vpop.permute.xlu1 %295 }
 0x848   :  { %v1736_v6 = vpop.eup %1735  ;;  %v298_v7 = vadd.f32 %v296_v63, %v268_v19  ;;  %v306_v19 = vmul.f32 %v287_v59, %v2089_v17 }
 0x849   :  { %494 = vrot.lane.b32.xlu0 %v1736_v6, %s1863_s14 }
 0x84a   :  { %1737 = vtanh.f32 %v298_v7 }
 0x850   :  { %v1738_v8 = vpop.eup %1737 }
 0x851   :  { %302 = vrot.lane.b32.xlu0 %v1738_v8, %s1863_s14 }
 0x8bb   :  { %v495_v12 = vpop.permute.xlu0 %494 }
 0x8bc   :  { %v497_v15 = vmul.f32 %v495_v12, %v492_v9 }
 0x8be   :  { %v2123_v10 = vadd.f32 %v498_v13, %v497_v15 }
 0x8c0   :  { %501 = vrot.lane.b32.xlu2 %v2123_v10, %s1863_s14 }
 0x8c3   :  { %v303_v18 = vpop.permute.xlu0 %302 }
 0x8c4   :  { %v305_v20 = vmul.f32 %v303_v18, %v300_v11 }
 0x8c6   :  { %v2128_v21 = vadd.f32 %v306_v19, %v305_v20 }
 0x8c8   :  { %v375_v22 = vsel %vm37_vm4, %v2097_v16, %v2128_v21 }
 0x8c9   :  { %1648 = vmatmul.msk.f32.vlgmr.msrb.gmra.mxu2 %vm117_vm5, %v375_v22 }
 0x8ca   :  { %903 = vmatpush.msrb.mxu2 %v1956_v28 }
 0x8cc   :  { %904 = vmatpush.msrb.mxu2 %v1961_v29 }
 0x8ce   :  { %905 = vmatpush.msrb.mxu2 %v1968_v30 }
 0x8d0   :  { %906 = vmatpush.msrb.mxu2 %v1976_v31 }
 0x8d2   :  { %907 = vmatpush.msrb.mxu2 %v1984_v32 }
 0x8d4   :  { %908 = vmatpush.msrb.mxu2 %v1992_v33 }
 0x8d6   :  { %909 = vmatpush.msrb.mxu2 %v2000_v34 }
 0x8d8   :  { %910 = vmatpush.msrb.mxu2 %v2016_v40 }
 0x91a   :  { %v2142_v4 = vpop.permute.xlu2 %501 }
 0x91b   :  { %1656 = vmatmul.msk.f32.vlgmr.msrb.gmra.mxu3 %vm37_vm4, %v2142_v4 }
 0x91c   :  { %1098 = vmatpush.msrb.mxu3 %v1908_v0 }
 0x91e   :  { %1099 = vmatpush.msrb.mxu3 %v1913_v1 }
 0x920   :  { %1100 = vmatpush.msrb.mxu3 %v1920_v2 }
 0x922   :  { %1101 = vmatpush.msrb.mxu3 %v1927_v3 }
 0x94c   :  { %v396_v17 = vpop.f32.mrf.mxu2 }
 0x94d   :  { %v397_v16 = vadd.f32 %v2073_v14, %v396_v17 }
 0x94f   :  { %419 = vrot.lane.b32.xlu2 %v397_v16, %s1864_s13  ;;  %v1649_v23 = vmul.f32 -1.442695, %v397_v16 }
 0x951   :  { %1739 = vpow2.f32 %v1649_v23 }
 0x957   :  { %v1740_v24 = vpop.eup %1739 }
 0x958   :  { %v402_v25 = vadd.f32 1.0, %v1740_v24 }
 0x95a   :  { %1741 = vrcp.f32 %v402_v25  ;;  %v414_v41 = vand.u32 2147483648, %v402_v25  ;;  %vm408_vm13 = vweird.f32 %v402_v25  ;;  %v412_v42 = vand.u32 2147483647, %v402_v25 }
 0x95c   :  { %v415_v44 = vor.u32 1.1754944e-38, %v414_v41  ;;  %vm413_vm15 = vcmp.eq.f32.partialorder %v412_v42, 8.507059e+37 }
 0x960   :  { %v1742_v26 = vpop.eup %1741 }
 0x961   :  { %v404_v27 = vmul.f32 %v1742_v26, %v402_v25  ;;  %vm409_vm12 = vweird.f32 %v1742_v26 }
 0x962   :  { %vm410_vm14 = vmor %vm408_vm13, %vm409_vm12 }
 0x963   :  { %v405_v35 = vsub.f32 1.0, %v404_v27 }
 0x965   :  { %v406_v37 = vmul.f32 %v1742_v26, %v405_v35 }
 0x967   :  { %v407_v39 = vadd.f32 %v1742_v26, %v406_v37 }
 0x969   :  { %v411_v43 = vsel %vm410_vm14, %v1742_v26, %v407_v39 }
 0x96a   :  { %v416_v46 = vsel %vm413_vm15, %v415_v44, %v411_v43 }
 0x96b   :  { %v429_v11 = vsub.f32 1.0, %v416_v46  ;;  %v435_v19 = vmul.f32 %v416_v46, %v2128_v21 }
 0x99e   :  { %v587_v36 = vpop.f32.mrf.mxu3 }
 0x99f   :  { %v588_v38 = vadd.f32 %v1944_v5, %v587_v36 }
 0x9a1   :  { %611 = vrot.lane.b32.xlu1 %v588_v38, %s1862_s11  ;;  %v590_v49 = vadd.f32 %v1655_v48, %v588_v38 }
 0x9a3   :  { %v1657_v50 = vmul.f32 -1.442695, %v590_v49 }
 0x9a5   :  { %1743 = vpow2.f32 %v1657_v50 }
 0x9a9   :  { %v420_v45 = vpop.permute.xlu2 %419 }
 0x9aa   :  { %v422_v47 = vmul.f32 %v420_v45, %v416_v46 }
 0x9ab   :  { %v1744_v51 = vpop.eup %1743 }
 0x9ac   :  { %424 = vrot.lane.b32.xlu1 %v422_v47, %s1862_s11  ;;  %v594_v52 = vadd.f32 1.0, %v1744_v51  ;;  %v1660_v51 = vld [vmem:[%s2486_s0 + $0xa] sm:$0x3] }
 0x9ae   :  { %1745 = vrcp.f32 %v594_v52  ;;  %v606_v58 = vand.u32 2147483648, %v594_v52  ;;  %vm600_vm1 = vweird.f32 %v594_v52  ;;  %v604_v59 = vand.u32 2147483647, %v594_v52 }
 0x9b0   :  { %v607_v61 = vor.u32 1.1754944e-38, %v606_v58  ;;  %vm605_vm3 = vcmp.eq.f32.partialorder %v604_v59, 8.507059e+37 }
 0x9b4   :  { %v1746_v53 = vpop.eup %1745 }
 0x9b5   :  { %v596_v54 = vmul.f32 %v1746_v53, %v594_v52  ;;  %vm601_vm0 = vweird.f32 %v1746_v53 }
 0x9b6   :  { %vm602_vm2 = vmor %vm600_vm1, %vm601_vm0 }
 0x9b7   :  { %v597_v55 = vsub.f32 1.0, %v596_v54 }
 0x9b9   :  { %v598_v56 = vmul.f32 %v1746_v53, %v597_v55 }
 0x9bb   :  { %v599_v57 = vadd.f32 %v1746_v53, %v598_v56 }
 0x9bd   :  { %v603_v60 = vsel %vm602_vm2, %v1746_v53, %v599_v57 }
 0x9be   :  { %v608_v62 = vsel %vm605_vm3, %v607_v61, %v603_v60 }
 0x9bf   :  { %v621_v21 = vsub.f32 1.0, %v608_v62 }
 0xa13   :  { %v612_v63 = vpop.permute.xlu1 %611 }
 0xa14   :  { %v614_v6 = vmul.f32 %v612_v63, %v608_v62 }
 0xa16   :  { %616 = vrot.lane.b32.xlu0 %v614_v6, %s1862_s11 }
 0xa1e   :  { %v425_v7 = vpop.permute.xlu1 %424 }
 0xa1f   :  { %v427_v8 = vadd.f32 %v425_v7, %v397_v16  ;;  %v627_v16 = vmul.f32 %v608_v62, %v2123_v10 }
 0xa21   :  { %1747 = vtanh.f32 %v427_v8 }
 0xa27   :  { %v1748_v9 = vpop.eup %1747 }
 0xa28   :  { %431 = vrot.lane.b32.xlu0 %v1748_v9, %s1863_s14 }
 0xa88   :  { %v617_v12 = vpop.permute.xlu0 %616 }
 0xa89   :  { %v619_v13 = vadd.f32 %v1655_v48, %v617_v12 }
 0xa8b   :  { %1749 = vtanh.f32 %v619_v13 }
 0xa91   :  { %v1750_v15 = vpop.eup %1749 }
 0xa92   :  { %623 = vrot.lane.b32.xlu2 %v1750_v15, %s1863_s14 }
 0xa9a   :  { %v432_v18 = vpop.permute.xlu0 %431 }
 0xa9b   :  { %v434_v20 = vmul.f32 %v432_v18, %v429_v11 }
 0xa9d   :  { %v2162_v22 = vadd.f32 %v435_v19, %v434_v20 }
 0xa9f   :  { %v504_v17 = vsel %vm37_vm4, %v2142_v4, %v2162_v22 }
 0xaa0   :  { %1653 = vmatmul.msk.f32.vlgmr.msrb.gmra.mxu1 %vm117_vm5, %v504_v17 }
 0xaa1   :  { %1032 = vmatpush.msrb.mxu1 %v1956_v28 }
 0xaa3   :  { %1033 = vmatpush.msrb.mxu1 %v1961_v29 }
 0xaa5   :  { %1034 = vmatpush.msrb.mxu1 %v1968_v30 }
 0xaa7   :  { %1035 = vmatpush.msrb.mxu1 %v1976_v31 }
 0xaa9   :  { %1036 = vmatpush.msrb.mxu1 %v1984_v32 }
 0xaab   :  { %1037 = vmatpush.msrb.mxu1 %v1992_v33 }
 0xaad   :  { %1038 = vmatpush.msrb.mxu1 %v2000_v34 }
 0xaaf   :  { %1039 = vmatpush.msrb.mxu1 %v2016_v40 }
 0xaec   :  { %v624_v4 = vpop.permute.xlu2 %623 }
 0xaed   :  { %v626_v23 = vmul.f32 %v624_v4, %v621_v21 }
 0xaef   :  { %v2177_v24 = vadd.f32 %v627_v16, %v626_v23 }
 0xaf1   :  { %630 = vrot.lane.b32.xlu1 %v2177_v24, %s1863_s14 }
 0xb1d   :  { %v525_v25 = vpop.f32.mrf.mxu1 }
 0xb1e   :  { %v526_v26 = vadd.f32 %v2073_v14, %v525_v25 }
 0xb20   :  { %548 = vrot.lane.b32.xlu2 %v526_v26, %s1864_s13  ;;  %v1654_v27 = vmul.f32 -1.442695, %v526_v26 }
 0xb22   :  { %1751 = vpow2.f32 %v1654_v27 }
 0xb28   :  { %v1752_v35 = vpop.eup %1751 }
 0xb29   :  { %v531_v36 = vadd.f32 1.0, %v1752_v35 }
 0xb2b   :  { %1753 = vrcp.f32 %v531_v36  ;;  %v543_v43 = vand.u32 2147483648, %v531_v36  ;;  %vm537_vm7 = vweird.f32 %v531_v36  ;;  %v541_v44 = vand.u32 2147483647, %v531_v36 }
 0xb2d   :  { %v544_v46 = vor.u32 1.1754944e-38, %v543_v43  ;;  %vm542_vm9 = vcmp.eq.f32.partialorder %v541_v44, 8.507059e+37  ;;  %v2223_v43 = vld [vmem:[%s2484_s1 + $0x18] sm:$0xff]  ;;  %v2229_v44 = vld [vmem:[%s2484_s1 + $0x10] sm:$0xff] }
 0xb31   :  { %v1754_v38 = vpop.eup %1753 }
 0xb32   :  { %v533_v10 = vmul.f32 %v1754_v38, %v531_v36  ;;  %vm538_vm6 = vweird.f32 %v1754_v38 }
 0xb33   :  { %vm539_vm8 = vmor %vm537_vm7, %vm538_vm6 }
 0xb34   :  { %v534_v39 = vsub.f32 1.0, %v533_v10 }
 0xb36   :  { %v535_v41 = vmul.f32 %v1754_v38, %v534_v39 }
 0xb38   :  { %v536_v42 = vadd.f32 %v1754_v38, %v535_v41 }
 0xb3a   :  { %v540_v45 = vsel %vm539_vm8, %v1754_v38, %v536_v42 }
 0xb63   :  { %v631_v37 = vpop.permute.xlu1 %630 }
 0xb64   :  { %1661 = vmatmul.msk.f32.vlgmr.msra.gmra.mxu2 %vm37_vm4, %v631_v37 }
 0xb65   :  { %1227 = vmatpush.msra.mxu2 %v1908_v0  ;;  %v545_v0 = vsel %vm542_vm9, %v544_v46, %v540_v45  ;;  %v2235_v45 = vld [vmem:[%s2484_s1 + $0x8] sm:$0xff]  ;;  %v2241_v46 = vld [vmem:[%s2484_s1] sm:$0xff] }
 0xb66   :  { %v558_v9 = vsub.f32 1.0, %v545_v0  ;;  %v564_v13 = vmul.f32 %v545_v0, %v2162_v22 }
 0xb67   :  { %1228 = vmatpush.msra.mxu2 %v1913_v1 }
 0xb69   :  { %1229 = vmatpush.msra.mxu2 %v1920_v2 }
 0xb6b   :  { %1230 = vmatpush.msra.mxu2 %v1927_v3 }
 0xb7a   :  { %v549_v47 = vpop.permute.xlu2 %548 }
 0xb7b   :  { %v551_v48 = vmul.f32 %v549_v47, %v545_v0 }
 0xb7d   :  { %553 = vrot.lane.b32.xlu1 %v551_v48, %s1862_s11 }
 0xbe7   :  { %v716_v1 = vpop.f32.mrf.mxu2 }
 0xbe8   :  { %v717_v2 = vadd.f32 %v1944_v5, %v716_v1 }
 0xbea   :  { %740 = vrot.lane.b32.xlu0 %v717_v2, %s1862_s11  ;;  %v719_v52 = vadd.f32 %v1660_v51, %v717_v2  ;;  %v2248_v2 = vld [vmem:[%s2485_s2] ss:$0 sm:$0xff] }
 0xbec   :  { %v1662_v53 = vmul.f32 -1.442695, %v719_v52 }
 0xbef   :  { %v554_v3 = vpop.permute.xlu1 %553 }
 0xbf0   :  { %v556_v49 = vadd.f32 %v554_v3, %v526_v26 }
 0xbf2   :  { %1755 = vtanh.f32 %v556_v49  ;;  %v1665_v49 = vld [vmem:[%s2486_s0 + $0xc] sm:$0x3] }
 0xbf3   :  { %1757 = vpow2.f32 %v1662_v53 }
 0xbf8   :  { %v1756_v50 = vpop.eup %1755 }
 0xbf9   :  { %560 = vrot.lane.b32.xlu0 %v1756_v50, %s1863_s14  ;;  %v1758_v54 = vpop.eup %1757 }
 0xbfa   :  { %v723_v55 = vadd.f32 1.0, %v1758_v54 }
 0xbfc   :  { %1759 = vrcp.f32 %v723_v55  ;;  %v735_v60 = vand.u32 2147483648, %v723_v55  ;;  %vm729_vm11 = vweird.f32 %v723_v55  ;;  %v733_v61 = vand.u32 2147483647, %v723_v55 }
 0xbfe   :  { %v736_v63 = vor.u32 1.1754944e-38, %v735_v60  ;;  %vm734_vm13 = vcmp.eq.f32.partialorder %v733_v61, 8.507059e+37  ;;  %v2264_v60 = vld [vmem:[%s2487_s3 + $0x38] sm:$0xff] }
 0xc02   :  { %v1760_v56 = vpop.eup %1759 }
 0xc03   :  { %v725_v5 = vmul.f32 %v1760_v56, %v723_v55  ;;  %vm730_vm10 = vweird.f32 %v1760_v56 }
 0xc04   :  { %vm731_vm12 = vmor %vm729_vm11, %vm730_vm10 }
 0xc05   :  { %v726_v57 = vsub.f32 1.0, %v725_v5 }
 0xc07   :  { %v727_v58 = vmul.f32 %v1760_v56, %v726_v57 }
 0xc09   :  { %v728_v59 = vadd.f32 %v1760_v56, %v727_v58 }
 0xc0b   :  { %v732_v62 = vsel %vm731_vm12, %v1760_v56, %v728_v59 }
 0xc0c   :  { %v737_v7 = vsel %vm734_vm13, %v736_v63, %v732_v62  ;;  %v2270_v62 = vld [vmem:[%s2487_s3 + $0x30] sm:$0xff]  ;;  %v2276_v63 = vld [vmem:[%s2487_s3 + $0x28] sm:$0xff] }
 0xc5c   :  { %v741_v6 = vpop.permute.xlu0 %740 }
 0xc5d   :  { %v743_v8 = vmul.f32 %v741_v6, %v737_v7 }
 0xc5f   :  { %745 = vrot.lane.b32.xlu2 %v743_v8, %s1862_s11  ;;  %v2288_v8 = vld [vmem:[%s2487_s3 + $0x18] sm:$0xff] }
 0xc6b   :  { %v561_v12 = vpop.permute.xlu0 %560 }
 0xc6c   :  { %v563_v15 = vmul.f32 %v561_v12, %v558_v9  ;;  %v2294_v12 = vld [vmem:[%s2487_s3 + $0x10] sm:$0xff] }
 0xc6e   :  { %v2197_v11 = vadd.f32 %v564_v13, %v563_v15 }
 0xc70   :  { %v633_v18 = vsel %vm37_vm4, %v631_v37, %v2197_v11 }
 0xc71   :  { %1658 = vmatmul.msk.f32.vlgmr.msrb.gmra.mxu0 %vm117_vm5, %v633_v18 }
 0xc72   :  { %1161 = vmatpush.msrb.mxu0 %v1956_v28 }
 0xc74   :  { %1162 = vmatpush.msrb.mxu0 %v1961_v29 }
 0xc76   :  { %1163 = vmatpush.msrb.mxu0 %v1968_v30  ;;  %v750_v30 = vsub.f32 1.0, %v737_v7 }
 0xc78   :  { %1164 = vmatpush.msrb.mxu0 %v1976_v31 }
 0xc7a   :  { %1165 = vmatpush.msrb.mxu0 %v1984_v32 }
 0xc7c   :  { %1166 = vmatpush.msrb.mxu0 %v1992_v33  ;;  %v756_v33 = vmul.f32 %v737_v7, %v2177_v24  ;;  %v2282_v7 = vld [vmem:[%s2487_s3 + $0x20] sm:$0xff] }
 0xc7e   :  { %1167 = vmatpush.msrb.mxu0 %v2000_v34 }
 0xc80   :  { %1168 = vmatpush.msrb.mxu0 %v2016_v40 }
 0xcb9   :  { %v746_v19 = vpop.permute.xlu2 %745 }
 0xcba   :  { %v748_v20 = vadd.f32 %v1660_v51, %v746_v19 }
 0xcbc   :  { %1761 = vtanh.f32 %v748_v20 }
 0xcc2   :  { %v1762_v22 = vpop.eup %1761 }
 0xcc3   :  { %752 = vrot.lane.b32.xlu1 %v1762_v22, %s1863_s14 }
 0xcee   :  { %v654_v28 = vpop.f32.mrf.mxu0 }
 0xcef   :  { %v655_v29 = vadd.f32 %v2073_v14, %v654_v28 }
 0xcf1   :  { %677 = vrot.lane.b32.xlu0 %v655_v29, %s1864_s13  ;;  %v1659_v32 = vmul.f32 -1.442695, %v655_v29 }
 0xcf3   :  { %1763 = vpow2.f32 %v1659_v32 }
 0xcf9   :  { %v1764_v4 = vpop.eup %1763 }
 0xcfa   :  { %v660_v16 = vadd.f32 1.0, %v1764_v4 }
 0xcfc   :  { %1765 = vrcp.f32 %v660_v16  ;;  %v672_v36 = vand.u32 2147483648, %v660_v16  ;;  %vm666_vm15 = vweird.f32 %v660_v16  ;;  %v670_v37 = vand.u32 2147483647, %v660_v16 }
 0xcfe   :  { %v673_v38 = vor.u32 1.1754944e-38, %v672_v36  ;;  %vm671_vm1 = vcmp.eq.f32.partialorder %v670_v37, 8.507059e+37 }
 0xd02   :  { %v1766_v23 = vpop.eup %1765 }
 0xd03   :  { %v662_v25 = vmul.f32 %v1766_v23, %v660_v16  ;;  %vm667_vm14 = vweird.f32 %v1766_v23 }
 0xd04   :  { %vm668_vm0 = vmor %vm666_vm15, %vm667_vm14 }
 0xd05   :  { %v663_v26 = vsub.f32 1.0, %v662_v25 }
 0xd07   :  { %v664_v27 = vmul.f32 %v1766_v23, %v663_v26 }
 0xd09   :  { %v665_v35 = vadd.f32 %v1766_v23, %v664_v27 }
 0xd0b   :  { %v669_v24 = vsel %vm668_vm0, %v1766_v23, %v665_v35 }
 0xd0c   :  { %v674_v39 = vsel %vm671_vm1, %v673_v38, %v669_v24 }
 0xd0d   :  { %v687_v54 = vsub.f32 1.0, %v674_v39  ;;  %v693_v56 = vmul.f32 %v674_v39, %v2197_v11 }
 0xd35   :  { %v753_v31 = vpop.permute.xlu1 %752 }
 0xd36   :  { %v755_v17 = vmul.f32 %v753_v31, %v750_v30 }
 0xd38   :  { %v2214_v21 = vadd.f32 %v756_v33, %v755_v17 }
 0xd3a   :  { %759 = vrot.lane.b32.xlu2 %v2214_v21, %s1863_s14 }
 0xd63   :  { %v678_v10 = vpop.permute.xlu0 %677 }
 0xd64   :  { %v680_v41 = vmul.f32 %v678_v10, %v674_v39 }
 0xd66   :  { %682 = vrot.lane.b32.xlu1 %v680_v41, %s1862_s11 }
 0xd94   :  { %v760_v42 = vpop.permute.xlu2 %759 }
 0xd95   :  { %1666 = vmatmul.msk.f32.vlgmr.msra.gmra.mxu1 %vm37_vm4, %v760_v42 }
 0xd96   :  { %1356 = vmatpush.msra.mxu1 %v2223_v43 }
 0xd98   :  { %1357 = vmatpush.msra.mxu1 %v2229_v44 }
 0xd9a   :  { %1358 = vmatpush.msra.mxu1 %v2235_v45 }
 0xd9c   :  { %1359 = vmatpush.msra.mxu1 %v2241_v46 }
 0xdd8   :  { %v683_v47 = vpop.permute.xlu1 %682 }
 0xdd9   :  { %v685_v0 = vadd.f32 %v683_v47, %v655_v29 }
 0xddb   :  { %1767 = vtanh.f32 %v685_v0 }
 0xde1   :  { %v1768_v48 = vpop.eup %1767 }
 0xde2   :  { %689 = vrot.lane.b32.xlu1 %v1768_v48, %s1863_s14 }
 0xe12   :  { %v845_v1 = vpop.f32.mrf.mxu1 }
 0xe13   :  { %v846_v3 = vadd.f32 %v2248_v2, %v845_v1 }
 0xe15   :  { %869 = vrot.lane.b32.xlu2 %v846_v3, %s1862_s11  ;;  %v848_v50 = vadd.f32 %v1665_v49, %v846_v3 }
 0xe17   :  { %v1667_v51 = vmul.f32 -1.442695, %v848_v50 }
 0xe19   :  { %1769 = vpow2.f32 %v1667_v51 }
 0xe1f   :  { %v1770_v52 = vpop.eup %1769 }
 0xe20   :  { %v852_v53 = vadd.f32 1.0, %v1770_v52 }
 0xe22   :  { %1771 = vrcp.f32 %v852_v53  ;;  %v864_v15 = vand.u32 2147483648, %v852_v53  ;;  %vm858_vm3 = vweird.f32 %v852_v53  ;;  %v862_v11 = vand.u32 2147483647, %v852_v53 }
 0xe24   :  { %v865_v19 = vor.u32 1.1754944e-38, %v864_v15  ;;  %vm863_vm7 = vcmp.eq.f32.partialorder %v862_v11, 8.507059e+37 }
 0xe28   :  { %v1772_v58 = vpop.eup %1771 }
 0xe29   :  { %v854_v61 = vmul.f32 %v1772_v58, %v852_v53  ;;  %vm859_vm2 = vweird.f32 %v1772_v58 }
 0xe2a   :  { %vm860_vm6 = vmor %vm858_vm3, %vm859_vm2 }
 0xe2b   :  { %v855_v6 = vsub.f32 1.0, %v854_v61 }
 0xe2d   :  { %v856_v9 = vmul.f32 %v1772_v58, %v855_v6 }
 0xe2f   :  { %v857_v13 = vadd.f32 %v1772_v58, %v856_v9 }
 0xe31   :  { %v861_v18 = vsel %vm860_vm6, %v1772_v58, %v857_v13 }
 0xe32   :  { %v866_v22 = vsel %vm863_vm7, %v865_v19, %v861_v18 }
 0xe33   :  { %v879_v25 = vsub.f32 1.0, %v866_v22 }
 0xe54   :  { %v690_v55 = vpop.permute.xlu1 %689 }
 0xe55   :  { %v692_v5 = vmul.f32 %v690_v55, %v687_v54  ;;  %v1670_v54 = vld [vmem:[%s2486_s0 + $0xe] sm:$0x3] }
 0xe57   :  { %v2256_v57 = vadd.f32 %v693_v56, %v692_v5 }
 0xe59   :  { %v762_v59 = vsel %vm37_vm4, %v760_v42, %v2256_v57 }
 0xe5a   :  { %1663 = vmatmul.msk.f32.vlgmr.msra.gmra.mxu3 %vm117_vm5, %v762_v59 }
 0xe5b   :  { %1290 = vmatpush.msra.mxu3 %v2264_v60 }
 0xe5d   :  { %1291 = vmatpush.msra.mxu3 %v2270_v62 }
 0xe5f   :  { %1292 = vmatpush.msra.mxu3 %v2276_v63 }
 0xe61   :  { %1293 = vmatpush.msra.mxu3 %v2282_v7 }
 0xe63   :  { %1294 = vmatpush.msra.mxu3 %v2288_v8 }
 0xe65   :  { %1295 = vmatpush.msra.mxu3 %v2294_v12 }
 0xe67   :  { %1296 = vmatpush.msra.mxu3 %v2000_v34 }
 0xe69   :  { %1297 = vmatpush.msra.mxu3 %v2016_v40 }
 0xe6f   :  { %v870_v20 = vpop.permute.xlu2 %869 }
 0xe70   :  { %v872_v28 = vmul.f32 %v870_v20, %v866_v22 }
 0xe72   :  { %874 = vrot.lane.b32.xlu0 %v872_v28, %s1862_s11 }
 0xedd   :  { %v783_v29 = vpop.f32.mrf.mxu3 }
 0xede   :  { %v784_v30 = vadd.f32 %v2073_v14, %v783_v29  ;;  %v885_v14 = vmul.f32 %v866_v22, %v2214_v21  ;;  %v2348_v29 = vld [vmem:[%s2488_s4] ss:$0 sm:$0xff] }
 0xee0   :  { %806 = vrot.lane.b32.xlu1 %v784_v30, %s1864_s13  ;;  %v1664_v32 = vmul.f32 -1.442695, %v784_v30 }
 0xee4   :  { %v875_v34 = vpop.permute.xlu0 %874 }
 0xee5   :  { %v877_v31 = vadd.f32 %v1665_v49, %v875_v34 }
 0xee7   :  { %1773 = vtanh.f32 %v877_v31 }
 0xee8   :  { %1775 = vpow2.f32 %v1664_v32 }
 0xeed   :  { %v1774_v40 = vpop.eup %1773 }
 0xeee   :  { %881 = vrot.lane.b32.xlu2 %v1774_v40, %s1863_s14  ;;  %v1776_v33 = vpop.eup %1775 }
 0xeef   :  { %v789_v17 = vadd.f32 1.0, %v1776_v33 }
 0xef1   :  { %1777 = vrcp.f32 %v789_v17  ;;  %v801_v24 = vand.u32 2147483648, %v789_v17  ;;  %vm795_vm9 = vweird.f32 %v789_v17  ;;  %v799_v38 = vand.u32 2147483647, %v789_v17 }
 0xef3   :  { %v802_v39 = vor.u32 1.1754944e-38, %v801_v24  ;;  %vm800_vm11 = vcmp.eq.f32.partialorder %v799_v38, 8.507059e+37 }
 0xef7   :  { %v1778_v4 = vpop.eup %1777 }
 0xef8   :  { %v791_v16 = vmul.f32 %v1778_v4, %v789_v17  ;;  %vm796_vm8 = vweird.f32 %v1778_v4 }
 0xef9   :  { %vm797_vm10 = vmor %vm795_vm9, %vm796_vm8 }
 0xefa   :  { %v792_v23 = vsub.f32 1.0, %v791_v16 }
 0xefc   :  { %v793_v26 = vmul.f32 %v1778_v4, %v792_v23 }
 0xefe   :  { %v794_v37 = vadd.f32 %v1778_v4, %v793_v26 }
 0xf00   :  { %v798_v10 = vsel %vm797_vm10, %v1778_v4, %v794_v37 }
 0xf01   :  { %v803_v42 = vsel %vm800_vm11, %v802_v39, %v798_v10 }
 0xf02   :  { %v816_v3 = vsub.f32 1.0, %v803_v42  ;;  %v822_v50 = vmul.f32 %v803_v42, %v2256_v57 }
 0xf48   :  { %v882_v27 = vpop.permute.xlu2 %881 }
 0xf49   :  { %v884_v35 = vmul.f32 %v882_v27, %v879_v25 }
 0xf4b   :  { %v2304_v36 = vadd.f32 %v885_v14, %v884_v35 }
 0xf4d   :  { %888 = vrot.lane.b32.xlu0 %v2304_v36, %s1863_s14 }
 0xf52   :  { %v807_v41 = vpop.permute.xlu1 %806 }
 0xf53   :  { %v809_v47 = vmul.f32 %v807_v41, %v803_v42 }
 0xf55   :  { %811 = vrot.lane.b32.xlu2 %v809_v47, %s1862_s11 }
 0xfaf   :  { %v812_v21 = vpop.permute.xlu2 %811 }
 0xfb0   :  { %v814_v0 = vadd.f32 %v812_v21, %v784_v30 }
 0xfb2   :  { %1779 = vtanh.f32 %v814_v0 }
 0xfb8   :  { %v1780_v48 = vpop.eup %1779 }
 0xfb9   :  { %818 = vrot.lane.b32.xlu1 %v1780_v48, %s1863_s14 }
 0xfbf   :  { %v889_v1 = vpop.permute.xlu0 %888 }
 0xfc0   :  { %1671 = vmatmul.msk.f32.vlgmr.msra.gmra.mxu0 %vm37_vm4, %v889_v1 }
 0xfc1   :  { %1485 = vmatpush.msra.mxu0 %v2223_v43 }
 0xfc3   :  { %1486 = vmatpush.msra.mxu0 %v2229_v44 }
 0xfc5   :  { %1487 = vmatpush.msra.mxu0 %v2235_v45  ;;  %v2331_v45 = vld [vmem:[%s2487_s3 + $0x8] sm:$0xff] }
 0xfc7   :  { %1488 = vmatpush.msra.mxu0 %v2241_v46  ;;  %v2338_v46 = vld [vmem:[%s2487_s3] sm:$0xff] }
0x102b   :  { %v819_v49 = vpop.permute.xlu1 %818 }
0x102c   :  { %v821_v51 = vmul.f32 %v819_v49, %v816_v3 }
0x102e   :  { %v2316_v52 = vadd.f32 %v822_v50, %v821_v51 }
0x1030   :  { %v891_v53 = vsel %vm37_vm4, %v889_v1, %v2316_v52 }
0x1031   :  { %1668 = vmatmul.msk.f32.vlgmr.msrb.gmra.mxu2 %vm117_vm5, %v891_v53 }
0x1032   :  { %1419 = vmatpush.msrb.mxu2 %v2264_v60 }
0x1034   :  { %1420 = vmatpush.msrb.mxu2 %v2270_v62 }
0x1036   :  { %1421 = vmatpush.msrb.mxu2 %v2276_v63 }
0x1038   :  { %1422 = vmatpush.msrb.mxu2 %v2282_v7 }
0x103a   :  { %1423 = vmatpush.msrb.mxu2 %v2288_v8 }
0x103c   :  { %1424 = vmatpush.msrb.mxu2 %v2294_v12 }
0x103d   :  { %v974_v43 = vpop.f32.mrf.mxu0 }
0x103e   :  { %v975_v44 = vadd.f32 %v2248_v2, %v974_v43  ;;  %1425 = vmatpush.msrb.mxu2 %v2331_v45 }
0x1040   :  { %998 = vrot.lane.b32.xlu0 %v975_v44, %s1862_s11  ;;  %1426 = vmatpush.msrb.mxu2 %v2338_v46  ;;  %v977_v55 = vadd.f32 %v1670_v54, %v975_v44 }
0x1042   :  { %v1672_v56 = vmul.f32 -1.442695, %v977_v55 }
0x1044   :  { %1781 = vpow2.f32 %v1672_v56 }
0x104a   :  { %v1782_v5 = vpop.eup %1781 }
0x104b   :  { %v981_v57 = vadd.f32 1.0, %v1782_v5 }
0x104d   :  { %1783 = vrcp.f32 %v981_v57  ;;  %v993_v13 = vand.u32 2147483648, %v981_v57  ;;  %vm987_vm13 = vweird.f32 %v981_v57  ;;  %v991_v15 = vand.u32 2147483647, %v981_v57 }
0x104f   :  { %v994_v18 = vor.u32 1.1754944e-38, %v993_v13  ;;  %vm992_vm15 = vcmp.eq.f32.partialorder %v991_v15, 8.507059e+37 }
0x1053   :  { %v1784_v58 = vpop.eup %1783 }
0x1054   :  { %v983_v59 = vmul.f32 %v1784_v58, %v981_v57  ;;  %vm988_vm12 = vweird.f32 %v1784_v58 }
0x1055   :  { %vm989_vm14 = vmor %vm987_vm13, %vm988_vm12 }
0x1056   :  { %v984_v61 = vsub.f32 1.0, %v983_v59 }
0x1058   :  { %v985_v6 = vmul.f32 %v1784_v58, %v984_v61 }
0x105a   :  { %v986_v9 = vadd.f32 %v1784_v58, %v985_v6 }
0x105c   :  { %v990_v11 = vsel %vm989_vm14, %v1784_v58, %v986_v9 }
0x105d   :  { %v995_v20 = vsel %vm992_vm15, %v994_v18, %v990_v11 }
0x105e   :  { %v1008_v39 = vsub.f32 1.0, %v995_v20  ;;  %v1014_v42 = vmul.f32 %v995_v20, %v2304_v36 }
0x10b2   :  { %v999_v19 = vpop.permute.xlu0 %998 }
0x10b3   :  { %v1001_v22 = vmul.f32 %v999_v19, %v995_v20 }
0x10b4   :  { %v912_v28 = vpop.f32.mrf.mxu2 }
0x10b5   :  { %1003 = vrot.lane.b32.xlu2 %v1001_v22, %s1862_s11  ;;  %v913_v30 = vadd.f32 %v2348_v29, %v912_v28 }
0x10b7   :  { %v1669_v34 = vmul.f32 -1.442695, %v913_v30 }
0x10b9   :  { %1785 = vpow2.f32 %v1669_v34 }
0x10bd   :  { %935 = vrot.lane.b32.xlu2 %v913_v30, %s1864_s13 }
0x10bf   :  { %v1786_v31 = vpop.eup %1785 }
0x10c0   :  { %v918_v40 = vadd.f32 1.0, %v1786_v31 }
0x10c2   :  { %1787 = vrcp.f32 %v918_v40  ;;  %v930_v27 = vand.u32 2147483648, %v918_v40  ;;  %vm924_vm1 = vweird.f32 %v918_v40  ;;  %v928_v14 = vand.u32 2147483647, %v918_v40 }
0x10c4   :  { %v931_v37 = vor.u32 1.1754944e-38, %v930_v27  ;;  %vm929_vm3 = vcmp.eq.f32.partialorder %v928_v14, 8.507059e+37 }
0x10c8   :  { %v1788_v32 = vpop.eup %1787 }
0x10c9   :  { %v920_v33 = vmul.f32 %v1788_v32, %v918_v40  ;;  %vm925_vm0 = vweird.f32 %v1788_v32 }
0x10ca   :  { %vm926_vm2 = vmor %vm924_vm1, %vm925_vm0 }
0x10cb   :  { %v921_v4 = vsub.f32 1.0, %v920_v33 }
0x10cd   :  { %v922_v23 = vmul.f32 %v1788_v32, %v921_v4 }
0x10cf   :  { %v923_v25 = vadd.f32 %v1788_v32, %v922_v23 }
0x10d1   :  { %v927_v35 = vsel %vm926_vm2, %v1788_v32, %v923_v25 }
0x10d2   :  { %v932_v38 = vsel %vm929_vm3, %v931_v37, %v927_v35 }
0x10d3   :  { %v945_v49 = vsub.f32 1.0, %v932_v38  ;;  %v951_v51 = vmul.f32 %v932_v38, %v2316_v52 }
0x110f   :  { %v1004_v17 = vpop.permute.xlu2 %1003 }
0x1110   :  { %v1006_v16 = vadd.f32 %v1670_v54, %v1004_v17 }
0x1112   :  { %1789 = vtanh.f32 %v1006_v16 }
0x1117   :  { %v936_v24 = vpop.permute.xlu2 %935 }
0x1118   :  { %v1790_v26 = vpop.eup %1789  ;;  %v938_v10 = vmul.f32 %v936_v24, %v932_v38 }
0x1119   :  { %1010 = vrot.lane.b32.xlu0 %v1790_v26, %s1863_s14 }
0x1121   :  { %940 = vrot.lane.b32.xlu0 %v938_v10, %s1862_s11 }
0x118b   :  { %v1011_v41 = vpop.permute.xlu0 %1010 }
0x118c   :  { %v1013_v47 = vmul.f32 %v1011_v41, %v1008_v39 }
0x118e   :  { %v2355_v21 = vadd.f32 %v1014_v42, %v1013_v47 }
0x1190   :  { %1017 = vrot.lane.b32.xlu1 %v2355_v21, %s1863_s14 }
0x1193   :  { %v941_v0 = vpop.permute.xlu0 %940 }
0x1194   :  { %v943_v48 = vadd.f32 %v941_v0, %v913_v30 }
0x1196   :  { %1791 = vtanh.f32 %v943_v48 }
0x119c   :  { %v1792_v1 = vpop.eup %1791 }
0x119d   :  { %947 = vrot.lane.b32.xlu1 %v1792_v1, %s1863_s14 }
0x1202   :  { %v1018_v3 = vpop.permute.xlu1 %1017 }
0x1203   :  { %1676 = vmatmul.msk.f32.vlgmr.msrb.gmra.mxu3 %vm37_vm4, %v1018_v3 }
0x120f   :  { %v948_v50 = vpop.permute.xlu1 %947 }
0x1210   :  { %v950_v36 = vmul.f32 %v948_v50, %v945_v49 }
0x1212   :  { %v2362_v53 = vadd.f32 %v951_v51, %v950_v36  ;;  %v1680_v51 = vld [vmem:[%s2486_s0 + $0x12] sm:$0x3] }
0x1214   :  { %v1020_v43 = vsel %vm37_vm4, %v1018_v3, %v2362_v53 }
0x1215   :  { %1673 = vmatmul.msk.f32.vlgmr.msrb.gmra.mxu1 %vm117_vm5, %v1020_v43 }
0x1216   :  { %1548 = vmatpush.msrb.mxu1 %v2264_v60  ;;  %v1675_v60 = vld [vmem:[%s2486_s0 + $0x10] sm:$0x3] }
0x1218   :  { %1549 = vmatpush.msrb.mxu1 %v2270_v62 }
0x121a   :  { %1550 = vmatpush.msrb.mxu1 %v2276_v63 }
0x121c   :  { %1551 = vmatpush.msrb.mxu1 %v2282_v7 }
0x121e   :  { %1552 = vmatpush.msrb.mxu1 %v2288_v8 }
0x1220   :  { %1553 = vmatpush.msrb.mxu1 %v2294_v12 }
0x1222   :  { %1554 = vmatpush.msrb.mxu1 %v2331_v45 }
0x1224   :  { %1555 = vmatpush.msrb.mxu1 %v2338_v46 }
0x1286   :  { %v1103_v52 = vpop.f32.mrf.mxu3 }
0x1287   :  { %v1104_v44 = vadd.f32 %v2248_v2, %v1103_v52 }
0x1289   :  { %1127 = vrot.lane.b32.xlu2 %v1104_v44, %s1862_s11  ;;  %v1106_v62 = vadd.f32 %v1675_v60, %v1104_v44 }
0x128b   :  { %v1677_v63 = vmul.f32 -1.442695, %v1106_v62 }
0x128d   :  { %1793 = vpow2.f32 %v1677_v63 }
0x1292   :  { %v1041_v9 = vpop.f32.mrf.mxu1 }
0x1293   :  { %v1794_v7 = vpop.eup %1793  ;;  %v1042_v13 = vadd.f32 %v2348_v29, %v1041_v9 }
0x1294   :  { %v1110_v8 = vadd.f32 1.0, %v1794_v7 }
0x1295   :  { %v1674_v15 = vmul.f32 -1.442695, %v1042_v13 }
0x1296   :  { %1795 = vrcp.f32 %v1110_v8  ;;  %v1122_v56 = vand.u32 2147483648, %v1110_v8  ;;  %vm1116_vm7 = vweird.f32 %v1110_v8  ;;  %v1120_v5 = vand.u32 2147483647, %v1110_v8 }
0x1297   :  { %1797 = vpow2.f32 %v1674_v15 }
0x1298   :  { %v1123_v58 = vor.u32 1.1754944e-38, %v1122_v56  ;;  %vm1121_vm9 = vcmp.eq.f32.partialorder %v1120_v5, 8.507059e+37 }
0x129c   :  { %v1796_v12 = vpop.eup %1795 }
0x129d   :  { %v1112_v54 = vmul.f32 %v1796_v12, %v1110_v8  ;;  %vm1117_vm6 = vweird.f32 %v1796_v12  ;;  %v1798_v11 = vpop.eup %1797 }
0x129e   :  { %vm1118_vm8 = vmor %vm1116_vm7, %vm1117_vm6  ;;  %v1047_v18 = vadd.f32 1.0, %v1798_v11 }
0x129f   :  { %v1113_v45 = vsub.f32 1.0, %v1112_v54 }
0x12a0   :  { %1799 = vrcp.f32 %v1047_v18  ;;  %v1059_v32 = vand.u32 2147483648, %v1047_v18  ;;  %vm1053_vm11 = vweird.f32 %v1047_v18  ;;  %v1057_v33 = vand.u32 2147483647, %v1047_v18 }
0x12a1   :  { %v1114_v55 = vmul.f32 %v1796_v12, %v1113_v45 }
0x12a2   :  { %v1060_v4 = vor.u32 1.1754944e-38, %v1059_v32  ;;  %vm1058_vm13 = vcmp.eq.f32.partialorder %v1057_v33, 8.507059e+37 }
0x12a3   :  { %v1115_v46 = vadd.f32 %v1796_v12, %v1114_v55 }
0x12a5   :  { %v1119_v57 = vsel %vm1118_vm8, %v1796_v12, %v1115_v46 }
0x12a6   :  { %v1124_v59 = vsel %vm1121_vm9, %v1123_v58, %v1119_v57  ;;  %v1800_v19 = vpop.eup %1799 }
0x12a7   :  { %v1049_v20 = vmul.f32 %v1800_v19, %v1047_v18  ;;  %vm1054_vm10 = vweird.f32 %v1800_v19  ;;  %v1137_v26 = vsub.f32 1.0, %v1124_v59  ;;  %v1143_v14 = vmul.f32 %v1124_v59, %v2355_v21 }
0x12a8   :  { %vm1055_vm12 = vmor %vm1053_vm11, %vm1054_vm10 }
0x12a9   :  { %v1050_v28 = vsub.f32 1.0, %v1049_v20 }
0x12ab   :  { %v1051_v34 = vmul.f32 %v1800_v19, %v1050_v28 }
0x12ad   :  { %v1052_v31 = vadd.f32 %v1800_v19, %v1051_v34 }
0x12af   :  { %v1056_v17 = vsel %vm1055_vm12, %v1800_v19, %v1052_v31 }
0x12b0   :  { %v1061_v23 = vsel %vm1058_vm13, %v1060_v4, %v1056_v17 }
0x12b1   :  { %v1074_v41 = vsub.f32 1.0, %v1061_v23  ;;  %v1080_v47 = vmul.f32 %v1061_v23, %v2362_v53 }
0x12e3   :  { %v1128_v61 = vpop.permute.xlu2 %1127 }
0x12e4   :  { %v1130_v6 = vmul.f32 %v1128_v61, %v1124_v59 }
0x12e6   :  { %1132 = vrot.lane.b32.xlu0 %v1130_v6, %s1862_s11 }
0x12ee   :  { %1064 = vrot.lane.b32.xlu0 %v1042_v13, %s1864_s13 }
0x1358   :  { %v1133_v22 = vpop.permute.xlu0 %1132 }
0x1359   :  { %v1135_v30 = vadd.f32 %v1675_v60, %v1133_v22 }
0x135b   :  { %1801 = vtanh.f32 %v1135_v30 }
0x1360   :  { %v1065_v16 = vpop.permute.xlu0 %1064 }
0x1361   :  { %v1802_v40 = vpop.eup %1801  ;;  %v1067_v25 = vmul.f32 %v1065_v16, %v1061_v23 }
0x1362   :  { %1139 = vrot.lane.b32.xlu1 %v1802_v40, %s1863_s14 }
0x136a   :  { %1069 = vrot.lane.b32.xlu1 %v1067_v25, %s1862_s11 }
0x13d4   :  { %v1140_v27 = vpop.permute.xlu1 %1139 }
0x13d5   :  { %v1142_v35 = vmul.f32 %v1140_v27, %v1137_v26 }
0x13d7   :  { %v2386_v37 = vadd.f32 %v1143_v14, %v1142_v35 }
0x13d9   :  { %1146 = vrot.lane.b32.xlu2 %v2386_v37, %s1863_s14 }
0x13dc   :  { %v1070_v24 = vpop.permute.xlu1 %1069 }
0x13dd   :  { %v1072_v38 = vadd.f32 %v1070_v24, %v1042_v13 }
0x13df   :  { %1803 = vtanh.f32 %v1072_v38 }
0x13e5   :  { %v1804_v10 = vpop.eup %1803 }
0x13e6   :  { %1076 = vrot.lane.b32.xlu2 %v1804_v10, %s1863_s14 }
0x1433   :  { %v1147_v39 = vpop.permute.xlu2 %1146 }
0x1434   :  { %1681 = vmatmul.msk.f32.vlgmr.msra.gmra.mxu2 %vm37_vm4, %v1147_v39 }
0x1440   :  { %v1077_v42 = vpop.permute.xlu2 %1076 }
0x1441   :  { %v1079_v21 = vmul.f32 %v1077_v42, %v1074_v41 }
0x1443   :  { %v2393_v0 = vadd.f32 %v1080_v47, %v1079_v21  ;;  %v1685_v47 = vld [vmem:[%s2486_s0 + $0x14] sm:$0x3] }
0x1445   :  { %v1149_v48 = vsel %vm37_vm4, %v1147_v39, %v2393_v0 }
0x1446   :  { %1678 = vmatmul.msk.f32.vlgmr.msrb.gmra.mxu0 %vm117_vm5, %v1149_v48 }
0x14b7   :  { %v1232_v1 = vpop.f32.mrf.mxu2 }
0x14b8   :  { %v1233_v3 = vadd.f32 %v2248_v2, %v1232_v1 }
0x14ba   :  { %1256 = vrot.lane.b32.xlu0 %v1233_v3, %s1862_s11  ;;  %v1235_v36 = vadd.f32 %v1680_v51, %v1233_v3 }
0x14bc   :  { %v1682_v53 = vmul.f32 -1.442695, %v1235_v36 }
0x14be   :  { %1805 = vpow2.f32 %v1682_v53 }
0x14c3   :  { %v1170_v49 = vpop.f32.mrf.mxu0 }
0x14c4   :  { %v1171_v50 = vadd.f32 %v2348_v29, %v1170_v49  ;;  %v1806_v43 = vpop.eup %1805 }
0x14c5   :  { %v1239_v52 = vadd.f32 1.0, %v1806_v43 }
0x14c6   :  { %1193 = vrot.lane.b32.xlu0 %v1171_v50, %s1864_s13  ;;  %v1679_v5 = vmul.f32 -1.442695, %v1171_v50 }
0x14c7   :  { %1807 = vrcp.f32 %v1239_v52  ;;  %v1251_v8 = vand.u32 2147483648, %v1239_v52  ;;  %vm1245_vm15 = vweird.f32 %v1239_v52  ;;  %v1249_v12 = vand.u32 2147483647, %v1239_v52 }
0x14c8   :  { %1809 = vpow2.f32 %v1679_v5 }
0x14c9   :  { %v1252_v45 = vor.u32 1.1754944e-38, %v1251_v8  ;;  %vm1250_vm1 = vcmp.eq.f32.partialorder %v1249_v12, 8.507059e+37 }
0x14cd   :  { %v1808_v44 = vpop.eup %1807 }
0x14ce   :  { %v1241_v60 = vmul.f32 %v1808_v44, %v1239_v52  ;;  %vm1246_vm14 = vweird.f32 %v1808_v44  ;;  %v1810_v57 = vpop.eup %1809 }
0x14cf   :  { %vm1247_vm0 = vmor %vm1245_vm15, %vm1246_vm14  ;;  %v1176_v58 = vadd.f32 1.0, %v1810_v57 }
0x14d0   :  { %v1242_v62 = vsub.f32 1.0, %v1241_v60 }
0x14d1   :  { %1811 = vrcp.f32 %v1176_v58  ;;  %v1188_v19 = vand.u32 2147483648, %v1176_v58  ;;  %vm1182_vm3 = vweird.f32 %v1176_v58  ;;  %v1186_v20 = vand.u32 2147483647, %v1176_v58 }
0x14d2   :  { %v1243_v63 = vmul.f32 %v1808_v44, %v1242_v62 }
0x14d3   :  { %v1189_v28 = vor.u32 1.1754944e-38, %v1188_v19  ;;  %vm1187_vm7 = vcmp.eq.f32.partialorder %v1186_v20, 8.507059e+37 }
0x14d4   :  { %v1244_v7 = vadd.f32 %v1808_v44, %v1243_v63 }
0x14d6   :  { %v1248_v54 = vsel %vm1247_vm0, %v1808_v44, %v1244_v7 }
0x14d7   :  { %v1253_v55 = vsel %vm1250_vm1, %v1252_v45, %v1248_v54  ;;  %v1812_v59 = vpop.eup %1811 }
0x14d8   :  { %v1178_v61 = vmul.f32 %v1812_v59, %v1176_v58  ;;  %vm1183_vm2 = vweird.f32 %v1812_v59  ;;  %v1266_v40 = vsub.f32 1.0, %v1253_v55  ;;  %v1272_v33 = vmul.f32 %v1253_v55, %v2386_v37 }
0x14d9   :  { %vm1184_vm6 = vmor %vm1182_vm3, %vm1183_vm2 }
0x14da   :  { %v1179_v6 = vsub.f32 1.0, %v1178_v61 }
0x14dc   :  { %v1180_v15 = vmul.f32 %v1812_v59, %v1179_v6 }
0x14de   :  { %v1181_v11 = vadd.f32 %v1812_v59, %v1180_v15 }
0x14e0   :  { %v1185_v22 = vsel %vm1184_vm6, %v1812_v59, %v1181_v11 }
0x14e1   :  { %v1190_v34 = vsel %vm1187_vm7, %v1189_v28, %v1185_v22 }
0x14e2   :  { %v1203_v27 = vsub.f32 1.0, %v1190_v34  ;;  %v1209_v35 = vmul.f32 %v1190_v34, %v2393_v0 }
0x152c   :  { %v1257_v46 = vpop.permute.xlu0 %1256 }
0x152d   :  { %v1259_v56 = vmul.f32 %v1257_v46, %v1253_v55 }
0x152f   :  { %1261 = vrot.lane.b32.xlu1 %v1259_v56, %s1862_s11 }
0x1538   :  { %v1194_v30 = vpop.permute.xlu0 %1193 }
0x1539   :  { %v1196_v31 = vmul.f32 %v1194_v30, %v1190_v34 }
0x15a1   :  { %v1262_v9 = vpop.permute.xlu1 %1261 }
0x15a2   :  { %v1264_v13 = vadd.f32 %v1680_v51, %v1262_v9 }
0x15a4   :  { %1813 = vtanh.f32 %v1264_v13 }
0x15aa   :  { %v1814_v18 = vpop.eup %1813 }
0x15ab   :  { %1268 = vrot.lane.b32.xlu2 %v1814_v18, %s1863_s14 }
0x15b3   :  { %1198 = vrot.lane.b32.xlu2 %v1196_v31, %s1862_s11 }
0x1605   :  { %v1269_v32 = vpop.permute.xlu2 %1268 }
0x1606   :  { %v1271_v17 = vmul.f32 %v1269_v32, %v1266_v40 }
0x1608   :  { %v2409_v4 = vadd.f32 %v1272_v33, %v1271_v17 }
0x160a   :  { %1275 = vrot.lane.b32.xlu1 %v2409_v4, %s1863_s14 }
0x160d   :  { %v1199_v16 = vpop.permute.xlu2 %1198 }
0x160e   :  { %v1201_v23 = vadd.f32 %v1199_v16, %v1171_v50 }
0x1610   :  { %1815 = vtanh.f32 %v1201_v23 }
0x1616   :  { %v1816_v25 = vpop.eup %1815 }
0x1617   :  { %1205 = vrot.lane.b32.xlu0 %v1816_v25, %s1863_s14 }
0x167c   :  { %v1276_v26 = vpop.permute.xlu1 %1275 }
0x167d   :  { %1686 = vmatmul.msk.f32.vlgmr.msra.gmra.mxu1 %vm37_vm4, %v1276_v26 }
0x1689   :  { %v1206_v14 = vpop.permute.xlu0 %1205 }
0x168a   :  { %v1208_v37 = vmul.f32 %v1206_v14, %v1203_v27 }
0x168c   :  { %v2416_v24 = vadd.f32 %v1209_v35, %v1208_v37  ;;  %v1690_v35 = vld [vmem:[%s2486_s0 + $0x16] sm:$0x3] }
0x168e   :  { %v1278_v38 = vsel %vm37_vm4, %v1276_v26, %v2416_v24 }
0x168f   :  { %1683 = vmatmul.msk.f32.vlgmr.msra.gmra.mxu3 %vm117_vm5, %v1278_v38 }
0x16fa   :  { %v1361_v10 = vpop.f32.mrf.mxu1 }
0x16fb   :  { %v1362_v39 = vadd.f32 %v2248_v2, %v1361_v10 }
0x16fd   :  { %1385 = vrot.lane.b32.xlu1 %v1362_v39, %s1862_s11  ;;  %v1364_v21 = vadd.f32 %v1685_v47, %v1362_v39 }
0x16ff   :  { %v1687_v0 = vmul.f32 -1.442695, %v1364_v21 }
0x1701   :  { %1817 = vpow2.f32 %v1687_v0 }
0x1707   :  { %v1818_v48 = vpop.eup %1817 }
0x1708   :  { %v1368_v1 = vadd.f32 1.0, %v1818_v48 }
0x170a   :  { %1819 = vrcp.f32 %v1368_v1  ;;  %v1380_v44 = vand.u32 2147483648, %v1368_v1  ;;  %vm1374_vm9 = vweird.f32 %v1368_v1  ;;  %v1378_v60 = vand.u32 2147483647, %v1368_v1 }
0x170c   :  { %v1381_v63 = vor.u32 1.1754944e-38, %v1380_v44  ;;  %vm1379_vm11 = vcmp.eq.f32.partialorder %v1378_v60, 8.507059e+37 }
0x1710   :  { %v1820_v3 = vpop.eup %1819 }
0x1711   :  { %v1370_v50 = vmul.f32 %v1820_v3, %v1368_v1  ;;  %vm1375_vm8 = vweird.f32 %v1820_v3 }
0x1712   :  { %v1299_v41 = vpop.f32.mrf.mxu3  ;;  %vm1376_vm10 = vmor %vm1374_vm9, %vm1375_vm8 }
0x1713   :  { %v1300_v42 = vadd.f32 %v2348_v29, %v1299_v41  ;;  %v1371_v51 = vsub.f32 1.0, %v1370_v50 }
0x1715   :  { %1322 = vrot.lane.b32.xlu0 %v1300_v42, %s1864_s13  ;;  %v1684_v49 = vmul.f32 -1.442695, %v1300_v42  ;;  %v1372_v53 = vmul.f32 %v1820_v3, %v1371_v51 }
0x1717   :  { %1821 = vpow2.f32 %v1684_v49  ;;  %v1373_v52 = vadd.f32 %v1820_v3, %v1372_v53 }
0x1719   :  { %v1377_v62 = vsel %vm1376_vm10, %v1820_v3, %v1373_v52 }
0x171a   :  { %v1382_v8 = vsel %vm1379_vm11, %v1381_v63, %v1377_v62 }
0x171b   :  { %v1395_v22 = vsub.f32 1.0, %v1382_v8  ;;  %v1401_v30 = vmul.f32 %v1382_v8, %v2409_v4 }
0x171d   :  { %v1822_v36 = vpop.eup %1821 }
0x171e   :  { %v1305_v43 = vadd.f32 1.0, %v1822_v36 }
0x1720   :  { %1823 = vrcp.f32 %v1305_v43  ;;  %v1317_v5 = vand.u32 2147483648, %v1305_v43  ;;  %vm1311_vm13 = vweird.f32 %v1305_v43  ;;  %v1315_v57 = vand.u32 2147483647, %v1305_v43 }
0x1722   :  { %v1318_v59 = vor.u32 1.1754944e-38, %v1317_v5  ;;  %vm1316_vm15 = vcmp.eq.f32.partialorder %v1315_v57, 8.507059e+37 }
0x1726   :  { %v1824_v54 = vpop.eup %1823 }
0x1727   :  { %v1307_v45 = vmul.f32 %v1824_v54, %v1305_v43  ;;  %vm1312_vm12 = vweird.f32 %v1824_v54 }
0x1728   :  { %vm1313_vm14 = vmor %vm1311_vm13, %vm1312_vm12  ;;  %vm1631_vm13 = vcmask 1024  }
0x1729   :  { %v1308_v55 = vsub.f32 1.0, %v1307_v45 }
0x172b   :  { %v1309_v46 = vmul.f32 %v1824_v54, %v1308_v55 }
0x172d   :  { %v1310_v56 = vadd.f32 %v1824_v54, %v1309_v46 }
0x172f   :  { %v1314_v58 = vsel %vm1313_vm14, %v1824_v54, %v1310_v56 }
0x1730   :  { %v1319_v6 = vsel %vm1316_vm15, %v1318_v59, %v1314_v58 }
0x1731   :  { %v1332_v32 = vsub.f32 1.0, %v1319_v6  ;;  %v1338_v17 = vmul.f32 %v1319_v6, %v2416_v24 }
0x176f   :  { %v1386_v7 = vpop.permute.xlu1 %1385 }
0x1770   :  { %v1388_v12 = vmul.f32 %v1386_v7, %v1382_v8 }
0x1772   :  { %1390 = vrot.lane.b32.xlu2 %v1388_v12, %s1862_s11 }
0x1787   :  { %v1323_v61 = vpop.permute.xlu0 %1322 }
0x1788   :  { %v1325_v9 = vmul.f32 %v1323_v61, %v1319_v6 }
0x178a   :  { %1327 = vrot.lane.b32.xlu2 %v1325_v9, %s1862_s11 }
0x17cc   :  { %v1391_v13 = vpop.permute.xlu2 %1390 }
0x17cd   :  { %v1393_v15 = vadd.f32 %v1685_v47, %v1391_v13 }
0x17cf   :  { %1825 = vtanh.f32 %v1393_v15 }
0x17d5   :  { %v1826_v11 = vpop.eup %1825 }
0x17d6   :  { %1397 = vrot.lane.b32.xlu1 %v1826_v11, %s1863_s14 }
0x17e4   :  { %v1328_v18 = vpop.permute.xlu2 %1327 }
0x17e5   :  { %v1330_v19 = vadd.f32 %v1328_v18, %v1300_v42 }
0x17e7   :  { %1827 = vtanh.f32 %v1330_v19 }
0x17ed   :  { %v1828_v20 = vpop.eup %1827 }
0x17ee   :  { %1334 = vrot.lane.b32.xlu1 %v1828_v20, %s1863_s14 }
0x1848   :  { %v1398_v28 = vpop.permute.xlu1 %1397 }
0x1849   :  { %v1400_v34 = vmul.f32 %v1398_v28, %v1395_v22 }
0x184b   :  { %v2433_v31 = vadd.f32 %v1401_v30, %v1400_v34 }
0x184d   :  { %1404 = vrot.lane.b32.xlu0 %v2433_v31, %s1863_s14 }
0x1860   :  { %v1335_v40 = vpop.permute.xlu1 %1334 }
0x1861   :  { %v1337_v33 = vmul.f32 %v1335_v40, %v1332_v32 }
0x1863   :  { %v2438_v16 = vadd.f32 %v1338_v17, %v1337_v33 }
0x18bf   :  { %v1405_v23 = vpop.permute.xlu0 %1404 }
0x18c0   :  { %v1407_v25 = vsel %vm37_vm4, %v1405_v23, %v2438_v16  ;;  %1691 = vmatmul.msk.f32.vlgmr.msra.gmra.mxu0 %vm37_vm4, %v1405_v23 }
0x18c1   :  { %1688 = vmatmul.msk.f32.vlgmr.msrb.gmra.mxu2 %vm117_vm5, %v1407_v25 }
0x193d   :  { %v1490_v4 = vpop.f32.mrf.mxu0 }
0x193e   :  { %v1491_v26 = vadd.f32 %v2248_v2, %v1490_v4 }
0x1940   :  { %1514 = vrot.lane.b32.xlu2 %v1491_v26, %s1862_s11  ;;  %v1493_v37 = vadd.f32 %v1690_v35, %v1491_v26 }
0x1942   :  { %v1692_v24 = vmul.f32 -1.442695, %v1493_v37 }
0x1944   :  { %v1428_v27 = vpop.f32.mrf.mxu2  ;;  %1829 = vpow2.f32 %v1692_v24 }
0x1945   :  { %v1429_v14 = vadd.f32 %v2348_v29, %v1428_v27 }
0x1947   :  { %1451 = vrot.lane.b32.xlu0 %v1429_v14, %s1864_s13  ;;  %v1689_v42 = vmul.f32 -1.442695, %v1429_v14 }
0x194a   :  { %v1830_v38 = vpop.eup %1829 }
0x194b   :  { %v1497_v10 = vadd.f32 1.0, %v1830_v38 }
0x194d   :  { %1831 = vrcp.f32 %v1497_v10  ;;  %v1509_v0 = vand.u32 2147483648, %v1497_v10  ;;  %vm1503_vm1 = vweird.f32 %v1497_v10  ;;  %v1507_v48 = vand.u32 2147483647, %v1497_v10 }
0x194e   :  { %1833 = vpow2.f32 %v1689_v42  ;;  %v1599_v42 = vld [vmem:[%s2489_s5 + $0x8] sm:$0xff] }
0x194f   :  { %v1510_v49 = vor.u32 1.1754944e-38, %v1509_v0  ;;  %vm1508_vm3 = vcmp.eq.f32.partialorder %v1507_v48, 8.507059e+37 }
0x1953   :  { %v1832_v39 = vpop.eup %1831 }
0x1954   :  { %v1499_v41 = vmul.f32 %v1832_v39, %v1497_v10  ;;  %vm1504_vm0 = vweird.f32 %v1832_v39  ;;  %v1834_v1 = vpop.eup %1833 }
0x1955   :  { %vm1505_vm2 = vmor %vm1503_vm1, %vm1504_vm0  ;;  %v1434_v50 = vadd.f32 1.0, %v1834_v1 }
0x1956   :  { %v1500_v2 = vsub.f32 1.0, %v1499_v41  ;;  %v1601_v41 = vld [vmem:[%s2489_s5 + $0x18] sm:$0xff] }
0x1957   :  { %1835 = vrcp.f32 %v1434_v50  ;;  %v1446_v63 = vand.u32 2147483648, %v1434_v50  ;;  %vm1440_vm7 = vweird.f32 %v1434_v50  ;;  %v1444_v7 = vand.u32 2147483647, %v1434_v50  ;;  %1623 = vmatpush.msrb.mxu3 %v1601_v41 }
0x1958   :  { %v1501_v47 = vmul.f32 %v1832_v39, %v1500_v2  ;;  %v1600_v2 = vld [vmem:[%s2489_s5 + $0x10] sm:$0xff] }
0x1959   :  { %v1447_v12 = vor.u32 1.1754944e-38, %v1446_v63  ;;  %vm1445_vm9 = vcmp.eq.f32.partialorder %v1444_v7, 8.507059e+37  ;;  %1624 = vmatpush.msrb.mxu3 %v1600_v2 }
0x195a   :  { %v1502_v21 = vadd.f32 %v1832_v39, %v1501_v47  ;;  %v1598_v47 = vld [vmem:[%s2489_s5] sm:$0xff] }
0x195b   :  { %1625 = vmatpush.msrb.mxu3 %v1599_v42 }
0x195c   :  { %v1506_v3 = vsel %vm1505_vm2, %v1832_v39, %v1502_v21 }
0x195d   :  { %v1511_v51 = vsel %vm1508_vm3, %v1510_v49, %v1506_v3  ;;  %v1836_v43 = vpop.eup %1835  ;;  %1626 = vmatpush.msrb.mxu3 %v1598_v47  ;;  %v12_v49 = vstv %s2490_s6 }
0x195e   :  { %v1436_v52 = vmul.f32 %v1836_v43, %v1434_v50  ;;  %vm1441_vm6 = vweird.f32 %v1836_v43  ;;  %v1524_v61 = vsub.f32 1.0, %v1511_v51  ;;  %v1530_v9 = vmul.f32 %v1511_v51, %v2433_v31  ;;  %13 = vst [vmem:[#allocation2] sm:$0x1] %v12_v49 }
0x195f   :  { %vm1442_vm8 = vmor %vm1440_vm7, %vm1441_vm6 }
0x1960   :  { %v1437_v44 = vsub.f32 1.0, %v1436_v52 }
0x1962   :  { %v1438_v60 = vmul.f32 %v1836_v43, %v1437_v44 }
0x1964   :  { %v1439_v62 = vadd.f32 %v1836_v43, %v1438_v60 }
0x1966   :  { %v1443_v8 = vsel %vm1442_vm8, %v1836_v43, %v1439_v62 }
0x1967   :  { %v1448_v45 = vsel %vm1445_vm9, %v1447_v12, %v1443_v8 }
0x1968   :  { %v1461_v18 = vsub.f32 1.0, %v1448_v45  ;;  %v1467_v20 = vmul.f32 %v1448_v45, %v2438_v16 }
0x199a   :  { %v1515_v36 = vpop.permute.xlu2 %1514 }
0x199b   :  { %v1517_v53 = vmul.f32 %v1515_v36, %v1511_v51  ;;  %v1702_v51 = vld [vmem:[#allocation2] ss:$0 sm:$0xff] }
0x199d   :  { %1519 = vrot.lane.b32.xlu1 %v1517_v53, %s1862_s11 }
0x19b9   :  { %v1452_v54 = vpop.permute.xlu0 %1451 }
0x19ba   :  { %v1454_v55 = vmul.f32 %v1452_v54, %v1448_v45 }
0x19bc   :  { %1456 = vrot.lane.b32.xlu2 %v1454_v55, %s1862_s11 }
0x1a0f   :  { %v1520_v46 = vpop.permute.xlu1 %1519 }
0x1a10   :  { %v1522_v56 = vadd.f32 %v1690_v35, %v1520_v46 }
0x1a12   :  { %1837 = vtanh.f32 %v1522_v56 }
0x1a16   :  { %v1457_v5 = vpop.permute.xlu2 %1456 }
0x1a17   :  { %v1459_v57 = vadd.f32 %v1457_v5, %v1429_v14 }
0x1a18   :  { %v1838_v58 = vpop.eup %1837 }
0x1a19   :  { %1839 = vtanh.f32 %v1459_v57  ;;  %1526 = vrot.lane.b32.xlu0 %v1838_v58, %s1863_s14 }
0x1a1f   :  { %v1840_v59 = vpop.eup %1839 }
0x1a20   :  { %1463 = vrot.lane.b32.xlu1 %v1840_v59, %s1863_s14 }
0x1a8b   :  { %v1527_v6 = vpop.permute.xlu0 %1526 }
0x1a8c   :  { %v1529_v13 = vmul.f32 %v1527_v6, %v1524_v61 }
0x1a8e   :  { %v1531_v15 = vadd.f32 %v1530_v9, %v1529_v13 }
0x1a90   :  { %1533 = vrot.lane.b32.xlu2 %v1531_v15, %s1863_s14 }
0x1a92   :  { %v1464_v11 = vpop.permute.xlu1 %1463 }
0x1a93   :  { %v1466_v19 = vmul.f32 %v1464_v11, %v1461_v18 }
0x1a95   :  { %v1468_v22 = vadd.f32 %v1467_v20, %v1466_v19 }
0x1aea   :  { %v1534_v28 = vpop.permute.xlu2 %1533 }
0x1aeb   :  { %v1536_v30 = vsel %vm37_vm4, %v1534_v28, %v1468_v22 }
0x1aec   :  { %1693 = vmatmul.msk.f32.vlgmr.msrb.gmra.mxu1 %vm117_vm5, %v1536_v30 }
0x1b69   :  { %v1557_v34 = vpop.f32.mrf.mxu1 }
0x1b6a   :  { %v1558_v40 = vadd.f32 %v2348_v29, %v1557_v34 }
0x1b6c   :  { %1580 = vrot.lane.b32.xlu0 %v1558_v40, %s1864_s13  ;;  %v1694_v31 = vmul.f32 -1.442695, %v1558_v40 }
0x1b6e   :  { %1841 = vpow2.f32 %v1694_v31 }
0x1b74   :  { %v1842_v32 = vpop.eup %1841 }
0x1b75   :  { %v1563_v33 = vadd.f32 1.0, %v1842_v32 }
0x1b77   :  { %1843 = vrcp.f32 %v1563_v33  ;;  %v1575_v26 = vand.u32 2147483648, %v1563_v33  ;;  %vm1569_vm11 = vweird.f32 %v1563_v33  ;;  %v1573_v27 = vand.u32 2147483647, %v1563_v33 }
0x1b79   :  { %v1576_v35 = vor.u32 1.1754944e-38, %v1575_v26  ;;  %vm1574_vm12 = vcmp.eq.f32.partialorder %v1573_v27, 8.507059e+37 }
0x1b7d   :  { %v1844_v17 = vpop.eup %1843 }
0x1b7e   :  { %v1565_v23 = vmul.f32 %v1844_v17, %v1563_v33  ;;  %vm1570_vm10 = vweird.f32 %v1844_v17 }
0x1b7f   :  { %vm1571_vm5 = vmor %vm1569_vm11, %vm1570_vm10 }
0x1b80   :  { %v1566_v25 = vsub.f32 1.0, %v1565_v23 }
0x1b82   :  { %v1567_v16 = vmul.f32 %v1844_v17, %v1566_v25 }
0x1b84   :  { %v1568_v4 = vadd.f32 %v1844_v17, %v1567_v16 }
0x1b86   :  { %v1572_v14 = vsel %vm1571_vm5, %v1844_v17, %v1568_v4 }
0x1b87   :  { %v1577_v37 = vsel %vm1574_vm12, %v1576_v35, %v1572_v14 }
0x1b88   :  { %v1590_v21 = vsub.f32 1.0, %v1577_v37  ;;  %v1596_v48 = vmul.f32 %v1577_v37, %v1468_v22 }
0x1bde   :  { %v1581_v29 = vpop.permute.xlu0 %1580 }
0x1bdf   :  { %v1583_v24 = vmul.f32 %v1581_v29, %v1577_v37 }
0x1be1   :  { %1585 = vrot.lane.b32.xlu1 %v1583_v24, %s1862_s11 }
0x1c53   :  { %v1586_v38 = vpop.permute.xlu1 %1585 }
0x1c54   :  { %v1588_v10 = vadd.f32 %v1586_v38, %v1558_v40 }
0x1c56   :  { %1845 = vtanh.f32 %v1588_v10 }
0x1c5c   :  { %v1846_v39 = vpop.eup %1845 }
0x1c5d   :  { %1592 = vrot.lane.b32.xlu2 %v1846_v39, %s1863_s14 }
0x1cb7   :  { %v1593_v0 = vpop.permute.xlu2 %1592 }
0x1cb8   :  { %v1595_v1 = vmul.f32 %v1593_v0, %v1590_v21 }
0x1cba   :  { %v1597_v3 = vadd.f32 %v1596_v48, %v1595_v1 }
0x1cbc   :  { %1607 = vrot.lane.b32.xlu0 %v1597_v3, %s1863_s14 }
0x1d2e   :  { %v1608_v50 = vpop.permute.xlu0 %1607 }
0x1d2f   :  { %1695 = vmatmul.msk.f32.vlgmr.msrb.gmra.mxu3 %vm37_vm4, %v1608_v50 }
0x1db2   :  { %v1628_v36 = vpop.f32.mrf.mxu3 }
0x1db3   :  { %v1629_v53 = vadd.f32 %v1702_v51, %v1628_v36 }
0x1db5   :  { %1632 = vst.msk [vmem:[%s2491_s7] sm:$0x3] %vm1631_vm13, %v1629_v53 }

</bundles_post_ra>
